<compile_context>
chip_gen: v6e
topology: v6e:2x2x1
jax: 0.10.0
libtpu: 0.0.40
codegen_flags: <defaults>
</compile_context>

<pallas_src>
import math
import functools

import jax
import jax.numpy as jnp
from jax import lax
from jax.experimental import pallas as pl
from jax.experimental.pallas import tpu as pltpu


# ----------------------------------------------------------------------------
# BlockSpec helper (all operands are 2-D; block == full array, so no (8,128)
# divisibility constraint applies)
# ----------------------------------------------------------------------------

def _full_spec(shape):
    assert len(shape) == 2
    return pl.BlockSpec(tuple(shape), lambda i: (0, 0))


_COMPILER_PARAMS = pltpu.CompilerParams(dimension_semantics=("arbitrary",))


# ----------------------------------------------------------------------------
# In-kernel building blocks (operate on traced VMEM-resident values)
# ----------------------------------------------------------------------------

def _attention_core(q2d, k2d, v2d, mask, wo, bo, *, B, Sq, Sk, H, depth):
    """Multi-head scaled-dot-product attention + output projection.

    q2d: (B*Sq, H*depth), k2d/v2d: (B*Sk, H*depth), mask: (B, Sk) additive.
    Returns (B*Sq, H*depth).  Heads/batches are unrolled statically; only 2-D
    dots, static lane/sublane slices and concats are used (TPU-safe lowering).
    """
    scale = 1.0 / math.sqrt(depth)
    ctx_rows = []
    for b in range(B):
        mrow = mask[b:b + 1, :]                                   # (1, Sk)
        heads = []
        for h in range(H):
            qh = q2d[b * Sq:(b + 1) * Sq, h * depth:(h + 1) * depth]  # (Sq, d)
            kh = k2d[b * Sk:(b + 1) * Sk, h * depth:(h + 1) * depth]  # (Sk, d)
            vh = v2d[b * Sk:(b + 1) * Sk, h * depth:(h + 1) * depth]  # (Sk, d)
            # q @ k^T without materializing a transpose of k.
            s = lax.dot_general(
                qh, kh, dimension_numbers=(((1,), (1,)), ((), ())),
                preferred_element_type=jnp.float32) * scale            # (Sq, Sk)
            s = s + mrow                                               # bcast
            m = jnp.max(s, axis=-1, keepdims=True)
            p = jnp.exp(s - m)
            inv = pl.reciprocal(jnp.sum(p, axis=-1, keepdims=True), approx=True)
            attn_w = p * inv
            heads.append(jnp.dot(attn_w, vh,
                                 preferred_element_type=jnp.float32))  # (Sq, d)
        ctx_rows.append(jnp.concatenate(heads, axis=-1))               # (Sq, Dm)
    ctx = jnp.concatenate(ctx_rows, axis=0)                            # (B*Sq, Dm)
    return jnp.dot(ctx, wo, preferred_element_type=jnp.float32) + bo


def _ffn(x2d, w1, b1, w2, b2):
    h = jnp.maximum(
        jnp.dot(x2d, w1, preferred_element_type=jnp.float32) + b1, 0.0)
    return jnp.dot(h, w2, preferred_element_type=jnp.float32) + b2


# ----------------------------------------------------------------------------
# Fused layer kernels
# ----------------------------------------------------------------------------

def _encoder_layer_kernel(x_ref, mask_ref,
                          wqkv_ref, bqkv_ref, wo_ref, bo_ref,
                          w1_ref, b1_ref, w2_ref, b2_ref,
                          o_ref, *, B, S, H, depth):
    Dm = H * depth
    x2d = x_ref[...]                                                   # (B*S, Dm)
    mask = mask_ref[...]                                               # (B, S)

    # Fused QKV projection: one (B*S, Dm) @ (Dm, 3*Dm) matmul.
    qkv = jnp.dot(x2d, wqkv_ref[...],
                  preferred_element_type=jnp.float32) + bqkv_ref[...]
    attn = _attention_core(qkv[:, 0 * Dm:1 * Dm],
                           qkv[:, 1 * Dm:2 * Dm],
                           qkv[:, 2 * Dm:3 * Dm],
                           mask, wo_ref[...], bo_ref[...],
                           B=B, Sq=S, Sk=S, H=H, depth=depth)

    # Reference encoder layer: FFN applied directly to the attention output
    # (no residual, no layernorm).
    y = _ffn(attn, w1_ref[...], b1_ref[...], w2_ref[...], b2_ref[...])
    o_ref[...] = y.astype(o_ref.dtype)


def _decoder_layer_kernel(x_ref, enc_ref, smask_ref, tmask_ref,
                          s_wqkv_ref, s_bqkv_ref, s_wo_ref, s_bo_ref,
                          c_wq_ref, c_bq_ref, c_wkv_ref, c_bkv_ref,
                          c_wo_ref, c_bo_ref,
                          w1_ref, b1_ref, w2_ref, b2_ref,
                          o_ref, *, B, S, H, depth):
    Dm = H * depth
    x2d = x_ref[...]                                                   # (B*S, Dm)
    enc2d = enc_ref[...]                                               # (B*S, Dm)
    smask = smask_ref[...]
    tmask = tmask_ref[...]

    # Masked self-attention + residual.
    qkv = jnp.dot(x2d, s_wqkv_ref[...],
                  preferred_element_type=jnp.float32) + s_bqkv_ref[...]
    attn = _attention_core(qkv[:, 0 * Dm:1 * Dm],
                           qkv[:, 1 * Dm:2 * Dm],
                           qkv[:, 2 * Dm:3 * Dm],
                           tmask, s_wo_ref[...], s_bo_ref[...],
                           B=B, Sq=S, Sk=S, H=H, depth=depth)
    x2d = x2d + attn

    # Cross-attention (Q from decoder state, fused K/V from encoder output)
    # + residual.
    q2d = jnp.dot(x2d, c_wq_ref[...],
                  preferred_element_type=jnp.float32) + c_bq_ref[...]
    kv = jnp.dot(enc2d, c_wkv_ref[...],
                 preferred_element_type=jnp.float32) + c_bkv_ref[...]
    attn = _attention_core(q2d, kv[:, 0 * Dm:1 * Dm], kv[:, 1 * Dm:2 * Dm],
                           smask, c_wo_ref[...], c_bo_ref[...],
                           B=B, Sq=S, Sk=S, H=H, depth=depth)
    x2d = x2d + attn

    # FFN (no residual, per reference).
    y = _ffn(x2d, w1_ref[...], b1_ref[...], w2_ref[...], b2_ref[...])
    o_ref[...] = y.astype(o_ref.dtype)


def _out_proj_kernel(x_ref, w_ref, b_ref, o_ref):
    y = jnp.dot(x_ref[...], w_ref[...],
                preferred_element_type=jnp.float32) + b_ref[...]
    o_ref[...] = y.astype(o_ref.dtype)


# ----------------------------------------------------------------------------
# pallas_call wrappers (single grid step; everything fits in VMEM at these
# shapes; activations stay 2-D (B*S, feat) to avoid inter-kernel transposes)
# ----------------------------------------------------------------------------

def encoder_layer_pallas(x2d, mask, p, *, B, S, H, depth):
    Dm = H * depth
    mha, ffn = p["mha"], p["ffn"]
    args = (x2d, mask,
            mha["wqkv_w"], mha["wqkv_b"], mha["wo_w"], mha["wo_b"],
            ffn["ff1_w"], ffn["ff1_b"], ffn["ff2_w"], ffn["ff2_b"])
    kernel = functools.partial(_encoder_layer_kernel, B=B, S=S, H=H, depth=depth)
    return pl.pallas_call(
        kernel,
        out_shape=jax.ShapeDtypeStruct((B * S, Dm), x2d.dtype),
        grid=(1,),
        in_specs=[_full_spec(a.shape) for a in args],
        out_specs=_full_spec((B * S, Dm)),
        compiler_params=_COMPILER_PARAMS,
    )(*args)


def decoder_layer_pallas(x2d, enc2d, src_mask, tgt_mask, p, *, B, S, H, depth):
    Dm = H * depth
    smha, cmha, ffn = p["self_mha"], p["cross_mha"], p["ffn"]
    args = (x2d, enc2d, src_mask, tgt_mask,
            smha["wqkv_w"], smha["wqkv_b"], smha["wo_w"], smha["wo_b"],
            cmha["wq_w"], cmha["wq_b"], cmha["wkv_w"], cmha["wkv_b"],
            cmha["wo_w"], cmha["wo_b"],
            ffn["ff1_w"], ffn["ff1_b"], ffn["ff2_w"], ffn["ff2_b"])
    kernel = functools.partial(_decoder_layer_kernel, B=B, S=S, H=H, depth=depth)
    return pl.pallas_call(
        kernel,
        out_shape=jax.ShapeDtypeStruct((B * S, Dm), x2d.dtype),
        grid=(1,),
        in_specs=[_full_spec(a.shape) for a in args],
        out_specs=_full_spec((B * S, Dm)),
        compiler_params=_COMPILER_PARAMS,
    )(*args)


def out_proj_pallas(x2d, w, b):
    M, _ = x2d.shape
    N = w.shape[1]
    args = (x2d, w, b)
    return pl.pallas_call(
        _out_proj_kernel,
        out_shape=jax.ShapeDtypeStruct((M, N), x2d.dtype),
        grid=(1,),
        in_specs=[_full_spec(a.shape) for a in args],
        out_specs=_full_spec((M, N)),
        compiler_params=_COMPILER_PARAMS,
    )(*args)


# ----------------------------------------------------------------------------
# Full forward pass
# ----------------------------------------------------------------------------

def transformer_forward(params, src, tgt, src_mask, tgt_mask, *, num_heads):
    B, S, Dm = src.shape
    depth = Dm // num_heads

    x2d = src.reshape(B * S, Dm)
    for lp in params["encoder"]:
        x2d = encoder_layer_pallas(x2d, src_mask, lp,
                                   B=B, S=S, H=num_heads, depth=depth)
    enc2d = x2d

    y2d = tgt.reshape(B * S, Dm)
    for lp in params["decoder"]:
        y2d = decoder_layer_pallas(y2d, enc2d, src_mask, tgt_mask, lp,
                                   B=B, S=S, H=num_heads, depth=depth)

    logits2d = out_proj_pallas(y2d, params["out_w"], params["out_b"])
    vocab = params["out_w"].shape[1]
    return logits2d.reshape(B, S, vocab)


# ----------------------------------------------------------------------------
# Deterministic parameter init (weights stored as (in, out) = torch W^T;
# Q/K/V fused into one weight, K/V fused for cross-attention; biases (1, N))
# ----------------------------------------------------------------------------

def _init_linear(key, fan_in, fan_out):
    kw, kb = jax.random.split(key)
    w = jax.random.normal(kw, (fan_in, fan_out), jnp.float32) * 0.05
    b = jax.random.normal(kb, (1, fan_out), jnp.float32) * 0.05
    return w, b


def _init_self_mha(key, d_model):
    kq, kk, kv, ko = jax.random.split(key, 4)
    wq, bq = _init_linear(kq, d_model, d_model)
    wk, bk = _init_linear(kk, d_model, d_model)
    wv, bv = _init_linear(kv, d_model, d_model)
    wo, bo = _init_linear(ko, d_model, d_model)
    return {"wqkv_w": jnp.concatenate([wq, wk, wv], axis=1),
            "wqkv_b": jnp.concatenate([bq, bk, bv], axis=1),
            "wo_w": wo, "wo_b": bo}


def _init_cross_mha(key, d_model):
    kq, kk, kv, ko = jax.random.split(key, 4)
    wq, bq = _init_linear(kq, d_model, d_model)
    wk, bk = _init_linear(kk, d_model, d_model)
    wv, bv = _init_linear(kv, d_model, d_model)
    wo, bo = _init_linear(ko, d_model, d_model)
    return {"wq_w": wq, "wq_b": bq,
            "wkv_w": jnp.concatenate([wk, wv], axis=1),
            "wkv_b": jnp.concatenate([bk, bv], axis=1),
            "wo_w": wo, "wo_b": bo}


def _init_ffn(key, d_model, d_ff):
    k1, k2 = jax.random.split(key)
    w1, b1 = _init_linear(k1, d_model, d_ff)
    w2, b2 = _init_linear(k2, d_ff, d_model)
    return {"ff1_w": w1, "ff1_b": b1, "ff2_w": w2, "ff2_b": b2}


def init_params(key, num_enc, num_dec, d_model, d_ff, vocab):
    params = {"encoder": [], "decoder": []}
    for _ in range(num_enc):
        key, k1, k2 = jax.random.split(key, 3)
        params["encoder"].append({"mha": _init_self_mha(k1, d_model),
                                  "ffn": _init_ffn(k2, d_model, d_ff)})
    for _ in range(num_dec):
        key, k1, k2, k3 = jax.random.split(key, 4)
        params["decoder"].append({"self_mha": _init_self_mha(k1, d_model),
                                  "cross_mha": _init_cross_mha(k2, d_model),
                                  "ffn": _init_ffn(k3, d_model, d_ff)})
    key, ko = jax.random.split(key)
    params["out_w"], params["out_b"] = _init_linear(ko, d_model, vocab)
    return params


# ----------------------------------------------------------------------------
# main
# ----------------------------------------------------------------------------

if __name__ == "__main__":
    # Small shapes consistent with the module's forward.
    BATCH = 2
    SEQ = 8
    D_MODEL = 32
    NUM_HEADS = 4          # depth = 8
    D_FF = 64
    VOCAB = 128            # lane-dense final projection
    NUM_ENC = 2
    NUM_DEC = 2

    root = jax.random.PRNGKey(0)
    k_params, k_src, k_tgt = jax.random.split(root, 3)

    params = init_params(k_params, NUM_ENC, NUM_DEC, D_MODEL, D_FF, VOCAB)

    src = jax.random.normal(k_src, (BATCH, SEQ, D_MODEL), jnp.float32)
    tgt = jax.random.normal(k_tgt, (BATCH, SEQ, D_MODEL), jnp.float32)
    src_mask = jnp.ones((BATCH, SEQ), jnp.float32)
    tgt_mask = jnp.ones((BATCH, SEQ), jnp.float32)

    forward = jax.jit(functools.partial(transformer_forward,
                                        num_heads=NUM_HEADS))
    out = forward(params, src, tgt, src_mask, tgt_mask)
    out = jax.block_until_ready(out)

    assert out.shape == (BATCH, SEQ, VOCAB)
    assert bool(jnp.all(jnp.isfinite(out)))
    print("KERNEL_OK")
</pallas_src>

<mosaic_0001>
module attributes {stable_mosaic.version = 11 : i64} {
  func.func @_out_proj_kernel(%arg0: i32, %arg1: memref<16x32xf32, #tpu.memory_space<vmem>>, %arg2: memref<32x128xf32, #tpu.memory_space<vmem>>, %arg3: memref<1x128xf32, #tpu.memory_space<vmem>>, %arg4: memref<16x128xf32, #tpu.memory_space<vmem>>) attributes {dimension_semantics = [#tpu.dimension_semantics<arbitrary>], iteration_bounds = array<i64: 1>, scalar_prefetch = 0 : i64, scratch_operands = 0 : i64, tpu.core_type = #tpu.core_type<tc>, window_params = [{pipeline_mode = #tpu.pipeline_mode<synchronous>, transform_indices = @transform_0, window_bounds = array<i64: 16, 32>}, {pipeline_mode = #tpu.pipeline_mode<synchronous>, transform_indices = @transform_1, window_bounds = array<i64: 32, 128>}, {pipeline_mode = #tpu.pipeline_mode<synchronous>, transform_indices = @transform_2, window_bounds = array<i64: 1, 128>}, {pipeline_mode = #tpu.pipeline_mode<synchronous>, transform_indices = @transform_3, window_bounds = array<i64: 16, 128>}]} {
    %c0 = arith.constant 0 : index
    %c0_0 = arith.constant 0 : index
    %0 = vector.load %arg1[%c0, %c0_0] : memref<16x32xf32, #tpu.memory_space<vmem>>, vector<16x32xf32>
    %c0_1 = arith.constant 0 : index
    %c0_2 = arith.constant 0 : index
    %1 = vector.load %arg2[%c0_1, %c0_2] : memref<32x128xf32, #tpu.memory_space<vmem>>, vector<32x128xf32>
    %cst = arith.constant dense<0.000000e+00> : vector<16x128xf32>
    %2 = tpu.matmul %0, %1, %cst {dimension_numbers = #tpu.dot_dimension_numbers<[1], [0], [0], [1], [0, 0, 1, 1], [], []>} : vector<16x32xf32>, vector<32x128xf32>, vector<16x128xf32> -> vector<16x128xf32>
    %c0_3 = arith.constant 0 : index
    %c0_4 = arith.constant 0 : index
    %3 = vector.load %arg3[%c0_3, %c0_4] : memref<1x128xf32, #tpu.memory_space<vmem>>, vector<1x128xf32>
    %4 = vector.broadcast %3 : vector<1x128xf32> to vector<16x128xf32>
    %5 = arith.addf %2, %4 : vector<16x128xf32>
    %c0_5 = arith.constant 0 : index
    %c0_6 = arith.constant 0 : index
    %6 = vector.load %arg4[%c0_5, %c0_6] : memref<16x128xf32, #tpu.memory_space<vmem>>, vector<16x128xf32>
    tpu.vector_store %arg4[%c0_5, %c0_6], %5 {strides = array<i32>} : memref<16x128xf32, #tpu.memory_space<vmem>>, vector<16x128xf32>,
    return
  }
  func.func @transform_0(%arg0: i32) -> (i32, i32) {
    %c0_i32 = arith.constant 0 : i32
    %c0_i32_0 = arith.constant 0 : i32
    %c0_i32_1 = arith.constant 0 : i32
    return %c0_i32, %c0_i32_0 : i32, i32
  }
  func.func @transform_1(%arg0: i32) -> (i32, i32) {
    %c0_i32 = arith.constant 0 : i32
    %c0_i32_0 = arith.constant 0 : i32
    %c0_i32_1 = arith.constant 0 : i32
    return %c0_i32, %c0_i32_0 : i32, i32
  }
  func.func @transform_2(%arg0: i32) -> (i32, i32) {
    %c0_i32 = arith.constant 0 : i32
    %c0_i32_0 = arith.constant 0 : i32
    %c0_i32_1 = arith.constant 0 : i32
    return %c0_i32, %c0_i32_0 : i32, i32
  }
  func.func @transform_3(%arg0: i32) -> (i32, i32) {
    %c0_i32 = arith.constant 0 : i32
    %c0_i32_0 = arith.constant 0 : i32
    %c0_i32_1 = arith.constant 0 : i32
    return %c0_i32, %c0_i32_0 : i32, i32
  }
}

module attributes {stable_mosaic.version = 11 : i64} {
  func.func @_decoder_layer_kernel(%arg0: i32, %arg1: memref<16x32xf32, #tpu.memory_space<vmem>>, %arg2: memref<16x32xf32, #tpu.memory_space<vmem>>, %arg3: memref<2x8xf32, #tpu.memory_space<vmem>>, %arg4: memref<2x8xf32, #tpu.memory_space<vmem>>, %arg5: memref<32x96xf32, #tpu.memory_space<vmem>>, %arg6: memref<1x96xf32, #tpu.memory_space<vmem>>, %arg7: memref<32x32xf32, #tpu.memory_space<vmem>>, %arg8: memref<1x32xf32, #tpu.memory_space<vmem>>, %arg9: memref<32x32xf32, #tpu.memory_space<vmem>>, %arg10: memref<1x32xf32, #tpu.memory_space<vmem>>, %arg11: memref<32x64xf32, #tpu.memory_space<vmem>>, %arg12: memref<1x64xf32, #tpu.memory_space<vmem>>, %arg13: memref<32x32xf32, #tpu.memory_space<vmem>>, %arg14: memref<1x32xf32, #tpu.memory_space<vmem>>, %arg15: memref<32x64xf32, #tpu.memory_space<vmem>>, %arg16: memref<1x64xf32, #tpu.memory_space<vmem>>, %arg17: memref<64x32xf32, #tpu.memory_space<vmem>>, %arg18: memref<1x32xf32, #tpu.memory_space<vmem>>, %arg19: memref<16x32xf32, #tpu.memory_space<vmem>>) attributes {dimension_semantics = [#tpu.dimension_semantics<arbitrary>], iteration_bounds = array<i64: 1>, scalar_prefetch = 0 : i64, scratch_operands = 0 : i64, tpu.core_type = #tpu.core_type<tc>, window_params = [{pipeline_mode = #tpu.pipeline_mode<synchronous>, transform_indices = @transform_0, window_bounds = array<i64: 16, 32>}, {pipeline_mode = #tpu.pipeline_mode<synchronous>, transform_indices = @transform_1, window_bounds = array<i64: 16, 32>}, {pipeline_mode = #tpu.pipeline_mode<synchronous>, transform_indices = @transform_2, window_bounds = array<i64: 2, 8>}, {pipeline_mode = #tpu.pipeline_mode<synchronous>, transform_indices = @transform_3, window_bounds = array<i64: 2, 8>}, {pipeline_mode = #tpu.pipeline_mode<synchronous>, transform_indices = @transform_4, window_bounds = array<i64: 32, 96>}, {pipeline_mode = #tpu.pipeline_mode<synchronous>, transform_indices = @transform_5, window_bounds = array<i64: 1, 96>}, {pipeline_mode = #tpu.pipeline_mode<synchronous>, transform_indices = @transform_6, window_bounds = array<i64: 32, 32>}, {pipeline_mode = #tpu.pipeline_mode<synchronous>, transform_indices = @transform_7, window_bounds = array<i64: 1, 32>}, {pipeline_mode = #tpu.pipeline_mode<synchronous>, transform_indices = @transform_8, window_bounds = array<i64: 32, 32>}, {pipeline_mode = #tpu.pipeline_mode<synchronous>, transform_indices = @transform_9, window_bounds = array<i64: 1, 32>}, {pipeline_mode = #tpu.pipeline_mode<synchronous>, transform_indices = @transform_10, window_bounds = array<i64: 32, 64>}, {pipeline_mode = #tpu.pipeline_mode<synchronous>, transform_indices = @transform_11, window_bounds = array<i64: 1, 64>}, {pipeline_mode = #tpu.pipeline_mode<synchronous>, transform_indices = @transform_12, window_bounds = array<i64: 32, 32>}, {pipeline_mode = #tpu.pipeline_mode<synchronous>, transform_indices = @transform_13, window_bounds = array<i64: 1, 32>}, {pipeline_mode = #tpu.pipeline_mode<synchronous>, transform_indices = @transform_14, window_bounds = array<i64: 32, 64>}, {pipeline_mode = #tpu.pipeline_mode<synchronous>, transform_indices = @transform_15, window_bounds = array<i64: 1, 64>}, {pipeline_mode = #tpu.pipeline_mode<synchronous>, transform_indices = @transform_16, window_bounds = array<i64: 64, 32>}, {pipeline_mode = #tpu.pipeline_mode<synchronous>, transform_indices = @transform_17, window_bounds = array<i64: 1, 32>}, {pipeline_mode = #tpu.pipeline_mode<synchronous>, transform_indices = @transform_18, window_bounds = array<i64: 16, 32>}]} {
    %c0 = arith.constant 0 : index
    %c0_0 = arith.constant 0 : index
    %0 = vector.load %arg1[%c0, %c0_0] : memref<16x32xf32, #tpu.memory_space<vmem>>, vector<16x32xf32>
    %c0_1 = arith.constant 0 : index
    %c0_2 = arith.constant 0 : index
    %1 = vector.load %arg2[%c0_1, %c0_2] : memref<16x32xf32, #tpu.memory_space<vmem>>, vector<16x32xf32>
    %c0_3 = arith.constant 0 : index
    %c0_4 = arith.constant 0 : index
    %2 = vector.load %arg3[%c0_3, %c0_4] : memref<2x8xf32, #tpu.memory_space<vmem>>, vector<2x8xf32>
    %c0_5 = arith.constant 0 : index
    %c0_6 = arith.constant 0 : index
    %3 = vector.load %arg4[%c0_5, %c0_6] : memref<2x8xf32, #tpu.memory_space<vmem>>, vector<2x8xf32>
    %c0_7 = arith.constant 0 : index
    %c0_8 = arith.constant 0 : index
    %4 = vector.load %arg5[%c0_7, %c0_8] : memref<32x96xf32, #tpu.memory_space<vmem>>, vector<32x96xf32>
    %cst = arith.constant dense<0.000000e+00> : vector<16x96xf32>
    %5 = tpu.matmul %0, %4, %cst {dimension_numbers = #tpu.dot_dimension_numbers<[1], [0], [0], [1], [0, 0, 1, 1], [], []>} : vector<16x32xf32>, vector<32x96xf32>, vector<16x96xf32> -> vector<16x96xf32>
    %c0_9 = arith.constant 0 : index
    %c0_10 = arith.constant 0 : index
    %6 = vector.load %arg6[%c0_9, %c0_10] : memref<1x96xf32, #tpu.memory_space<vmem>>, vector<1x96xf32>
    %7 = vector.broadcast %6 : vector<1x96xf32> to vector<16x96xf32>
    %8 = arith.addf %5, %7 : vector<16x96xf32>
    %9 = vector.extract_strided_slice %8 {offsets = [0, 0], sizes = [16, 32], strides = [1, 1]} : vector<16x96xf32> to vector<16x32xf32>
    %10 = vector.extract_strided_slice %8 {offsets = [0, 32], sizes = [16, 32], strides = [1, 1]} : vector<16x96xf32> to vector<16x32xf32>
    %11 = vector.extract_strided_slice %8 {offsets = [0, 64], sizes = [16, 32], strides = [1, 1]} : vector<16x96xf32> to vector<16x32xf32>
    %c0_11 = arith.constant 0 : index
    %c0_12 = arith.constant 0 : index
    %12 = vector.load %arg7[%c0_11, %c0_12] : memref<32x32xf32, #tpu.memory_space<vmem>>, vector<32x32xf32>
    %c0_13 = arith.constant 0 : index
    %c0_14 = arith.constant 0 : index
    %13 = vector.load %arg8[%c0_13, %c0_14] : memref<1x32xf32, #tpu.memory_space<vmem>>, vector<1x32xf32>
    %14 = vector.extract_strided_slice %3 {offsets = [0, 0], sizes = [1, 8], strides = [1, 1]} : vector<2x8xf32> to vector<1x8xf32>
    %15 = vector.extract_strided_slice %9 {offsets = [0, 0], sizes = [8, 8], strides = [1, 1]} : vector<16x32xf32> to vector<8x8xf32>
    %16 = vector.extract_strided_slice %10 {offsets = [0, 0], sizes = [8, 8], strides = [1, 1]} : vector<16x32xf32> to vector<8x8xf32>
    %17 = vector.extract_strided_slice %11 {offsets = [0, 0], sizes = [8, 8], strides = [1, 1]} : vector<16x32xf32> to vector<8x8xf32>
    %cst_15 = arith.constant dense<0.000000e+00> : vector<8x8xf32>
    %18 = tpu.matmul %15, %16, %cst_15 {dimension_numbers = #tpu.dot_dimension_numbers<[1], [1], [0], [0], [0, 0, 1, 0], [], []>} : vector<8x8xf32>, vector<8x8xf32>, vector<8x8xf32> -> vector<8x8xf32>
    %cst_16 = arith.constant 0.353553385 : f32
    %19 = vector.broadcast %cst_16 : f32 to vector<8x8xf32>
    %20 = arith.mulf %18, %19 : vector<8x8xf32>
    %21 = vector.broadcast %14 : vector<1x8xf32> to vector<8x8xf32>
    %22 = arith.addf %20, %21 : vector<8x8xf32>
    %cst_17 = arith.constant dense<0xFF800000> : vector<8xf32>
    %23 = vector.multi_reduction <maximumf>, %22, %cst_17 [1] : vector<8x8xf32> to vector<8xf32>
    %24 = vector.shape_cast %23 : vector<8xf32> to vector<8x1xf32>
    %25 = vector.broadcast %24 : vector<8x1xf32> to vector<8x8xf32>
    %26 = arith.subf %22, %25 : vector<8x8xf32>
    %27 = math.exp %26 : vector<8x8xf32>
    %cst_18 = arith.constant dense<0.000000e+00> : vector<8xf32>
    %28 = vector.multi_reduction <add>, %27, %cst_18 [1] : vector<8x8xf32> to vector<8xf32>
    %29 = vector.shape_cast %28 : vector<8xf32> to vector<8x1xf32>
    %30 = tpu.reciprocal %29 {approx = true} : vector<8x1xf32> -> vector<8x1xf32>
    %31 = vector.broadcast %30 : vector<8x1xf32> to vector<8x8xf32>
    %32 = arith.mulf %27, %31 : vector<8x8xf32>
    %cst_19 = arith.constant dense<0.000000e+00> : vector<8x8xf32>
    %33 = tpu.matmul %32, %17, %cst_19 {dimension_numbers = #tpu.dot_dimension_numbers<[1], [0], [0], [1], [0, 0, 1, 1], [], []>} : vector<8x8xf32>, vector<8x8xf32>, vector<8x8xf32> -> vector<8x8xf32>
    %34 = vector.extract_strided_slice %9 {offsets = [0, 8], sizes = [8, 8], strides = [1, 1]} : vector<16x32xf32> to vector<8x8xf32>
    %35 = vector.extract_strided_slice %10 {offsets = [0, 8], sizes = [8, 8], strides = [1, 1]} : vector<16x32xf32> to vector<8x8xf32>
    %36 = vector.extract_strided_slice %11 {offsets = [0, 8], sizes = [8, 8], strides = [1, 1]} : vector<16x32xf32> to vector<8x8xf32>
    %cst_20 = arith.constant dense<0.000000e+00> : vector<8x8xf32>
    %37 = tpu.matmul %34, %35, %cst_20 {dimension_numbers = #tpu.dot_dimension_numbers<[1], [1], [0], [0], [0, 0, 1, 0], [], []>} : vector<8x8xf32>, vector<8x8xf32>, vector<8x8xf32> -> vector<8x8xf32>
    %cst_21 = arith.constant 0.353553385 : f32
    %38 = vector.broadcast %cst_21 : f32 to vector<8x8xf32>
    %39 = arith.mulf %37, %38 : vector<8x8xf32>
    %40 = vector.broadcast %14 : vector<1x8xf32> to vector<8x8xf32>
    %41 = arith.addf %39, %40 : vector<8x8xf32>
    %cst_22 = arith.constant dense<0xFF800000> : vector<8xf32>
    %42 = vector.multi_reduction <maximumf>, %41, %cst_22 [1] : vector<8x8xf32> to vector<8xf32>
    %43 = vector.shape_cast %42 : vector<8xf32> to vector<8x1xf32>
    %44 = vector.broadcast %43 : vector<8x1xf32> to vector<8x8xf32>
    %45 = arith.subf %41, %44 : vector<8x8xf32>
    %46 = math.exp %45 : vector<8x8xf32>
    %cst_23 = arith.constant dense<0.000000e+00> : vector<8xf32>
    %47 = vector.multi_reduction <add>, %46, %cst_23 [1] : vector<8x8xf32> to vector<8xf32>
    %48 = vector.shape_cast %47 : vector<8xf32> to vector<8x1xf32>
    %49 = tpu.reciprocal %48 {approx = true} : vector<8x1xf32> -> vector<8x1xf32>
    %50 = vector.broadcast %49 : vector<8x1xf32> to vector<8x8xf32>
    %51 = arith.mulf %46, %50 : vector<8x8xf32>
    %cst_24 = arith.constant dense<0.000000e+00> : vector<8x8xf32>
    %52 = tpu.matmul %51, %36, %cst_24 {dimension_numbers = #tpu.dot_dimension_numbers<[1], [0], [0], [1], [0, 0, 1, 1], [], []>} : vector<8x8xf32>, vector<8x8xf32>, vector<8x8xf32> -> vector<8x8xf32>
    %53 = vector.extract_strided_slice %9 {offsets = [0, 16], sizes = [8, 8], strides = [1, 1]} : vector<16x32xf32> to vector<8x8xf32>
    %54 = vector.extract_strided_slice %10 {offsets = [0, 16], sizes = [8, 8], strides = [1, 1]} : vector<16x32xf32> to vector<8x8xf32>
    %55 = vector.extract_strided_slice %11 {offsets = [0, 16], sizes = [8, 8], strides = [1, 1]} : vector<16x32xf32> to vector<8x8xf32>
    %cst_25 = arith.constant dense<0.000000e+00> : vector<8x8xf32>
    %56 = tpu.matmul %53, %54, %cst_25 {dimension_numbers = #tpu.dot_dimension_numbers<[1], [1], [0], [0], [0, 0, 1, 0], [], []>} : vector<8x8xf32>, vector<8x8xf32>, vector<8x8xf32> -> vector<8x8xf32>
    %cst_26 = arith.constant 0.353553385 : f32
    %57 = vector.broadcast %cst_26 : f32 to vector<8x8xf32>
    %58 = arith.mulf %56, %57 : vector<8x8xf32>
    %59 = vector.broadcast %14 : vector<1x8xf32> to vector<8x8xf32>
    %60 = arith.addf %58, %59 : vector<8x8xf32>
    %cst_27 = arith.constant dense<0xFF800000> : vector<8xf32>
    %61 = vector.multi_reduction <maximumf>, %60, %cst_27 [1] : vector<8x8xf32> to vector<8xf32>
    %62 = vector.shape_cast %61 : vector<8xf32> to vector<8x1xf32>
    %63 = vector.broadcast %62 : vector<8x1xf32> to vector<8x8xf32>
    %64 = arith.subf %60, %63 : vector<8x8xf32>
    %65 = math.exp %64 : vector<8x8xf32>
    %cst_28 = arith.constant dense<0.000000e+00> : vector<8xf32>
    %66 = vector.multi_reduction <add>, %65, %cst_28 [1] : vector<8x8xf32> to vector<8xf32>
    %67 = vector.shape_cast %66 : vector<8xf32> to vector<8x1xf32>
    %68 = tpu.reciprocal %67 {approx = true} : vector<8x1xf32> -> vector<8x1xf32>
    %69 = vector.broadcast %68 : vector<8x1xf32> to vector<8x8xf32>
    %70 = arith.mulf %65, %69 : vector<8x8xf32>
    %cst_29 = arith.constant dense<0.000000e+00> : vector<8x8xf32>
    %71 = tpu.matmul %70, %55, %cst_29 {dimension_numbers = #tpu.dot_dimension_numbers<[1], [0], [0], [1], [0, 0, 1, 1], [], []>} : vector<8x8xf32>, vector<8x8xf32>, vector<8x8xf32> -> vector<8x8xf32>
    %72 = vector.extract_strided_slice %9 {offsets = [0, 24], sizes = [8, 8], strides = [1, 1]} : vector<16x32xf32> to vector<8x8xf32>
    %73 = vector.extract_strided_slice %10 {offsets = [0, 24], sizes = [8, 8], strides = [1, 1]} : vector<16x32xf32> to vector<8x8xf32>
    %74 = vector.extract_strided_slice %11 {offsets = [0, 24], sizes = [8, 8], strides = [1, 1]} : vector<16x32xf32> to vector<8x8xf32>
    %cst_30 = arith.constant dense<0.000000e+00> : vector<8x8xf32>
    %75 = tpu.matmul %72, %73, %cst_30 {dimension_numbers = #tpu.dot_dimension_numbers<[1], [1], [0], [0], [0, 0, 1, 0], [], []>} : vector<8x8xf32>, vector<8x8xf32>, vector<8x8xf32> -> vector<8x8xf32>
    %cst_31 = arith.constant 0.353553385 : f32
    %76 = vector.broadcast %cst_31 : f32 to vector<8x8xf32>
    %77 = arith.mulf %75, %76 : vector<8x8xf32>
    %78 = vector.broadcast %14 : vector<1x8xf32> to vector<8x8xf32>
    %79 = arith.addf %77, %78 : vector<8x8xf32>
    %cst_32 = arith.constant dense<0xFF800000> : vector<8xf32>
    %80 = vector.multi_reduction <maximumf>, %79, %cst_32 [1] : vector<8x8xf32> to vector<8xf32>
    %81 = vector.shape_cast %80 : vector<8xf32> to vector<8x1xf32>
    %82 = vector.broadcast %81 : vector<8x1xf32> to vector<8x8xf32>
    %83 = arith.subf %79, %82 : vector<8x8xf32>
    %84 = math.exp %83 : vector<8x8xf32>
    %cst_33 = arith.constant dense<0.000000e+00> : vector<8xf32>
    %85 = vector.multi_reduction <add>, %84, %cst_33 [1] : vector<8x8xf32> to vector<8xf32>
    %86 = vector.shape_cast %85 : vector<8xf32> to vector<8x1xf32>
    %87 = tpu.reciprocal %86 {approx = true} : vector<8x1xf32> -> vector<8x1xf32>
    %88 = vector.broadcast %87 : vector<8x1xf32> to vector<8x8xf32>
    %89 = arith.mulf %84, %88 : vector<8x8xf32>
    %cst_34 = arith.constant dense<0.000000e+00> : vector<8x8xf32>
    %90 = tpu.matmul %89, %74, %cst_34 {dimension_numbers = #tpu.dot_dimension_numbers<[1], [0], [0], [1], [0, 0, 1, 1], [], []>} : vector<8x8xf32>, vector<8x8xf32>, vector<8x8xf32> -> vector<8x8xf32>
    %91 = tpu.concatenate %33, %52, %71, %90 in 1 : vector<8x8xf32>, vector<8x8xf32>, vector<8x8xf32>, vector<8x8xf32> -> vector<8x32xf32>
    %92 = vector.extract_strided_slice %3 {offsets = [1, 0], sizes = [1, 8], strides = [1, 1]} : vector<2x8xf32> to vector<1x8xf32>
    %93 = vector.extract_strided_slice %9 {offsets = [8, 0], sizes = [8, 8], strides = [1, 1]} : vector<16x32xf32> to vector<8x8xf32>
    %94 = vector.extract_strided_slice %10 {offsets = [8, 0], sizes = [8, 8], strides = [1, 1]} : vector<16x32xf32> to vector<8x8xf32>
    %95 = vector.extract_strided_slice %11 {offsets = [8, 0], sizes = [8, 8], strides = [1, 1]} : vector<16x32xf32> to vector<8x8xf32>
    %cst_35 = arith.constant dense<0.000000e+00> : vector<8x8xf32>
    %96 = tpu.matmul %93, %94, %cst_35 {dimension_numbers = #tpu.dot_dimension_numbers<[1], [1], [0], [0], [0, 0, 1, 0], [], []>} : vector<8x8xf32>, vector<8x8xf32>, vector<8x8xf32> -> vector<8x8xf32>
    %cst_36 = arith.constant 0.353553385 : f32
    %97 = vector.broadcast %cst_36 : f32 to vector<8x8xf32>
    %98 = arith.mulf %96, %97 : vector<8x8xf32>
    %99 = vector.broadcast %92 : vector<1x8xf32> to vector<8x8xf32>
    %100 = arith.addf %98, %99 : vector<8x8xf32>
    %cst_37 = arith.constant dense<0xFF800000> : vector<8xf32>
    %101 = vector.multi_reduction <maximumf>, %100, %cst_37 [1] : vector<8x8xf32> to vector<8xf32>
    %102 = vector.shape_cast %101 : vector<8xf32> to vector<8x1xf32>
    %103 = vector.broadcast %102 : vector<8x1xf32> to vector<8x8xf32>
    %104 = arith.subf %100, %103 : vector<8x8xf32>
    %105 = math.exp %104 : vector<8x8xf32>
    %cst_38 = arith.constant dense<0.000000e+00> : vector<8xf32>
    %106 = vector.multi_reduction <add>, %105, %cst_38 [1] : vector<8x8xf32> to vector<8xf32>
    %107 = vector.shape_cast %106 : vector<8xf32> to vector<8x1xf32>
    %108 = tpu.reciprocal %107 {approx = true} : vector<8x1xf32> -> vector<8x1xf32>
    %109 = vector.broadcast %108 : vector<8x1xf32> to vector<8x8xf32>
    %110 = arith.mulf %105, %109 : vector<8x8xf32>
    %cst_39 = arith.constant dense<0.000000e+00> : vector<8x8xf32>
    %111 = tpu.matmul %110, %95, %cst_39 {dimension_numbers = #tpu.dot_dimension_numbers<[1], [0], [0], [1], [0, 0, 1, 1], [], []>} : vector<8x8xf32>, vector<8x8xf32>, vector<8x8xf32> -> vector<8x8xf32>
    %112 = vector.extract_strided_slice %9 {offsets = [8, 8], sizes = [8, 8], strides = [1, 1]} : vector<16x32xf32> to vector<8x8xf32>
    %113 = vector.extract_strided_slice %10 {offsets = [8, 8], sizes = [8, 8], strides = [1, 1]} : vector<16x32xf32> to vector<8x8xf32>
    %114 = vector.extract_strided_slice %11 {offsets = [8, 8], sizes = [8, 8], strides = [1, 1]} : vector<16x32xf32> to vector<8x8xf32>
    %cst_40 = arith.constant dense<0.000000e+00> : vector<8x8xf32>
    %115 = tpu.matmul %112, %113, %cst_40 {dimension_numbers = #tpu.dot_dimension_numbers<[1], [1], [0], [0], [0, 0, 1, 0], [], []>} : vector<8x8xf32>, vector<8x8xf32>, vector<8x8xf32> -> vector<8x8xf32>
    %cst_41 = arith.constant 0.353553385 : f32
    %116 = vector.broadcast %cst_41 : f32 to vector<8x8xf32>
    %117 = arith.mulf %115, %116 : vector<8x8xf32>
    %118 = vector.broadcast %92 : vector<1x8xf32> to vector<8x8xf32>
    %119 = arith.addf %117, %118 : vector<8x8xf32>
    %cst_42 = arith.constant dense<0xFF800000> : vector<8xf32>
    %120 = vector.multi_reduction <maximumf>, %119, %cst_42 [1] : vector<8x8xf32> to vector<8xf32>
    %121 = vector.shape_cast %120 : vector<8xf32> to vector<8x1xf32>
    %122 = vector.broadcast %121 : vector<8x1xf32> to vector<8x8xf32>
    %123 = arith.subf %119, %122 : vector<8x8xf32>
    %124 = math.exp %123 : vector<8x8xf32>
    %cst_43 = arith.constant dense<0.000000e+00> : vector<8xf32>
    %125 = vector.multi_reduction <add>, %124, %cst_43 [1] : vector<8x8xf32> to vector<8xf32>
    %126 = vector.shape_cast %125 : vector<8xf32> to vector<8x1xf32>
    %127 = tpu.reciprocal %126 {approx = true} : vector<8x1xf32> -> vector<8x1xf32>
    %128 = vector.broadcast %127 : vector<8x1xf32> to vector<8x8xf32>
    %129 = arith.mulf %124, %128 : vector<8x8xf32>
    %cst_44 = arith.constant dense<0.000000e+00> : vector<8x8xf32>
    %130 = tpu.matmul %129, %114, %cst_44 {dimension_numbers = #tpu.dot_dimension_numbers<[1], [0], [0], [1], [0, 0, 1, 1], [], []>} : vector<8x8xf32>, vector<8x8xf32>, vector<8x8xf32> -> vector<8x8xf32>
    %131 = vector.extract_strided_slice %9 {offsets = [8, 16], sizes = [8, 8], strides = [1, 1]} : vector<16x32xf32> to vector<8x8xf32>
    %132 = vector.extract_strided_slice %10 {offsets = [8, 16], sizes = [8, 8], strides = [1, 1]} : vector<16x32xf32> to vector<8x8xf32>
    %133 = vector.extract_strided_slice %11 {offsets = [8, 16], sizes = [8, 8], strides = [1, 1]} : vector<16x32xf32> to vector<8x8xf32>
    %cst_45 = arith.constant dense<0.000000e+00> : vector<8x8xf32>
    %134 = tpu.matmul %131, %132, %cst_45 {dimension_numbers = #tpu.dot_dimension_numbers<[1], [1], [0], [0], [0, 0, 1, 0], [], []>} : vector<8x8xf32>, vector<8x8xf32>, vector<8x8xf32> -> vector<8x8xf32>
    %cst_46 = arith.constant 0.353553385 : f32
    %135 = vector.broadcast %cst_46 : f32 to vector<8x8xf32>
    %136 = arith.mulf %134, %135 : vector<8x8xf32>
    %137 = vector.broadcast %92 : vector<1x8xf32> to vector<8x8xf32>
    %138 = arith.addf %136, %137 : vector<8x8xf32>
    %cst_47 = arith.constant dense<0xFF800000> : vector<8xf32>
    %139 = vector.multi_reduction <maximumf>, %138, %cst_47 [1] : vector<8x8xf32> to vector<8xf32>
    %140 = vector.shape_cast %139 : vector<8xf32> to vector<8x1xf32>
    %141 = vector.broadcast %140 : vector<8x1xf32> to vector<8x8xf32>
    %142 = arith.subf %138, %141 : vector<8x8xf32>
    %143 = math.exp %142 : vector<8x8xf32>
    %cst_48 = arith.constant dense<0.000000e+00> : vector<8xf32>
    %144 = vector.multi_reduction <add>, %143, %cst_48 [1] : vector<8x8xf32> to vector<8xf32>
    %145 = vector.shape_cast %144 : vector<8xf32> to vector<8x1xf32>
    %146 = tpu.reciprocal %145 {approx = true} : vector<8x1xf32> -> vector<8x1xf32>
    %147 = vector.broadcast %146 : vector<8x1xf32> to vector<8x8xf32>
    %148 = arith.mulf %143, %147 : vector<8x8xf32>
    %cst_49 = arith.constant dense<0.000000e+00> : vector<8x8xf32>
    %149 = tpu.matmul %148, %133, %cst_49 {dimension_numbers = #tpu.dot_dimension_numbers<[1], [0], [0], [1], [0, 0, 1, 1], [], []>} : vector<8x8xf32>, vector<8x8xf32>, vector<8x8xf32> -> vector<8x8xf32>
    %150 = vector.extract_strided_slice %9 {offsets = [8, 24], sizes = [8, 8], strides = [1, 1]} : vector<16x32xf32> to vector<8x8xf32>
    %151 = vector.extract_strided_slice %10 {offsets = [8, 24], sizes = [8, 8], strides = [1, 1]} : vector<16x32xf32> to vector<8x8xf32>
    %152 = vector.extract_strided_slice %11 {offsets = [8, 24], sizes = [8, 8], strides = [1, 1]} : vector<16x32xf32> to vector<8x8xf32>
    %cst_50 = arith.constant dense<0.000000e+00> : vector<8x8xf32>
    %153 = tpu.matmul %150, %151, %cst_50 {dimension_numbers = #tpu.dot_dimension_numbers<[1], [1], [0], [0], [0, 0, 1, 0], [], []>} : vector<8x8xf32>, vector<8x8xf32>, vector<8x8xf32> -> vector<8x8xf32>
    %cst_51 = arith.constant 0.353553385 : f32
    %154 = vector.broadcast %cst_51 : f32 to vector<8x8xf32>
    %155 = arith.mulf %153, %154 : vector<8x8xf32>
    %156 = vector.broadcast %92 : vector<1x8xf32> to vector<8x8xf32>
    %157 = arith.addf %155, %156 : vector<8x8xf32>
    %cst_52 = arith.constant dense<0xFF800000> : vector<8xf32>
    %158 = vector.multi_reduction <maximumf>, %157, %cst_52 [1] : vector<8x8xf32> to vector<8xf32>
    %159 = vector.shape_cast %158 : vector<8xf32> to vector<8x1xf32>
    %160 = vector.broadcast %159 : vector<8x1xf32> to vector<8x8xf32>
    %161 = arith.subf %157, %160 : vector<8x8xf32>
    %162 = math.exp %161 : vector<8x8xf32>
    %cst_53 = arith.constant dense<0.000000e+00> : vector<8xf32>
    %163 = vector.multi_reduction <add>, %162, %cst_53 [1] : vector<8x8xf32> to vector<8xf32>
    %164 = vector.shape_cast %163 : vector<8xf32> to vector<8x1xf32>
    %165 = tpu.reciprocal %164 {approx = true} : vector<8x1xf32> -> vector<8x1xf32>
    %166 = vector.broadcast %165 : vector<8x1xf32> to vector<8x8xf32>
    %167 = arith.mulf %162, %166 : vector<8x8xf32>
    %cst_54 = arith.constant dense<0.000000e+00> : vector<8x8xf32>
    %168 = tpu.matmul %167, %152, %cst_54 {dimension_numbers = #tpu.dot_dimension_numbers<[1], [0], [0], [1], [0, 0, 1, 1], [], []>} : vector<8x8xf32>, vector<8x8xf32>, vector<8x8xf32> -> vector<8x8xf32>
    %169 = tpu.concatenate %111, %130, %149, %168 in 1 : vector<8x8xf32>, vector<8x8xf32>, vector<8x8xf32>, vector<8x8xf32> -> vector<8x32xf32>
    %170 = tpu.concatenate %91, %169 in 0 : vector<8x32xf32>, vector<8x32xf32> -> vector<16x32xf32>
    %cst_55 = arith.constant dense<0.000000e+00> : vector<16x32xf32>
    %171 = tpu.matmul %170, %12, %cst_55 {dimension_numbers = #tpu.dot_dimension_numbers<[1], [0], [0], [1], [0, 0, 1, 1], [], []>} : vector<16x32xf32>, vector<32x32xf32>, vector<16x32xf32> -> vector<16x32xf32>
    %172 = vector.broadcast %13 : vector<1x32xf32> to vector<16x32xf32>
    %173 = arith.addf %171, %172 : vector<16x32xf32>
    %174 = arith.addf %0, %173 : vector<16x32xf32>
    %c0_56 = arith.constant 0 : index
    %c0_57 = arith.constant 0 : index
    %175 = vector.load %arg9[%c0_56, %c0_57] : memref<32x32xf32, #tpu.memory_space<vmem>>, vector<32x32xf32>
    %cst_58 = arith.constant dense<0.000000e+00> : vector<16x32xf32>
    %176 = tpu.matmul %174, %175, %cst_58 {dimension_numbers = #tpu.dot_dimension_numbers<[1], [0], [0], [1], [0, 0, 1, 1], [], []>} : vector<16x32xf32>, vector<32x32xf32>, vector<16x32xf32> -> vector<16x32xf32>
    %c0_59 = arith.constant 0 : index
    %c0_60 = arith.constant 0 : index
    %177 = vector.load %arg10[%c0_59, %c0_60] : memref<1x32xf32, #tpu.memory_space<vmem>>, vector<1x32xf32>
    %178 = vector.broadcast %177 : vector<1x32xf32> to vector<16x32xf32>
    %179 = arith.addf %176, %178 : vector<16x32xf32>
    %c0_61 = arith.constant 0 : index
    %c0_62 = arith.constant 0 : index
    %180 = vector.load %arg11[%c0_61, %c0_62] : memref<32x64xf32, #tpu.memory_space<vmem>>, vector<32x64xf32>
    %cst_63 = arith.constant dense<0.000000e+00> : vector<16x64xf32>
    %181 = tpu.matmul %1, %180, %cst_63 {dimension_numbers = #tpu.dot_dimension_numbers<[1], [0], [0], [1], [0, 0, 1, 1], [], []>} : vector<16x32xf32>, vector<32x64xf32>, vector<16x64xf32> -> vector<16x64xf32>
    %c0_64 = arith.constant 0 : index
    %c0_65 = arith.constant 0 : index
    %182 = vector.load %arg12[%c0_64, %c0_65] : memref<1x64xf32, #tpu.memory_space<vmem>>, vector<1x64xf32>
    %183 = vector.broadcast %182 : vector<1x64xf32> to vector<16x64xf32>
    %184 = arith.addf %181, %183 : vector<16x64xf32>
    %185 = vector.extract_strided_slice %184 {offsets = [0, 0], sizes = [16, 32], strides = [1, 1]} : vector<16x64xf32> to vector<16x32xf32>
    %186 = vector.extract_strided_slice %184 {offsets = [0, 32], sizes = [16, 32], strides = [1, 1]} : vector<16x64xf32> to vector<16x32xf32>
    %c0_66 = arith.constant 0 : index
    %c0_67 = arith.constant 0 : index
    %187 = vector.load %arg13[%c0_66, %c0_67] : memref<32x32xf32, #tpu.memory_space<vmem>>, vector<32x32xf32>
    %c0_68 = arith.constant 0 : index
    %c0_69 = arith.constant 0 : index
    %188 = vector.load %arg14[%c0_68, %c0_69] : memref<1x32xf32, #tpu.memory_space<vmem>>, vector<1x32xf32>
    %189 = vector.extract_strided_slice %2 {offsets = [0, 0], sizes = [1, 8], strides = [1, 1]} : vector<2x8xf32> to vector<1x8xf32>
    %190 = vector.extract_strided_slice %179 {offsets = [0, 0], sizes = [8, 8], strides = [1, 1]} : vector<16x32xf32> to vector<8x8xf32>
    %191 = vector.extract_strided_slice %185 {offsets = [0, 0], sizes = [8, 8], strides = [1, 1]} : vector<16x32xf32> to vector<8x8xf32>
    %192 = vector.extract_strided_slice %186 {offsets = [0, 0], sizes = [8, 8], strides = [1, 1]} : vector<16x32xf32> to vector<8x8xf32>
    %cst_70 = arith.constant dense<0.000000e+00> : vector<8x8xf32>
    %193 = tpu.matmul %190, %191, %cst_70 {dimension_numbers = #tpu.dot_dimension_numbers<[1], [1], [0], [0], [0, 0, 1, 0], [], []>} : vector<8x8xf32>, vector<8x8xf32>, vector<8x8xf32> -> vector<8x8xf32>
    %cst_71 = arith.constant 0.353553385 : f32
    %194 = vector.broadcast %cst_71 : f32 to vector<8x8xf32>
    %195 = arith.mulf %193, %194 : vector<8x8xf32>
    %196 = vector.broadcast %189 : vector<1x8xf32> to vector<8x8xf32>
    %197 = arith.addf %195, %196 : vector<8x8xf32>
    %cst_72 = arith.constant dense<0xFF800000> : vector<8xf32>
    %198 = vector.multi_reduction <maximumf>, %197, %cst_72 [1] : vector<8x8xf32> to vector<8xf32>
    %199 = vector.shape_cast %198 : vector<8xf32> to vector<8x1xf32>
    %200 = vector.broadcast %199 : vector<8x1xf32> to vector<8x8xf32>
    %201 = arith.subf %197, %200 : vector<8x8xf32>
    %202 = math.exp %201 : vector<8x8xf32>
    %cst_73 = arith.constant dense<0.000000e+00> : vector<8xf32>
    %203 = vector.multi_reduction <add>, %202, %cst_73 [1] : vector<8x8xf32> to vector<8xf32>
    %204 = vector.shape_cast %203 : vector<8xf32> to vector<8x1xf32>
    %205 = tpu.reciprocal %204 {approx = true} : vector<8x1xf32> -> vector<8x1xf32>
    %206 = vector.broadcast %205 : vector<8x1xf32> to vector<8x8xf32>
    %207 = arith.mulf %202, %206 : vector<8x8xf32>
    %cst_74 = arith.constant dense<0.000000e+00> : vector<8x8xf32>
    %208 = tpu.matmul %207, %192, %cst_74 {dimension_numbers = #tpu.dot_dimension_numbers<[1], [0], [0], [1], [0, 0, 1, 1], [], []>} : vector<8x8xf32>, vector<8x8xf32>, vector<8x8xf32> -> vector<8x8xf32>
    %209 = vector.extract_strided_slice %179 {offsets = [0, 8], sizes = [8, 8], strides = [1, 1]} : vector<16x32xf32> to vector<8x8xf32>
    %210 = vector.extract_strided_slice %185 {offsets = [0, 8], sizes = [8, 8], strides = [1, 1]} : vector<16x32xf32> to vector<8x8xf32>
    %211 = vector.extract_strided_slice %186 {offsets = [0, 8], sizes = [8, 8], strides = [1, 1]} : vector<16x32xf32> to vector<8x8xf32>
    %cst_75 = arith.constant dense<0.000000e+00> : vector<8x8xf32>
    %212 = tpu.matmul %209, %210, %cst_75 {dimension_numbers = #tpu.dot_dimension_numbers<[1], [1], [0], [0], [0, 0, 1, 0], [], []>} : vector<8x8xf32>, vector<8x8xf32>, vector<8x8xf32> -> vector<8x8xf32>
    %cst_76 = arith.constant 0.353553385 : f32
    %213 = vector.broadcast %cst_76 : f32 to vector<8x8xf32>
    %214 = arith.mulf %212, %213 : vector<8x8xf32>
    %215 = vector.broadcast %189 : vector<1x8xf32> to vector<8x8xf32>
    %216 = arith.addf %214, %215 : vector<8x8xf32>
    %cst_77 = arith.constant dense<0xFF800000> : vector<8xf32>
    %217 = vector.multi_reduction <maximumf>, %216, %cst_77 [1] : vector<8x8xf32> to vector<8xf32>
    %218 = vector.shape_cast %217 : vector<8xf32> to vector<8x1xf32>
    %219 = vector.broadcast %218 : vector<8x1xf32> to vector<8x8xf32>
    %220 = arith.subf %216, %219 : vector<8x8xf32>
    %221 = math.exp %220 : vector<8x8xf32>
    %cst_78 = arith.constant dense<0.000000e+00> : vector<8xf32>
    %222 = vector.multi_reduction <add>, %221, %cst_78 [1] : vector<8x8xf32> to vector<8xf32>
    %223 = vector.shape_cast %222 : vector<8xf32> to vector<8x1xf32>
    %224 = tpu.reciprocal %223 {approx = true} : vector<8x1xf32> -> vector<8x1xf32>
    %225 = vector.broadcast %224 : vector<8x1xf32> to vector<8x8xf32>
    %226 = arith.mulf %221, %225 : vector<8x8xf32>
    %cst_79 = arith.constant dense<0.000000e+00> : vector<8x8xf32>
    %227 = tpu.matmul %226, %211, %cst_79 {dimension_numbers = #tpu.dot_dimension_numbers<[1], [0], [0], [1], [0, 0, 1, 1], [], []>} : vector<8x8xf32>, vector<8x8xf32>, vector<8x8xf32> -> vector<8x8xf32>
    %228 = vector.extract_strided_slice %179 {offsets = [0, 16], sizes = [8, 8], strides = [1, 1]} : vector<16x32xf32> to vector<8x8xf32>
    %229 = vector.extract_strided_slice %185 {offsets = [0, 16], sizes = [8, 8], strides = [1, 1]} : vector<16x32xf32> to vector<8x8xf32>
    %230 = vector.extract_strided_slice %186 {offsets = [0, 16], sizes = [8, 8], strides = [1, 1]} : vector<16x32xf32> to vector<8x8xf32>
    %cst_80 = arith.constant dense<0.000000e+00> : vector<8x8xf32>
    %231 = tpu.matmul %228, %229, %cst_80 {dimension_numbers = #tpu.dot_dimension_numbers<[1], [1], [0], [0], [0, 0, 1, 0], [], []>} : vector<8x8xf32>, vector<8x8xf32>, vector<8x8xf32> -> vector<8x8xf32>
    %cst_81 = arith.constant 0.353553385 : f32
    %232 = vector.broadcast %cst_81 : f32 to vector<8x8xf32>
    %233 = arith.mulf %231, %232 : vector<8x8xf32>
    %234 = vector.broadcast %189 : vector<1x8xf32> to vector<8x8xf32>
    %235 = arith.addf %233, %234 : vector<8x8xf32>
    %cst_82 = arith.constant dense<0xFF800000> : vector<8xf32>
    %236 = vector.multi_reduction <maximumf>, %235, %cst_82 [1] : vector<8x8xf32> to vector<8xf32>
    %237 = vector.shape_cast %236 : vector<8xf32> to vector<8x1xf32>
    %238 = vector.broadcast %237 : vector<8x1xf32> to vector<8x8xf32>
    %239 = arith.subf %235, %238 : vector<8x8xf32>
    %240 = math.exp %239 : vector<8x8xf32>
    %cst_83 = arith.constant dense<0.000000e+00> : vector<8xf32>
    %241 = vector.multi_reduction <add>, %240, %cst_83 [1] : vector<8x8xf32> to vector<8xf32>
    %242 = vector.shape_cast %241 : vector<8xf32> to vector<8x1xf32>
    %243 = tpu.reciprocal %242 {approx = true} : vector<8x1xf32> -> vector<8x1xf32>
    %244 = vector.broadcast %243 : vector<8x1xf32> to vector<8x8xf32>
    %245 = arith.mulf %240, %244 : vector<8x8xf32>
    %cst_84 = arith.constant dense<0.000000e+00> : vector<8x8xf32>
    %246 = tpu.matmul %245, %230, %cst_84 {dimension_numbers = #tpu.dot_dimension_numbers<[1], [0], [0], [1], [0, 0, 1, 1], [], []>} : vector<8x8xf32>, vector<8x8xf32>, vector<8x8xf32> -> vector<8x8xf32>
    %247 = vector.extract_strided_slice %179 {offsets = [0, 24], sizes = [8, 8], strides = [1, 1]} : vector<16x32xf32> to vector<8x8xf32>
    %248 = vector.extract_strided_slice %185 {offsets = [0, 24], sizes = [8, 8], strides = [1, 1]} : vector<16x32xf32> to vector<8x8xf32>
    %249 = vector.extract_strided_slice %186 {offsets = [0, 24], sizes = [8, 8], strides = [1, 1]} : vector<16x32xf32> to vector<8x8xf32>
    %cst_85 = arith.constant dense<0.000000e+00> : vector<8x8xf32>
    %250 = tpu.matmul %247, %248, %cst_85 {dimension_numbers = #tpu.dot_dimension_numbers<[1], [1], [0], [0], [0, 0, 1, 0], [], []>} : vector<8x8xf32>, vector<8x8xf32>, vector<8x8xf32> -> vector<8x8xf32>
    %cst_86 = arith.constant 0.353553385 : f32
    %251 = vector.broadcast %cst_86 : f32 to vector<8x8xf32>
    %252 = arith.mulf %250, %251 : vector<8x8xf32>
    %253 = vector.broadcast %189 : vector<1x8xf32> to vector<8x8xf32>
    %254 = arith.addf %252, %253 : vector<8x8xf32>
    %cst_87 = arith.constant dense<0xFF800000> : vector<8xf32>
    %255 = vector.multi_reduction <maximumf>, %254, %cst_87 [1] : vector<8x8xf32> to vector<8xf32>
    %256 = vector.shape_cast %255 : vector<8xf32> to vector<8x1xf32>
    %257 = vector.broadcast %256 : vector<8x1xf32> to vector<8x8xf32>
    %258 = arith.subf %254, %257 : vector<8x8xf32>
    %259 = math.exp %258 : vector<8x8xf32>
    %cst_88 = arith.constant dense<0.000000e+00> : vector<8xf32>
    %260 = vector.multi_reduction <add>, %259, %cst_88 [1] : vector<8x8xf32> to vector<8xf32>
    %261 = vector.shape_cast %260 : vector<8xf32> to vector<8x1xf32>
    %262 = tpu.reciprocal %261 {approx = true} : vector<8x1xf32> -> vector<8x1xf32>
    %263 = vector.broadcast %262 : vector<8x1xf32> to vector<8x8xf32>
    %264 = arith.mulf %259, %263 : vector<8x8xf32>
    %cst_89 = arith.constant dense<0.000000e+00> : vector<8x8xf32>
    %265 = tpu.matmul %264, %249, %cst_89 {dimension_numbers = #tpu.dot_dimension_numbers<[1], [0], [0], [1], [0, 0, 1, 1], [], []>} : vector<8x8xf32>, vector<8x8xf32>, vector<8x8xf32> -> vector<8x8xf32>
    %266 = tpu.concatenate %208, %227, %246, %265 in 1 : vector<8x8xf32>, vector<8x8xf32>, vector<8x8xf32>, vector<8x8xf32> -> vector<8x32xf32>
    %267 = vector.extract_strided_slice %2 {offsets = [1, 0], sizes = [1, 8], strides = [1, 1]} : vector<2x8xf32> to vector<1x8xf32>
    %268 = vector.extract_strided_slice %179 {offsets = [8, 0], sizes = [8, 8], strides = [1, 1]} : vector<16x32xf32> to vector<8x8xf32>
    %269 = vector.extract_strided_slice %185 {offsets = [8, 0], sizes = [8, 8], strides = [1, 1]} : vector<16x32xf32> to vector<8x8xf32>
    %270 = vector.extract_strided_slice %186 {offsets = [8, 0], sizes = [8, 8], strides = [1, 1]} : vector<16x32xf32> to vector<8x8xf32>
    %cst_90 = arith.constant dense<0.000000e+00> : vector<8x8xf32>
    %271 = tpu.matmul %268, %269, %cst_90 {dimension_numbers = #tpu.dot_dimension_numbers<[1], [1], [0], [0], [0, 0, 1, 0], [], []>} : vector<8x8xf32>, vector<8x8xf32>, vector<8x8xf32> -> vector<8x8xf32>
    %cst_91 = arith.constant 0.353553385 : f32
    %272 = vector.broadcast %cst_91 : f32 to vector<8x8xf32>
    %273 = arith.mulf %271, %272 : vector<8x8xf32>
    %274 = vector.broadcast %267 : vector<1x8xf32> to vector<8x8xf32>
    %275 = arith.addf %273, %274 : vector<8x8xf32>
    %cst_92 = arith.constant dense<0xFF800000> : vector<8xf32>
    %276 = vector.multi_reduction <maximumf>, %275, %cst_92 [1] : vector<8x8xf32> to vector<8xf32>
    %277 = vector.shape_cast %276 : vector<8xf32> to vector<8x1xf32>
    %278 = vector.broadcast %277 : vector<8x1xf32> to vector<8x8xf32>
    %279 = arith.subf %275, %278 : vector<8x8xf32>
    %280 = math.exp %279 : vector<8x8xf32>
    %cst_93 = arith.constant dense<0.000000e+00> : vector<8xf32>
    %281 = vector.multi_reduction <add>, %280, %cst_93 [1] : vector<8x8xf32> to vector<8xf32>
    %282 = vector.shape_cast %281 : vector<8xf32> to vector<8x1xf32>
    %283 = tpu.reciprocal %282 {approx = true} : vector<8x1xf32> -> vector<8x1xf32>
    %284 = vector.broadcast %283 : vector<8x1xf32> to vector<8x8xf32>
    %285 = arith.mulf %280, %284 : vector<8x8xf32>
    %cst_94 = arith.constant dense<0.000000e+00> : vector<8x8xf32>
    %286 = tpu.matmul %285, %270, %cst_94 {dimension_numbers = #tpu.dot_dimension_numbers<[1], [0], [0], [1], [0, 0, 1, 1], [], []>} : vector<8x8xf32>, vector<8x8xf32>, vector<8x8xf32> -> vector<8x8xf32>
    %287 = vector.extract_strided_slice %179 {offsets = [8, 8], sizes = [8, 8], strides = [1, 1]} : vector<16x32xf32> to vector<8x8xf32>
    %288 = vector.extract_strided_slice %185 {offsets = [8, 8], sizes = [8, 8], strides = [1, 1]} : vector<16x32xf32> to vector<8x8xf32>
    %289 = vector.extract_strided_slice %186 {offsets = [8, 8], sizes = [8, 8], strides = [1, 1]} : vector<16x32xf32> to vector<8x8xf32>
    %cst_95 = arith.constant dense<0.000000e+00> : vector<8x8xf32>
    %290 = tpu.matmul %287, %288, %cst_95 {dimension_numbers = #tpu.dot_dimension_numbers<[1], [1], [0], [0], [0, 0, 1, 0], [], []>} : vector<8x8xf32>, vector<8x8xf32>, vector<8x8xf32> -> vector<8x8xf32>
    %cst_96 = arith.constant 0.353553385 : f32
    %291 = vector.broadcast %cst_96 : f32 to vector<8x8xf32>
    %292 = arith.mulf %290, %291 : vector<8x8xf32>
    %293 = vector.broadcast %267 : vector<1x8xf32> to vector<8x8xf32>
    %294 = arith.addf %292, %293 : vector<8x8xf32>
    %cst_97 = arith.constant dense<0xFF800000> : vector<8xf32>
    %295 = vector.multi_reduction <maximumf>, %294, %cst_97 [1] : vector<8x8xf32> to vector<8xf32>
    %296 = vector.shape_cast %295 : vector<8xf32> to vector<8x1xf32>
    %297 = vector.broadcast %296 : vector<8x1xf32> to vector<8x8xf32>
    %298 = arith.subf %294, %297 : vector<8x8xf32>
    %299 = math.exp %298 : vector<8x8xf32>
    %cst_98 = arith.constant dense<0.000000e+00> : vector<8xf32>
    %300 = vector.multi_reduction <add>, %299, %cst_98 [1] : vector<8x8xf32> to vector<8xf32>
    %301 = vector.shape_cast %300 : vector<8xf32> to vector<8x1xf32>
    %302 = tpu.reciprocal %301 {approx = true} : vector<8x1xf32> -> vector<8x1xf32>
    %303 = vector.broadcast %302 : vector<8x1xf32> to vector<8x8xf32>
    %304 = arith.mulf %299, %303 : vector<8x8xf32>
    %cst_99 = arith.constant dense<0.000000e+00> : vector<8x8xf32>
    %305 = tpu.matmul %304, %289, %cst_99 {dimension_numbers = #tpu.dot_dimension_numbers<[1], [0], [0], [1], [0, 0, 1, 1], [], []>} : vector<8x8xf32>, vector<8x8xf32>, vector<8x8xf32> -> vector<8x8xf32>
    %306 = vector.extract_strided_slice %179 {offsets = [8, 16], sizes = [8, 8], strides = [1, 1]} : vector<16x32xf32> to vector<8x8xf32>
    %307 = vector.extract_strided_slice %185 {offsets = [8, 16], sizes = [8, 8], strides = [1, 1]} : vector<16x32xf32> to vector<8x8xf32>
    %308 = vector.extract_strided_slice %186 {offsets = [8, 16], sizes = [8, 8], strides = [1, 1]} : vector<16x32xf32> to vector<8x8xf32>
    %cst_100 = arith.constant dense<0.000000e+00> : vector<8x8xf32>
    %309 = tpu.matmul %306, %307, %cst_100 {dimension_numbers = #tpu.dot_dimension_numbers<[1], [1], [0], [0], [0, 0, 1, 0], [], []>} : vector<8x8xf32>, vector<8x8xf32>, vector<8x8xf32> -> vector<8x8xf32>
    %cst_101 = arith.constant 0.353553385 : f32
    %310 = vector.broadcast %cst_101 : f32 to vector<8x8xf32>
    %311 = arith.mulf %309, %310 : vector<8x8xf32>
    %312 = vector.broadcast %267 : vector<1x8xf32> to vector<8x8xf32>
    %313 = arith.addf %311, %312 : vector<8x8xf32>
    %cst_102 = arith.constant dense<0xFF800000> : vector<8xf32>
    %314 = vector.multi_reduction <maximumf>, %313, %cst_102 [1] : vector<8x8xf32> to vector<8xf32>
    %315 = vector.shape_cast %314 : vector<8xf32> to vector<8x1xf32>
    %316 = vector.broadcast %315 : vector<8x1xf32> to vector<8x8xf32>
    %317 = arith.subf %313, %316 : vector<8x8xf32>
    %318 = math.exp %317 : vector<8x8xf32>
    %cst_103 = arith.constant dense<0.000000e+00> : vector<8xf32>
    %319 = vector.multi_reduction <add>, %318, %cst_103 [1] : vector<8x8xf32> to vector<8xf32>
    %320 = vector.shape_cast %319 : vector<8xf32> to vector<8x1xf32>
    %321 = tpu.reciprocal %320 {approx = true} : vector<8x1xf32> -> vector<8x1xf32>
    %322 = vector.broadcast %321 : vector<8x1xf32> to vector<8x8xf32>
    %323 = arith.mulf %318, %322 : vector<8x8xf32>
    %cst_104 = arith.constant dense<0.000000e+00> : vector<8x8xf32>
    %324 = tpu.matmul %323, %308, %cst_104 {dimension_numbers = #tpu.dot_dimension_numbers<[1], [0], [0], [1], [0, 0, 1, 1], [], []>} : vector<8x8xf32>, vector<8x8xf32>, vector<8x8xf32> -> vector<8x8xf32>
    %325 = vector.extract_strided_slice %179 {offsets = [8, 24], sizes = [8, 8], strides = [1, 1]} : vector<16x32xf32> to vector<8x8xf32>
    %326 = vector.extract_strided_slice %185 {offsets = [8, 24], sizes = [8, 8], strides = [1, 1]} : vector<16x32xf32> to vector<8x8xf32>
    %327 = vector.extract_strided_slice %186 {offsets = [8, 24], sizes = [8, 8], strides = [1, 1]} : vector<16x32xf32> to vector<8x8xf32>
    %cst_105 = arith.constant dense<0.000000e+00> : vector<8x8xf32>
    %328 = tpu.matmul %325, %326, %cst_105 {dimension_numbers = #tpu.dot_dimension_numbers<[1], [1], [0], [0], [0, 0, 1, 0], [], []>} : vector<8x8xf32>, vector<8x8xf32>, vector<8x8xf32> -> vector<8x8xf32>
    %cst_106 = arith.constant 0.353553385 : f32
    %329 = vector.broadcast %cst_106 : f32 to vector<8x8xf32>
    %330 = arith.mulf %328, %329 : vector<8x8xf32>
    %331 = vector.broadcast %267 : vector<1x8xf32> to vector<8x8xf32>
    %332 = arith.addf %330, %331 : vector<8x8xf32>
    %cst_107 = arith.constant dense<0xFF800000> : vector<8xf32>
    %333 = vector.multi_reduction <maximumf>, %332, %cst_107 [1] : vector<8x8xf32> to vector<8xf32>
    %334 = vector.shape_cast %333 : vector<8xf32> to vector<8x1xf32>
    %335 = vector.broadcast %334 : vector<8x1xf32> to vector<8x8xf32>
    %336 = arith.subf %332, %335 : vector<8x8xf32>
    %337 = math.exp %336 : vector<8x8xf32>
    %cst_108 = arith.constant dense<0.000000e+00> : vector<8xf32>
    %338 = vector.multi_reduction <add>, %337, %cst_108 [1] : vector<8x8xf32> to vector<8xf32>
    %339 = vector.shape_cast %338 : vector<8xf32> to vector<8x1xf32>
    %340 = tpu.reciprocal %339 {approx = true} : vector<8x1xf32> -> vector<8x1xf32>
    %341 = vector.broadcast %340 : vector<8x1xf32> to vector<8x8xf32>
    %342 = arith.mulf %337, %341 : vector<8x8xf32>
    %cst_109 = arith.constant dense<0.000000e+00> : vector<8x8xf32>
    %343 = tpu.matmul %342, %327, %cst_109 {dimension_numbers = #tpu.dot_dimension_numbers<[1], [0], [0], [1], [0, 0, 1, 1], [], []>} : vector<8x8xf32>, vector<8x8xf32>, vector<8x8xf32> -> vector<8x8xf32>
    %344 = tpu.concatenate %286, %305, %324, %343 in 1 : vector<8x8xf32>, vector<8x8xf32>, vector<8x8xf32>, vector<8x8xf32> -> vector<8x32xf32>
    %345 = tpu.concatenate %266, %344 in 0 : vector<8x32xf32>, vector<8x32xf32> -> vector<16x32xf32>
    %cst_110 = arith.constant dense<0.000000e+00> : vector<16x32xf32>
    %346 = tpu.matmul %345, %187, %cst_110 {dimension_numbers = #tpu.dot_dimension_numbers<[1], [0], [0], [1], [0, 0, 1, 1], [], []>} : vector<16x32xf32>, vector<32x32xf32>, vector<16x32xf32> -> vector<16x32xf32>
    %347 = vector.broadcast %188 : vector<1x32xf32> to vector<16x32xf32>
    %348 = arith.addf %346, %347 : vector<16x32xf32>
    %349 = arith.addf %174, %348 : vector<16x32xf32>
    %c0_111 = arith.constant 0 : index
    %c0_112 = arith.constant 0 : index
    %350 = vector.load %arg15[%c0_111, %c0_112] : memref<32x64xf32, #tpu.memory_space<vmem>>, vector<32x64xf32>
    %c0_113 = arith.constant 0 : index
    %c0_114 = arith.constant 0 : index
    %351 = vector.load %arg16[%c0_113, %c0_114] : memref<1x64xf32, #tpu.memory_space<vmem>>, vector<1x64xf32>
    %c0_115 = arith.constant 0 : index
    %c0_116 = arith.constant 0 : index
    %352 = vector.load %arg17[%c0_115, %c0_116] : memref<64x32xf32, #tpu.memory_space<vmem>>, vector<64x32xf32>
    %c0_117 = arith.constant 0 : index
    %c0_118 = arith.constant 0 : index
    %353 = vector.load %arg18[%c0_117, %c0_118] : memref<1x32xf32, #tpu.memory_space<vmem>>, vector<1x32xf32>
    %cst_119 = arith.constant dense<0.000000e+00> : vector<16x64xf32>
    %354 = tpu.matmul %349, %350, %cst_119 {dimension_numbers = #tpu.dot_dimension_numbers<[1], [0], [0], [1], [0, 0, 1, 1], [], []>} : vector<16x32xf32>, vector<32x64xf32>, vector<16x64xf32> -> vector<16x64xf32>
    %355 = vector.broadcast %351 : vector<1x64xf32> to vector<16x64xf32>
    %356 = arith.addf %354, %355 : vector<16x64xf32>
    %cst_120 = arith.constant 0.000000e+00 : f32
    %357 = vector.broadcast %cst_120 : f32 to vector<16x64xf32>
    %358 = arith.maximumf %356, %357 : vector<16x64xf32>
    %cst_121 = arith.constant dense<0.000000e+00> : vector<16x32xf32>
    %359 = tpu.matmul %358, %352, %cst_121 {dimension_numbers = #tpu.dot_dimension_numbers<[1], [0], [0], [1], [0, 0, 1, 1], [], []>} : vector<16x64xf32>, vector<64x32xf32>, vector<16x32xf32> -> vector<16x32xf32>
    %360 = vector.broadcast %353 : vector<1x32xf32> to vector<16x32xf32>
    %361 = arith.addf %359, %360 : vector<16x32xf32>
    %c0_122 = arith.constant 0 : index
    %c0_123 = arith.constant 0 : index
    %362 = vector.load %arg19[%c0_122, %c0_123] : memref<16x32xf32, #tpu.memory_space<vmem>>, vector<16x32xf32>
    tpu.vector_store %arg19[%c0_122, %c0_123], %361 {strides = array<i32>} : memref<16x32xf32, #tpu.memory_space<vmem>>, vector<16x32xf32>,
    return
  }
  func.func @transform_0(%arg0: i32) -> (i32, i32) {
    %c0_i32 = arith.constant 0 : i32
    %c0_i32_0 = arith.constant 0 : i32
    %c0_i32_1 = arith.constant 0 : i32
    return %c0_i32, %c0_i32_0 : i32, i32
  }
  func.func @transform_1(%arg0: i32) -> (i32, i32) {
    %c0_i32 = arith.constant 0 : i32
    %c0_i32_0 = arith.constant 0 : i32
    %c0_i32_1 = arith.constant 0 : i32
    return %c0_i32, %c0_i32_0 : i32, i32
  }
  func.func @transform_2(%arg0: i32) -> (i32, i32) {
    %c0_i32 = arith.constant 0 : i32
    %c0_i32_0 = arith.constant 0 : i32
    %c0_i32_1 = arith.constant 0 : i32
    return %c0_i32, %c0_i32_0 : i32, i32
  }
  func.func @transform_3(%arg0: i32) -> (i32, i32) {
    %c0_i32 = arith.constant 0 : i32
    %c0_i32_0 = arith.constant 0 : i32
    %c0_i32_1 = arith.constant 0 : i32
    return %c0_i32, %c0_i32_0 : i32, i32
  }
  func.func @transform_4(%arg0: i32) -> (i32, i32) {
    %c0_i32 = arith.constant 0 : i32
    %c0_i32_0 = arith.constant 0 : i32
    %c0_i32_1 = arith.constant 0 : i32
    return %c0_i32, %c0_i32_0 : i32, i32
  }
  func.func @transform_5(%arg0: i32) -> (i32, i32) {
    %c0_i32 = arith.constant 0 : i32
    %c0_i32_0 = arith.constant 0 : i32
    %c0_i32_1 = arith.constant 0 : i32
    return %c0_i32, %c0_i32_0 : i32, i32
  }
  func.func @transform_6(%arg0: i32) -> (i32, i32) {
    %c0_i32 = arith.constant 0 : i32
    %c0_i32_0 = arith.constant 0 : i32
    %c0_i32_1 = arith.constant 0 : i32
    return %c0_i32, %c0_i32_0 : i32, i32
  }
  func.func @transform_7(%arg0: i32) -> (i32, i32) {
    %c0_i32 = arith.constant 0 : i32
    %c0_i32_0 = arith.constant 0 : i32
    %c0_i32_1 = arith.constant 0 : i32
    return %c0_i32, %c0_i32_0 : i32, i32
  }
  func.func @transform_8(%arg0: i32) -> (i32, i32) {
    %c0_i32 = arith.constant 0 : i32
    %c0_i32_0 = arith.constant 0 : i32
    %c0_i32_1 = arith.constant 0 : i32
    return %c0_i32, %c0_i32_0 : i32, i32
  }
  func.func @transform_9(%arg0: i32) -> (i32, i32) {
    %c0_i32 = arith.constant 0 : i32
    %c0_i32_0 = arith.constant 0 : i32
    %c0_i32_1 = arith.constant 0 : i32
    return %c0_i32, %c0_i32_0 : i32, i32
  }
  func.func @transform_10(%arg0: i32) -> (i32, i32) {
    %c0_i32 = arith.constant 0 : i32
    %c0_i32_0 = arith.constant 0 : i32
    %c0_i32_1 = arith.constant 0 : i32
    return %c0_i32, %c0_i32_0 : i32, i32
  }
  func.func @transform_11(%arg0: i32) -> (i32, i32) {
    %c0_i32 = arith.constant 0 : i32
    %c0_i32_0 = arith.constant 0 : i32
    %c0_i32_1 = arith.constant 0 : i32
    return %c0_i32, %c0_i32_0 : i32, i32
  }
  func.func @transform_12(%arg0: i32) -> (i32, i32) {
    %c0_i32 = arith.constant 0 : i32
    %c0_i32_0 = arith.constant 0 : i32
    %c0_i32_1 = arith.constant 0 : i32
    return %c0_i32, %c0_i32_0 : i32, i32
  }
  func.func @transform_13(%arg0: i32) -> (i32, i32) {
    %c0_i32 = arith.constant 0 : i32
    %c0_i32_0 = arith.constant 0 : i32
    %c0_i32_1 = arith.constant 0 : i32
    return %c0_i32, %c0_i32_0 : i32, i32
  }
  func.func @transform_14(%arg0: i32) -> (i32, i32) {
    %c0_i32 = arith.constant 0 : i32
    %c0_i32_0 = arith.constant 0 : i32
    %c0_i32_1 = arith.constant 0 : i32
    return %c0_i32, %c0_i32_0 : i32, i32
  }
  func.func @transform_15(%arg0: i32) -> (i32, i32) {
    %c0_i32 = arith.constant 0 : i32
    %c0_i32_0 = arith.constant 0 : i32
    %c0_i32_1 = arith.constant 0 : i32
    return %c0_i32, %c0_i32_0 : i32, i32
  }
  func.func @transform_16(%arg0: i32) -> (i32, i32) {
    %c0_i32 = arith.constant 0 : i32
    %c0_i32_0 = arith.constant 0 : i32
    %c0_i32_1 = arith.constant 0 : i32
    return %c0_i32, %c0_i32_0 : i32, i32
  }
  func.func @transform_17(%arg0: i32) -> (i32, i32) {
    %c0_i32 = arith.constant 0 : i32
    %c0_i32_0 = arith.constant 0 : i32
    %c0_i32_1 = arith.constant 0 : i32
    return %c0_i32, %c0_i32_0 : i32, i32
  }
  func.func @transform_18(%arg0: i32) -> (i32, i32) {
    %c0_i32 = arith.constant 0 : i32
    %c0_i32_0 = arith.constant 0 : i32
    %c0_i32_1 = arith.constant 0 : i32
    return %c0_i32, %c0_i32_0 : i32, i32
  }
}

module attributes {stable_mosaic.version = 11 : i64} {
  func.func @_encoder_layer_kernel(%arg0: i32, %arg1: memref<16x32xf32, #tpu.memory_space<vmem>>, %arg2: memref<2x8xf32, #tpu.memory_space<vmem>>, %arg3: memref<32x96xf32, #tpu.memory_space<vmem>>, %arg4: memref<1x96xf32, #tpu.memory_space<vmem>>, %arg5: memref<32x32xf32, #tpu.memory_space<vmem>>, %arg6: memref<1x32xf32, #tpu.memory_space<vmem>>, %arg7: memref<32x64xf32, #tpu.memory_space<vmem>>, %arg8: memref<1x64xf32, #tpu.memory_space<vmem>>, %arg9: memref<64x32xf32, #tpu.memory_space<vmem>>, %arg10: memref<1x32xf32, #tpu.memory_space<vmem>>, %arg11: memref<16x32xf32, #tpu.memory_space<vmem>>) attributes {dimension_semantics = [#tpu.dimension_semantics<arbitrary>], iteration_bounds = array<i64: 1>, scalar_prefetch = 0 : i64, scratch_operands = 0 : i64, tpu.core_type = #tpu.core_type<tc>, window_params = [{pipeline_mode = #tpu.pipeline_mode<synchronous>, transform_indices = @transform_0, window_bounds = array<i64: 16, 32>}, {pipeline_mode = #tpu.pipeline_mode<synchronous>, transform_indices = @transform_1, window_bounds = array<i64: 2, 8>}, {pipeline_mode = #tpu.pipeline_mode<synchronous>, transform_indices = @transform_2, window_bounds = array<i64: 32, 96>}, {pipeline_mode = #tpu.pipeline_mode<synchronous>, transform_indices = @transform_3, window_bounds = array<i64: 1, 96>}, {pipeline_mode = #tpu.pipeline_mode<synchronous>, transform_indices = @transform_4, window_bounds = array<i64: 32, 32>}, {pipeline_mode = #tpu.pipeline_mode<synchronous>, transform_indices = @transform_5, window_bounds = array<i64: 1, 32>}, {pipeline_mode = #tpu.pipeline_mode<synchronous>, transform_indices = @transform_6, window_bounds = array<i64: 32, 64>}, {pipeline_mode = #tpu.pipeline_mode<synchronous>, transform_indices = @transform_7, window_bounds = array<i64: 1, 64>}, {pipeline_mode = #tpu.pipeline_mode<synchronous>, transform_indices = @transform_8, window_bounds = array<i64: 64, 32>}, {pipeline_mode = #tpu.pipeline_mode<synchronous>, transform_indices = @transform_9, window_bounds = array<i64: 1, 32>}, {pipeline_mode = #tpu.pipeline_mode<synchronous>, transform_indices = @transform_10, window_bounds = array<i64: 16, 32>}]} {
    %c0 = arith.constant 0 : index
    %c0_0 = arith.constant 0 : index
    %0 = vector.load %arg1[%c0, %c0_0] : memref<16x32xf32, #tpu.memory_space<vmem>>, vector<16x32xf32>
    %c0_1 = arith.constant 0 : index
    %c0_2 = arith.constant 0 : index
    %1 = vector.load %arg2[%c0_1, %c0_2] : memref<2x8xf32, #tpu.memory_space<vmem>>, vector<2x8xf32>
    %c0_3 = arith.constant 0 : index
    %c0_4 = arith.constant 0 : index
    %2 = vector.load %arg3[%c0_3, %c0_4] : memref<32x96xf32, #tpu.memory_space<vmem>>, vector<32x96xf32>
    %cst = arith.constant dense<0.000000e+00> : vector<16x96xf32>
    %3 = tpu.matmul %0, %2, %cst {dimension_numbers = #tpu.dot_dimension_numbers<[1], [0], [0], [1], [0, 0, 1, 1], [], []>} : vector<16x32xf32>, vector<32x96xf32>, vector<16x96xf32> -> vector<16x96xf32>
    %c0_5 = arith.constant 0 : index
    %c0_6 = arith.constant 0 : index
    %4 = vector.load %arg4[%c0_5, %c0_6] : memref<1x96xf32, #tpu.memory_space<vmem>>, vector<1x96xf32>
    %5 = vector.broadcast %4 : vector<1x96xf32> to vector<16x96xf32>
    %6 = arith.addf %3, %5 : vector<16x96xf32>
    %7 = vector.extract_strided_slice %6 {offsets = [0, 0], sizes = [16, 32], strides = [1, 1]} : vector<16x96xf32> to vector<16x32xf32>
    %8 = vector.extract_strided_slice %6 {offsets = [0, 32], sizes = [16, 32], strides = [1, 1]} : vector<16x96xf32> to vector<16x32xf32>
    %9 = vector.extract_strided_slice %6 {offsets = [0, 64], sizes = [16, 32], strides = [1, 1]} : vector<16x96xf32> to vector<16x32xf32>
    %c0_7 = arith.constant 0 : index
    %c0_8 = arith.constant 0 : index
    %10 = vector.load %arg5[%c0_7, %c0_8] : memref<32x32xf32, #tpu.memory_space<vmem>>, vector<32x32xf32>
    %c0_9 = arith.constant 0 : index
    %c0_10 = arith.constant 0 : index
    %11 = vector.load %arg6[%c0_9, %c0_10] : memref<1x32xf32, #tpu.memory_space<vmem>>, vector<1x32xf32>
    %12 = vector.extract_strided_slice %1 {offsets = [0, 0], sizes = [1, 8], strides = [1, 1]} : vector<2x8xf32> to vector<1x8xf32>
    %13 = vector.extract_strided_slice %7 {offsets = [0, 0], sizes = [8, 8], strides = [1, 1]} : vector<16x32xf32> to vector<8x8xf32>
    %14 = vector.extract_strided_slice %8 {offsets = [0, 0], sizes = [8, 8], strides = [1, 1]} : vector<16x32xf32> to vector<8x8xf32>
    %15 = vector.extract_strided_slice %9 {offsets = [0, 0], sizes = [8, 8], strides = [1, 1]} : vector<16x32xf32> to vector<8x8xf32>
    %cst_11 = arith.constant dense<0.000000e+00> : vector<8x8xf32>
    %16 = tpu.matmul %13, %14, %cst_11 {dimension_numbers = #tpu.dot_dimension_numbers<[1], [1], [0], [0], [0, 0, 1, 0], [], []>} : vector<8x8xf32>, vector<8x8xf32>, vector<8x8xf32> -> vector<8x8xf32>
    %cst_12 = arith.constant 0.353553385 : f32
    %17 = vector.broadcast %cst_12 : f32 to vector<8x8xf32>
    %18 = arith.mulf %16, %17 : vector<8x8xf32>
    %19 = vector.broadcast %12 : vector<1x8xf32> to vector<8x8xf32>
    %20 = arith.addf %18, %19 : vector<8x8xf32>
    %cst_13 = arith.constant dense<0xFF800000> : vector<8xf32>
    %21 = vector.multi_reduction <maximumf>, %20, %cst_13 [1] : vector<8x8xf32> to vector<8xf32>
    %22 = vector.shape_cast %21 : vector<8xf32> to vector<8x1xf32>
    %23 = vector.broadcast %22 : vector<8x1xf32> to vector<8x8xf32>
    %24 = arith.subf %20, %23 : vector<8x8xf32>
    %25 = math.exp %24 : vector<8x8xf32>
    %cst_14 = arith.constant dense<0.000000e+00> : vector<8xf32>
    %26 = vector.multi_reduction <add>, %25, %cst_14 [1] : vector<8x8xf32> to vector<8xf32>
    %27 = vector.shape_cast %26 : vector<8xf32> to vector<8x1xf32>
    %28 = tpu.reciprocal %27 {approx = true} : vector<8x1xf32> -> vector<8x1xf32>
    %29 = vector.broadcast %28 : vector<8x1xf32> to vector<8x8xf32>
    %30 = arith.mulf %25, %29 : vector<8x8xf32>
    %cst_15 = arith.constant dense<0.000000e+00> : vector<8x8xf32>
    %31 = tpu.matmul %30, %15, %cst_15 {dimension_numbers = #tpu.dot_dimension_numbers<[1], [0], [0], [1], [0, 0, 1, 1], [], []>} : vector<8x8xf32>, vector<8x8xf32>, vector<8x8xf32> -> vector<8x8xf32>
    %32 = vector.extract_strided_slice %7 {offsets = [0, 8], sizes = [8, 8], strides = [1, 1]} : vector<16x32xf32> to vector<8x8xf32>
    %33 = vector.extract_strided_slice %8 {offsets = [0, 8], sizes = [8, 8], strides = [1, 1]} : vector<16x32xf32> to vector<8x8xf32>
    %34 = vector.extract_strided_slice %9 {offsets = [0, 8], sizes = [8, 8], strides = [1, 1]} : vector<16x32xf32> to vector<8x8xf32>
    %cst_16 = arith.constant dense<0.000000e+00> : vector<8x8xf32>
    %35 = tpu.matmul %32, %33, %cst_16 {dimension_numbers = #tpu.dot_dimension_numbers<[1], [1], [0], [0], [0, 0, 1, 0], [], []>} : vector<8x8xf32>, vector<8x8xf32>, vector<8x8xf32> -> vector<8x8xf32>
    %cst_17 = arith.constant 0.353553385 : f32
    %36 = vector.broadcast %cst_17 : f32 to vector<8x8xf32>
    %37 = arith.mulf %35, %36 : vector<8x8xf32>
    %38 = vector.broadcast %12 : vector<1x8xf32> to vector<8x8xf32>
    %39 = arith.addf %37, %38 : vector<8x8xf32>
    %cst_18 = arith.constant dense<0xFF800000> : vector<8xf32>
    %40 = vector.multi_reduction <maximumf>, %39, %cst_18 [1] : vector<8x8xf32> to vector<8xf32>
    %41 = vector.shape_cast %40 : vector<8xf32> to vector<8x1xf32>
    %42 = vector.broadcast %41 : vector<8x1xf32> to vector<8x8xf32>
    %43 = arith.subf %39, %42 : vector<8x8xf32>
    %44 = math.exp %43 : vector<8x8xf32>
    %cst_19 = arith.constant dense<0.000000e+00> : vector<8xf32>
    %45 = vector.multi_reduction <add>, %44, %cst_19 [1] : vector<8x8xf32> to vector<8xf32>
    %46 = vector.shape_cast %45 : vector<8xf32> to vector<8x1xf32>
    %47 = tpu.reciprocal %46 {approx = true} : vector<8x1xf32> -> vector<8x1xf32>
    %48 = vector.broadcast %47 : vector<8x1xf32> to vector<8x8xf32>
    %49 = arith.mulf %44, %48 : vector<8x8xf32>
    %cst_20 = arith.constant dense<0.000000e+00> : vector<8x8xf32>
    %50 = tpu.matmul %49, %34, %cst_20 {dimension_numbers = #tpu.dot_dimension_numbers<[1], [0], [0], [1], [0, 0, 1, 1], [], []>} : vector<8x8xf32>, vector<8x8xf32>, vector<8x8xf32> -> vector<8x8xf32>
    %51 = vector.extract_strided_slice %7 {offsets = [0, 16], sizes = [8, 8], strides = [1, 1]} : vector<16x32xf32> to vector<8x8xf32>
    %52 = vector.extract_strided_slice %8 {offsets = [0, 16], sizes = [8, 8], strides = [1, 1]} : vector<16x32xf32> to vector<8x8xf32>
    %53 = vector.extract_strided_slice %9 {offsets = [0, 16], sizes = [8, 8], strides = [1, 1]} : vector<16x32xf32> to vector<8x8xf32>
    %cst_21 = arith.constant dense<0.000000e+00> : vector<8x8xf32>
    %54 = tpu.matmul %51, %52, %cst_21 {dimension_numbers = #tpu.dot_dimension_numbers<[1], [1], [0], [0], [0, 0, 1, 0], [], []>} : vector<8x8xf32>, vector<8x8xf32>, vector<8x8xf32> -> vector<8x8xf32>
    %cst_22 = arith.constant 0.353553385 : f32
    %55 = vector.broadcast %cst_22 : f32 to vector<8x8xf32>
    %56 = arith.mulf %54, %55 : vector<8x8xf32>
    %57 = vector.broadcast %12 : vector<1x8xf32> to vector<8x8xf32>
    %58 = arith.addf %56, %57 : vector<8x8xf32>
    %cst_23 = arith.constant dense<0xFF800000> : vector<8xf32>
    %59 = vector.multi_reduction <maximumf>, %58, %cst_23 [1] : vector<8x8xf32> to vector<8xf32>
    %60 = vector.shape_cast %59 : vector<8xf32> to vector<8x1xf32>
    %61 = vector.broadcast %60 : vector<8x1xf32> to vector<8x8xf32>
    %62 = arith.subf %58, %61 : vector<8x8xf32>
    %63 = math.exp %62 : vector<8x8xf32>
    %cst_24 = arith.constant dense<0.000000e+00> : vector<8xf32>
    %64 = vector.multi_reduction <add>, %63, %cst_24 [1] : vector<8x8xf32> to vector<8xf32>
    %65 = vector.shape_cast %64 : vector<8xf32> to vector<8x1xf32>
    %66 = tpu.reciprocal %65 {approx = true} : vector<8x1xf32> -> vector<8x1xf32>
    %67 = vector.broadcast %66 : vector<8x1xf32> to vector<8x8xf32>
    %68 = arith.mulf %63, %67 : vector<8x8xf32>
    %cst_25 = arith.constant dense<0.000000e+00> : vector<8x8xf32>
    %69 = tpu.matmul %68, %53, %cst_25 {dimension_numbers = #tpu.dot_dimension_numbers<[1], [0], [0], [1], [0, 0, 1, 1], [], []>} : vector<8x8xf32>, vector<8x8xf32>, vector<8x8xf32> -> vector<8x8xf32>
    %70 = vector.extract_strided_slice %7 {offsets = [0, 24], sizes = [8, 8], strides = [1, 1]} : vector<16x32xf32> to vector<8x8xf32>
    %71 = vector.extract_strided_slice %8 {offsets = [0, 24], sizes = [8, 8], strides = [1, 1]} : vector<16x32xf32> to vector<8x8xf32>
    %72 = vector.extract_strided_slice %9 {offsets = [0, 24], sizes = [8, 8], strides = [1, 1]} : vector<16x32xf32> to vector<8x8xf32>
    %cst_26 = arith.constant dense<0.000000e+00> : vector<8x8xf32>
    %73 = tpu.matmul %70, %71, %cst_26 {dimension_numbers = #tpu.dot_dimension_numbers<[1], [1], [0], [0], [0, 0, 1, 0], [], []>} : vector<8x8xf32>, vector<8x8xf32>, vector<8x8xf32> -> vector<8x8xf32>
    %cst_27 = arith.constant 0.353553385 : f32
    %74 = vector.broadcast %cst_27 : f32 to vector<8x8xf32>
    %75 = arith.mulf %73, %74 : vector<8x8xf32>
    %76 = vector.broadcast %12 : vector<1x8xf32> to vector<8x8xf32>
    %77 = arith.addf %75, %76 : vector<8x8xf32>
    %cst_28 = arith.constant dense<0xFF800000> : vector<8xf32>
    %78 = vector.multi_reduction <maximumf>, %77, %cst_28 [1] : vector<8x8xf32> to vector<8xf32>
    %79 = vector.shape_cast %78 : vector<8xf32> to vector<8x1xf32>
    %80 = vector.broadcast %79 : vector<8x1xf32> to vector<8x8xf32>
    %81 = arith.subf %77, %80 : vector<8x8xf32>
    %82 = math.exp %81 : vector<8x8xf32>
    %cst_29 = arith.constant dense<0.000000e+00> : vector<8xf32>
    %83 = vector.multi_reduction <add>, %82, %cst_29 [1] : vector<8x8xf32> to vector<8xf32>
    %84 = vector.shape_cast %83 : vector<8xf32> to vector<8x1xf32>
    %85 = tpu.reciprocal %84 {approx = true} : vector<8x1xf32> -> vector<8x1xf32>
    %86 = vector.broadcast %85 : vector<8x1xf32> to vector<8x8xf32>
    %87 = arith.mulf %82, %86 : vector<8x8xf32>
    %cst_30 = arith.constant dense<0.000000e+00> : vector<8x8xf32>
    %88 = tpu.matmul %87, %72, %cst_30 {dimension_numbers = #tpu.dot_dimension_numbers<[1], [0], [0], [1], [0, 0, 1, 1], [], []>} : vector<8x8xf32>, vector<8x8xf32>, vector<8x8xf32> -> vector<8x8xf32>
    %89 = tpu.concatenate %31, %50, %69, %88 in 1 : vector<8x8xf32>, vector<8x8xf32>, vector<8x8xf32>, vector<8x8xf32> -> vector<8x32xf32>
    %90 = vector.extract_strided_slice %1 {offsets = [1, 0], sizes = [1, 8], strides = [1, 1]} : vector<2x8xf32> to vector<1x8xf32>
    %91 = vector.extract_strided_slice %7 {offsets = [8, 0], sizes = [8, 8], strides = [1, 1]} : vector<16x32xf32> to vector<8x8xf32>
    %92 = vector.extract_strided_slice %8 {offsets = [8, 0], sizes = [8, 8], strides = [1, 1]} : vector<16x32xf32> to vector<8x8xf32>
    %93 = vector.extract_strided_slice %9 {offsets = [8, 0], sizes = [8, 8], strides = [1, 1]} : vector<16x32xf32> to vector<8x8xf32>
    %cst_31 = arith.constant dense<0.000000e+00> : vector<8x8xf32>
    %94 = tpu.matmul %91, %92, %cst_31 {dimension_numbers = #tpu.dot_dimension_numbers<[1], [1], [0], [0], [0, 0, 1, 0], [], []>} : vector<8x8xf32>, vector<8x8xf32>, vector<8x8xf32> -> vector<8x8xf32>
    %cst_32 = arith.constant 0.353553385 : f32
    %95 = vector.broadcast %cst_32 : f32 to vector<8x8xf32>
    %96 = arith.mulf %94, %95 : vector<8x8xf32>
    %97 = vector.broadcast %90 : vector<1x8xf32> to vector<8x8xf32>
    %98 = arith.addf %96, %97 : vector<8x8xf32>
    %cst_33 = arith.constant dense<0xFF800000> : vector<8xf32>
    %99 = vector.multi_reduction <maximumf>, %98, %cst_33 [1] : vector<8x8xf32> to vector<8xf32>
    %100 = vector.shape_cast %99 : vector<8xf32> to vector<8x1xf32>
    %101 = vector.broadcast %100 : vector<8x1xf32> to vector<8x8xf32>
    %102 = arith.subf %98, %101 : vector<8x8xf32>
    %103 = math.exp %102 : vector<8x8xf32>
    %cst_34 = arith.constant dense<0.000000e+00> : vector<8xf32>
    %104 = vector.multi_reduction <add>, %103, %cst_34 [1] : vector<8x8xf32> to vector<8xf32>
    %105 = vector.shape_cast %104 : vector<8xf32> to vector<8x1xf32>
    %106 = tpu.reciprocal %105 {approx = true} : vector<8x1xf32> -> vector<8x1xf32>
    %107 = vector.broadcast %106 : vector<8x1xf32> to vector<8x8xf32>
    %108 = arith.mulf %103, %107 : vector<8x8xf32>
    %cst_35 = arith.constant dense<0.000000e+00> : vector<8x8xf32>
    %109 = tpu.matmul %108, %93, %cst_35 {dimension_numbers = #tpu.dot_dimension_numbers<[1], [0], [0], [1], [0, 0, 1, 1], [], []>} : vector<8x8xf32>, vector<8x8xf32>, vector<8x8xf32> -> vector<8x8xf32>
    %110 = vector.extract_strided_slice %7 {offsets = [8, 8], sizes = [8, 8], strides = [1, 1]} : vector<16x32xf32> to vector<8x8xf32>
    %111 = vector.extract_strided_slice %8 {offsets = [8, 8], sizes = [8, 8], strides = [1, 1]} : vector<16x32xf32> to vector<8x8xf32>
    %112 = vector.extract_strided_slice %9 {offsets = [8, 8], sizes = [8, 8], strides = [1, 1]} : vector<16x32xf32> to vector<8x8xf32>
    %cst_36 = arith.constant dense<0.000000e+00> : vector<8x8xf32>
    %113 = tpu.matmul %110, %111, %cst_36 {dimension_numbers = #tpu.dot_dimension_numbers<[1], [1], [0], [0], [0, 0, 1, 0], [], []>} : vector<8x8xf32>, vector<8x8xf32>, vector<8x8xf32> -> vector<8x8xf32>
    %cst_37 = arith.constant 0.353553385 : f32
    %114 = vector.broadcast %cst_37 : f32 to vector<8x8xf32>
    %115 = arith.mulf %113, %114 : vector<8x8xf32>
    %116 = vector.broadcast %90 : vector<1x8xf32> to vector<8x8xf32>
    %117 = arith.addf %115, %116 : vector<8x8xf32>
    %cst_38 = arith.constant dense<0xFF800000> : vector<8xf32>
    %118 = vector.multi_reduction <maximumf>, %117, %cst_38 [1] : vector<8x8xf32> to vector<8xf32>
    %119 = vector.shape_cast %118 : vector<8xf32> to vector<8x1xf32>
    %120 = vector.broadcast %119 : vector<8x1xf32> to vector<8x8xf32>
    %121 = arith.subf %117, %120 : vector<8x8xf32>
    %122 = math.exp %121 : vector<8x8xf32>
    %cst_39 = arith.constant dense<0.000000e+00> : vector<8xf32>
    %123 = vector.multi_reduction <add>, %122, %cst_39 [1] : vector<8x8xf32> to vector<8xf32>
    %124 = vector.shape_cast %123 : vector<8xf32> to vector<8x1xf32>
    %125 = tpu.reciprocal %124 {approx = true} : vector<8x1xf32> -> vector<8x1xf32>
    %126 = vector.broadcast %125 : vector<8x1xf32> to vector<8x8xf32>
    %127 = arith.mulf %122, %126 : vector<8x8xf32>
    %cst_40 = arith.constant dense<0.000000e+00> : vector<8x8xf32>
    %128 = tpu.matmul %127, %112, %cst_40 {dimension_numbers = #tpu.dot_dimension_numbers<[1], [0], [0], [1], [0, 0, 1, 1], [], []>} : vector<8x8xf32>, vector<8x8xf32>, vector<8x8xf32> -> vector<8x8xf32>
    %129 = vector.extract_strided_slice %7 {offsets = [8, 16], sizes = [8, 8], strides = [1, 1]} : vector<16x32xf32> to vector<8x8xf32>
    %130 = vector.extract_strided_slice %8 {offsets = [8, 16], sizes = [8, 8], strides = [1, 1]} : vector<16x32xf32> to vector<8x8xf32>
    %131 = vector.extract_strided_slice %9 {offsets = [8, 16], sizes = [8, 8], strides = [1, 1]} : vector<16x32xf32> to vector<8x8xf32>
    %cst_41 = arith.constant dense<0.000000e+00> : vector<8x8xf32>
    %132 = tpu.matmul %129, %130, %cst_41 {dimension_numbers = #tpu.dot_dimension_numbers<[1], [1], [0], [0], [0, 0, 1, 0], [], []>} : vector<8x8xf32>, vector<8x8xf32>, vector<8x8xf32> -> vector<8x8xf32>
    %cst_42 = arith.constant 0.353553385 : f32
    %133 = vector.broadcast %cst_42 : f32 to vector<8x8xf32>
    %134 = arith.mulf %132, %133 : vector<8x8xf32>
    %135 = vector.broadcast %90 : vector<1x8xf32> to vector<8x8xf32>
    %136 = arith.addf %134, %135 : vector<8x8xf32>
    %cst_43 = arith.constant dense<0xFF800000> : vector<8xf32>
    %137 = vector.multi_reduction <maximumf>, %136, %cst_43 [1] : vector<8x8xf32> to vector<8xf32>
    %138 = vector.shape_cast %137 : vector<8xf32> to vector<8x1xf32>
    %139 = vector.broadcast %138 : vector<8x1xf32> to vector<8x8xf32>
    %140 = arith.subf %136, %139 : vector<8x8xf32>
    %141 = math.exp %140 : vector<8x8xf32>
    %cst_44 = arith.constant dense<0.000000e+00> : vector<8xf32>
    %142 = vector.multi_reduction <add>, %141, %cst_44 [1] : vector<8x8xf32> to vector<8xf32>
    %143 = vector.shape_cast %142 : vector<8xf32> to vector<8x1xf32>
    %144 = tpu.reciprocal %143 {approx = true} : vector<8x1xf32> -> vector<8x1xf32>
    %145 = vector.broadcast %144 : vector<8x1xf32> to vector<8x8xf32>
    %146 = arith.mulf %141, %145 : vector<8x8xf32>
    %cst_45 = arith.constant dense<0.000000e+00> : vector<8x8xf32>
    %147 = tpu.matmul %146, %131, %cst_45 {dimension_numbers = #tpu.dot_dimension_numbers<[1], [0], [0], [1], [0, 0, 1, 1], [], []>} : vector<8x8xf32>, vector<8x8xf32>, vector<8x8xf32> -> vector<8x8xf32>
    %148 = vector.extract_strided_slice %7 {offsets = [8, 24], sizes = [8, 8], strides = [1, 1]} : vector<16x32xf32> to vector<8x8xf32>
    %149 = vector.extract_strided_slice %8 {offsets = [8, 24], sizes = [8, 8], strides = [1, 1]} : vector<16x32xf32> to vector<8x8xf32>
    %150 = vector.extract_strided_slice %9 {offsets = [8, 24], sizes = [8, 8], strides = [1, 1]} : vector<16x32xf32> to vector<8x8xf32>
    %cst_46 = arith.constant dense<0.000000e+00> : vector<8x8xf32>
    %151 = tpu.matmul %148, %149, %cst_46 {dimension_numbers = #tpu.dot_dimension_numbers<[1], [1], [0], [0], [0, 0, 1, 0], [], []>} : vector<8x8xf32>, vector<8x8xf32>, vector<8x8xf32> -> vector<8x8xf32>
    %cst_47 = arith.constant 0.353553385 : f32
    %152 = vector.broadcast %cst_47 : f32 to vector<8x8xf32>
    %153 = arith.mulf %151, %152 : vector<8x8xf32>
    %154 = vector.broadcast %90 : vector<1x8xf32> to vector<8x8xf32>
    %155 = arith.addf %153, %154 : vector<8x8xf32>
    %cst_48 = arith.constant dense<0xFF800000> : vector<8xf32>
    %156 = vector.multi_reduction <maximumf>, %155, %cst_48 [1] : vector<8x8xf32> to vector<8xf32>
    %157 = vector.shape_cast %156 : vector<8xf32> to vector<8x1xf32>
    %158 = vector.broadcast %157 : vector<8x1xf32> to vector<8x8xf32>
    %159 = arith.subf %155, %158 : vector<8x8xf32>
    %160 = math.exp %159 : vector<8x8xf32>
    %cst_49 = arith.constant dense<0.000000e+00> : vector<8xf32>
    %161 = vector.multi_reduction <add>, %160, %cst_49 [1] : vector<8x8xf32> to vector<8xf32>
    %162 = vector.shape_cast %161 : vector<8xf32> to vector<8x1xf32>
    %163 = tpu.reciprocal %162 {approx = true} : vector<8x1xf32> -> vector<8x1xf32>
    %164 = vector.broadcast %163 : vector<8x1xf32> to vector<8x8xf32>
    %165 = arith.mulf %160, %164 : vector<8x8xf32>
    %cst_50 = arith.constant dense<0.000000e+00> : vector<8x8xf32>
    %166 = tpu.matmul %165, %150, %cst_50 {dimension_numbers = #tpu.dot_dimension_numbers<[1], [0], [0], [1], [0, 0, 1, 1], [], []>} : vector<8x8xf32>, vector<8x8xf32>, vector<8x8xf32> -> vector<8x8xf32>
    %167 = tpu.concatenate %109, %128, %147, %166 in 1 : vector<8x8xf32>, vector<8x8xf32>, vector<8x8xf32>, vector<8x8xf32> -> vector<8x32xf32>
    %168 = tpu.concatenate %89, %167 in 0 : vector<8x32xf32>, vector<8x32xf32> -> vector<16x32xf32>
    %cst_51 = arith.constant dense<0.000000e+00> : vector<16x32xf32>
    %169 = tpu.matmul %168, %10, %cst_51 {dimension_numbers = #tpu.dot_dimension_numbers<[1], [0], [0], [1], [0, 0, 1, 1], [], []>} : vector<16x32xf32>, vector<32x32xf32>, vector<16x32xf32> -> vector<16x32xf32>
    %170 = vector.broadcast %11 : vector<1x32xf32> to vector<16x32xf32>
    %171 = arith.addf %169, %170 : vector<16x32xf32>
    %c0_52 = arith.constant 0 : index
    %c0_53 = arith.constant 0 : index
    %172 = vector.load %arg7[%c0_52, %c0_53] : memref<32x64xf32, #tpu.memory_space<vmem>>, vector<32x64xf32>
    %c0_54 = arith.constant 0 : index
    %c0_55 = arith.constant 0 : index
    %173 = vector.load %arg8[%c0_54, %c0_55] : memref<1x64xf32, #tpu.memory_space<vmem>>, vector<1x64xf32>
    %c0_56 = arith.constant 0 : index
    %c0_57 = arith.constant 0 : index
    %174 = vector.load %arg9[%c0_56, %c0_57] : memref<64x32xf32, #tpu.memory_space<vmem>>, vector<64x32xf32>
    %c0_58 = arith.constant 0 : index
    %c0_59 = arith.constant 0 : index
    %175 = vector.load %arg10[%c0_58, %c0_59] : memref<1x32xf32, #tpu.memory_space<vmem>>, vector<1x32xf32>
    %cst_60 = arith.constant dense<0.000000e+00> : vector<16x64xf32>
    %176 = tpu.matmul %171, %172, %cst_60 {dimension_numbers = #tpu.dot_dimension_numbers<[1], [0], [0], [1], [0, 0, 1, 1], [], []>} : vector<16x32xf32>, vector<32x64xf32>, vector<16x64xf32> -> vector<16x64xf32>
    %177 = vector.broadcast %173 : vector<1x64xf32> to vector<16x64xf32>
    %178 = arith.addf %176, %177 : vector<16x64xf32>
    %cst_61 = arith.constant 0.000000e+00 : f32
    %179 = vector.broadcast %cst_61 : f32 to vector<16x64xf32>
    %180 = arith.maximumf %178, %179 : vector<16x64xf32>
    %cst_62 = arith.constant dense<0.000000e+00> : vector<16x32xf32>
    %181 = tpu.matmul %180, %174, %cst_62 {dimension_numbers = #tpu.dot_dimension_numbers<[1], [0], [0], [1], [0, 0, 1, 1], [], []>} : vector<16x64xf32>, vector<64x32xf32>, vector<16x32xf32> -> vector<16x32xf32>
    %182 = vector.broadcast %175 : vector<1x32xf32> to vector<16x32xf32>
    %183 = arith.addf %181, %182 : vector<16x32xf32>
    %c0_63 = arith.constant 0 : index
    %c0_64 = arith.constant 0 : index
    %184 = vector.load %arg11[%c0_63, %c0_64] : memref<16x32xf32, #tpu.memory_space<vmem>>, vector<16x32xf32>
    tpu.vector_store %arg11[%c0_63, %c0_64], %183 {strides = array<i32>} : memref<16x32xf32, #tpu.memory_space<vmem>>, vector<16x32xf32>,
    return
  }
  func.func @transform_0(%arg0: i32) -> (i32, i32) {
    %c0_i32 = arith.constant 0 : i32
    %c0_i32_0 = arith.constant 0 : i32
    %c0_i32_1 = arith.constant 0 : i32
    return %c0_i32, %c0_i32_0 : i32, i32
  }
  func.func @transform_1(%arg0: i32) -> (i32, i32) {
    %c0_i32 = arith.constant 0 : i32
    %c0_i32_0 = arith.constant 0 : i32
    %c0_i32_1 = arith.constant 0 : i32
    return %c0_i32, %c0_i32_0 : i32, i32
  }
  func.func @transform_2(%arg0: i32) -> (i32, i32) {
    %c0_i32 = arith.constant 0 : i32
    %c0_i32_0 = arith.constant 0 : i32
    %c0_i32_1 = arith.constant 0 : i32
    return %c0_i32, %c0_i32_0 : i32, i32
  }
  func.func @transform_3(%arg0: i32) -> (i32, i32) {
    %c0_i32 = arith.constant 0 : i32
    %c0_i32_0 = arith.constant 0 : i32
    %c0_i32_1 = arith.constant 0 : i32
    return %c0_i32, %c0_i32_0 : i32, i32
  }
  func.func @transform_4(%arg0: i32) -> (i32, i32) {
    %c0_i32 = arith.constant 0 : i32
    %c0_i32_0 = arith.constant 0 : i32
    %c0_i32_1 = arith.constant 0 : i32
    return %c0_i32, %c0_i32_0 : i32, i32
  }
  func.func @transform_5(%arg0: i32) -> (i32, i32) {
    %c0_i32 = arith.constant 0 : i32
    %c0_i32_0 = arith.constant 0 : i32
    %c0_i32_1 = arith.constant 0 : i32
    return %c0_i32, %c0_i32_0 : i32, i32
  }
  func.func @transform_6(%arg0: i32) -> (i32, i32) {
    %c0_i32 = arith.constant 0 : i32
    %c0_i32_0 = arith.constant 0 : i32
    %c0_i32_1 = arith.constant 0 : i32
    return %c0_i32, %c0_i32_0 : i32, i32
  }
  func.func @transform_7(%arg0: i32) -> (i32, i32) {
    %c0_i32 = arith.constant 0 : i32
    %c0_i32_0 = arith.constant 0 : i32
    %c0_i32_1 = arith.constant 0 : i32
    return %c0_i32, %c0_i32_0 : i32, i32
  }
  func.func @transform_8(%arg0: i32) -> (i32, i32) {
    %c0_i32 = arith.constant 0 : i32
    %c0_i32_0 = arith.constant 0 : i32
    %c0_i32_1 = arith.constant 0 : i32
    return %c0_i32, %c0_i32_0 : i32, i32
  }
  func.func @transform_9(%arg0: i32) -> (i32, i32) {
    %c0_i32 = arith.constant 0 : i32
    %c0_i32_0 = arith.constant 0 : i32
    %c0_i32_1 = arith.constant 0 : i32
    return %c0_i32, %c0_i32_0 : i32, i32
  }
  func.func @transform_10(%arg0: i32) -> (i32, i32) {
    %c0_i32 = arith.constant 0 : i32
    %c0_i32_0 = arith.constant 0 : i32
    %c0_i32_1 = arith.constant 0 : i32
    return %c0_i32, %c0_i32_0 : i32, i32
  }
}

</mosaic_0001>

<bundles_post_ra>
// kernel: transformer_forward.9
= control target key start
LH: loop header
LB: loop body
LE: loop exit
PB: predicated region body
PF: predicated region fallthrough
CT: control target
= control target key end

     0   :  { %vm28_vm0 = vcmask 261120   ;;  %s220_s0 = inlined_call_operand.vmem [shape: f32[16,32], index: 0, kind: input, shape index: {}]   ;;  %s221_s1 = inlined_call_operand.vmem [shape: f32[32,128], index: 1, kind: input, shape index: {}]   ;;  %s222_s2 = inlined_call_operand.vmem [shape: f32[1,128], index: 2, kind: input, shape index: {}]   ;;  %s223_s3 = inlined_call_operand.hbm [shape: f32[16,128], index: 3, kind: output, shape index: {}]  }
   0x1   :  { %v20_v0 = vld [vmem:[%s221_s1 + $0x18] sm:$0xff]  ;;  %v19_v1 = vld [vmem:[%s221_s1 + $0x10] sm:$0xff]  ;;  %v15_v2 = vld [vmem:[%s220_s0] sm:$0xff] }
   0x2   :  { %137 = vmatprep.subr.mxu0 %v20_v0  ;;  %v18_v3 = vld [vmem:[%s221_s1 + $0x8] sm:$0xff]  ;;  %145 = vmatprep.mubr.msk.f32.mxu0 %vm28_vm0, %v15_v2 }
   0x3   :  { %138 = vmatpush3.msra.mxu0 %v20_v0 }
   0x4   :  { %8 = vsyncpa [#allocation3], 0  ;;  %139 = vmatprep.subr.mxu0 %v19_v1  ;;  %v17_v4 = vld [vmem:[%s221_s1] sm:$0xff]  ;;  %v16_v5 = vld [vmem:[%s220_s0 + $0x8] sm:$0xff]  ;;  %s173_s26 = smov [#allocation2]  }
   0x5   :  { %140 = vmatpush3.msra.mxu0 %v19_v1  ;;  %v128_v6 = vld [vmem:[%s222_s2] ss:$0 sm:$0xff]  ;;  %s117_s27 = sshll.u32 %s173_s26, 4  ;;  %s118_s27 = int_to_ptr.vmem [resolvable:$true] %s117_s27 }
   0x6   :  { %141 = vmatprep.subr.mxu0 %v18_v3  ;;  %s151_s1 = scalar_lea.vmem %s118_s27, 256  ;;  %p156_p1 = scmp.lt.s32.totalorder %s118_s27, %s118_s27 }
   0x7   :  { %142 = vmatpush3.msra.mxu0 %v18_v3  ;;  %p152_p0 = scmp.ne.s32.totalorder %s118_s27, %s151_s1  ;;  %p157_p2 = scmp.lt.s32.totalorder %s151_s1, %s151_s1 }
   0x8   :  { %143 = vmatprep.subr.mxu0 %v17_v4 }
   0x9   :  { %144 = vmatpush3.msra.mxu0 %v17_v4  ;;  %p158_p3 = por %p157_p2, %p156_p1 }
   0xa   :  { %146 = vmatmul.mubr.msk.f32.vlgmr.msra.gmra.mxu0 %vm28_vm0, %v16_v5 }
   0xb   :  { %p159_p4 = pnand %p158_p3, %p152_p0 }
  0xca   :  { %v147_v7 = vpop.f32.mrf.mxu0 }
  0xcb   :  { %v107_v8 = vadd.f32 %v147_v7, %v128_v6 }
  0xcc   :  { %v101_v9 = vpop.f32.mrf.mxu0 }
  0xcd   :  { %111 = vst [vmem:[#allocation2 + $0x8] sm:$0xff] %v107_v8  ;;  %v102_v10 = vadd.f32 %v128_v6, %v101_v9 }
  0xcf   :  { %110 = vst [vmem:[#allocation2] sm:$0xff] %v102_v10 }
  0xd0   :  { %162 = shalt.err (!%p159_p4)
}
  0xd1   :  { %s174_s0 = smov 128   ;;  %s175_s28 = smov 8  }
  0xd2   :  { %123 = dma.vmem_to_hbm [thread:$0]  %s118_s27, 256, %s223_s3, [#allocation3], %s174_s0, %s174_s0, %s175_s28  }
  0xd3   :  { %171 = dma.done.wait [#allocation3], 256  }
  0xd4   :  { %172 = vsyncadd [#allocation3], 4294967040 }
  0xd5   :  { %127 = vsyncpa [#allocation3], 1 }

// kernel: transformer_forward.5
= control target key start
LH: loop header
LB: loop body
LE: loop exit
PB: predicated region body
PF: predicated region fallthrough
CT: control target
= control target key end

     0   :  { %vm49_vm0 = vcmask 261120   ;;  %v2071_v6 = vmov 0.0   ;;  %vm2072_vm1 = vmmov 0   ;;  %s2074_s26 = smov 96   ;;  %s2075_s27 = smov 80   ;;  %vm139_vm2 = vcmask 64512   ;;  %s2384_s2 = inlined_call_operand.vmem [shape: f32[32,96], index: 2, kind: input, shape index: {}]   ;;  %s2385_s0 = inlined_call_operand.vmem [shape: f32[16,32], index: 0, kind: input, shape index: {}]   ;;  %s2386_s3 = inlined_call_operand.vmem [shape: f32[1,96], index: 3, kind: input, shape index: {}]   ;;  %s2387_s1 = inlined_call_operand.vmem [shape: f32[2,8], index: 1, kind: input, shape index: {}]   ;;  %s2388_s4 = inlined_call_operand.vmem [shape: f32[32,32], index: 4, kind: input, shape index: {}]   ;;  %s2389_s6 = inlined_call_operand.vmem [shape: f32[32,64], index: 6, kind: input, shape index: {}]   ;;  %s2390_s8 = inlined_call_operand.vmem [shape: f32[64,32], index: 8, kind: input, shape index: {}]   ;;  %s2391_s5 = inlined_call_operand.vmem [shape: f32[1,32], index: 5, kind: input, shape index: {}]   ;;  %s2392_s7 = inlined_call_operand.vmem [shape: f32[1,64], index: 7, kind: input, shape index: {}]   ;;  %s2393_s9 = inlined_call_operand.vmem [shape: f32[1,32], index: 9, kind: input, shape index: {}]   ;;  %s2394_s10 = inlined_call_operand.vmem [shape: f32[16,32], index: 10, kind: output, shape index: {}]  }
   0x1   :  { %v41_v0 = vld [vmem:[%s2384_s2 + $0x18] sm:$0xff]  ;;  %v40_v1 = vld [vmem:[%s2384_s2 + $0x10] sm:$0xff]  ;;  %v35_v2 = vld [vmem:[%s2385_s0] sm:$0xff]  ;;  %1912 = vmatprep.subr.mxu0 %v2071_v6  ;;  %1914 = vmatprep.mubr.msk.f32.mxu0 %vm2072_vm1, %v2071_v6  ;;  %s2076_s28 = smov 88   ;;  %s2077_s29 = smov 72   ;;  %v215_v27 = vlaneseq  ;;  %vm821_vm3 = vcmask 130048  }
   0x2   :  { %1891 = vmatprep.subr.mxu1 %v41_v0  ;;  %v39_v3 = vld [vmem:[%s2384_s2 + $0x8] sm:$0xff]  ;;  %1899 = vmatprep.mubr.msk.f32.mxu1 %vm49_vm0, %v35_v2  ;;  %v38_v4 = vld [vmem:[%s2384_s2] sm:$0xff]  ;;  %s2078_s30 = smov 112   ;;  %s2080_s11 = smov 56   ;;  %vm823_vm4 = vcmask 195584   ;;  %vm1707_vm5 = vcmask 523264  }
   0x3   :  { %1892 = vmatpush3.msra.mxu1 %v41_v0  ;;  %v36_v5 = vld [vmem:[%s2385_s0 + $0x8] sm:$0xff]  ;;  %v1795_v8 = vld [vmem:[%s2386_s3] ss:$0 sm:$0xff]  ;;  %s2073_s0 = smov 120   ;;  %s2079_s3 = smov 104   ;;  %v216_v28 = vshrl.u32 %v215_v27, 7 }
   0x4   :  { %1893 = vmatprep.subr.mxu1 %v40_v1  ;;  %s2081_s12 = smov 64   ;;  %v37_v30 = vld [vmem:[%s2387_s1] sm:$0x3]  ;;  %s2082_s1 = smov 40  }
   0x5   :  { %1894 = vmatpush3.msra.mxu1 %v40_v1  ;;  %v217_v29 = vsub.s32 0, %v216_v28  ;;  %v905_v46 = vsub.s32 1, %v216_v28  ;;  %s2083_s15 = smov 48   ;;  %s2084_s16 = smov 8  }
   0x6   :  { %1895 = vmatprep.subr.mxu1 %v39_v3  ;;  %s2085_s17 = smov 16   ;;  %s2086_s18 = smov 24  }
   0x7   :  { %1896 = vmatpush3.msra.mxu1 %v39_v3  ;;  %v218_v31 = vrot.slane %v37_v30, %v217_v29  ;;  %v906_v52 = vrot.slane %v37_v30, %v905_v46 }
   0x8   :  { %1897 = vmatprep.subr.mxu1 %v38_v4 }
   0x9   :  { %1898 = vmatpush3.msra.mxu1 %v38_v4 }
   0xa   :  { %1900 = vmatmul.mubr.msk.f32.vlgmr.msra.gmra.mxu1 %vm49_vm0, %v36_v5  ;;  %1902 = vmatprep.subr.mxu1 %v2071_v6 }
   0xb   :  { %1904 = vmatprep.mubr.msk.f32.mxu1 %vm2072_vm1, %v2071_v6 }
  0xca   :  { %v1901_v7 = vpop.f32.mrf.mxu1 }
  0xcb   :  { %v2179_v11 = vadd.f32 %v1901_v7, %v1795_v8 }
  0xcc   :  { %v122_v9 = vpop.f32.mrf.mxu1 }
  0xcd   :  { %v2171_v10 = vadd.f32 %v1795_v8, %v122_v9 }
  0xcf   :  { %307 = vrot.lane.b32.xlu1 %v2171_v10, %s2073_s0  ;;  %137 = vrot.lane.b32.xlu0 %v2171_v10, %s2074_s26 }
  0xd3   :  { %476 = vrot.lane.b32.xlu1 %v2171_v10, %s2075_s27  ;;  %309 = vrot.lane.b32.xlu0 %v2171_v10, %s2076_s28 }
  0xd7   :  { %643 = vrot.lane.b32.xlu1 %v2171_v10, %s2077_s29  ;;  %474 = vrot.lane.b32.xlu0 %v2171_v10, %s2078_s30 }
  0xdb   :  { %826 = vrot.lane.b32.xlu1 %v2179_v11, %s2074_s26  ;;  %641 = vrot.lane.b32.xlu0 %v2171_v10, %s2079_s3 }
  0xdf   :  { %995 = vrot.lane.b32.xlu1 %v2179_v11, %s2073_s0  ;;  %997 = vrot.lane.b32.xlu0 %v2179_v11, %s2076_s28 }
  0xe3   :  { %1162 = vrot.lane.b32.xlu1 %v2179_v11, %s2078_s30  ;;  %1164 = vrot.lane.b32.xlu0 %v2179_v11, %s2075_s27 }
  0xe7   :  { %1329 = vrot.lane.b32.xlu1 %v2179_v11, %s2079_s3  ;;  %1331 = vrot.lane.b32.xlu0 %v2179_v11, %s2077_s29 }
  0xeb   :  { %398 = vrot.lane.b32.xlu1 %v2171_v10, %s2080_s11  ;;  %231 = vrot.lane.b32.xlu0 %v2171_v10, %s2081_s12 }
 0x141   :  { %v308_v12 = vpop.permute.xlu1 %307  ;;  %v138_v13 = vpop.permute.xlu0 %137 }
 0x142   :  { %1903 = vmatpush3.xpose.msk.msra.mxu1 %vm139_vm2, %v138_v13 }
 0x143   :  { %1907 = vmatprep.subr.mxu1 %v2071_v6 }
 0x145   :  { %v477_v14 = vpop.permute.xlu1 %476  ;;  %1905 = vmatmul.mubr.msk.f32.vlgmr.msra.gmra.mxu1 %vm139_vm2, %v2171_v10  ;;  %v310_v15 = vpop.permute.xlu0 %309 }
 0x146   :  { %1913 = vmatpush3.xpose.msk.msra.mxu0 %vm139_vm2, %v310_v15  ;;  %1909 = vmatprep.mubr.msk.f32.mxu1 %vm2072_vm1, %v2071_v6 }
 0x147   :  { %1922 = vmatprep.subr.mxu0 %v2071_v6 }
 0x149   :  { %v644_v16 = vpop.permute.xlu1 %643  ;;  %1915 = vmatmul.mubr.msk.f32.vlgmr.msra.gmra.mxu0 %vm139_vm2, %v308_v12  ;;  %v475_v17 = vpop.permute.xlu0 %474 }
 0x14a   :  { %1923 = vmatpush3.xpose.msk.msra.mxu0 %vm139_vm2, %v477_v14  ;;  %1924 = vmatprep.mubr.msk.f32.mxu0 %vm2072_vm1, %v2071_v6 }
 0x14b   :  { %1932 = vmatprep.subr.mxu0 %v2071_v6 }
 0x14d   :  { %1925 = vmatmul.mubr.msk.f32.vlgmr.msra.gmra.mxu0 %vm139_vm2, %v475_v17  ;;  %v642_v18 = vpop.permute.xlu0 %641  ;;  %v827_v19 = vpop.permute.xlu1 %826 }
 0x14e   :  { %1933 = vmatpush3.xpose.msk.msra.mxu0 %vm139_vm2, %v644_v16  ;;  %1934 = vmatprep.mubr.msk.f32.mxu0 %vm2072_vm1, %v2071_v6 }
 0x14f   :  { %1942 = vmatprep.subr.mxu0 %v2071_v6 }
 0x151   :  { %1935 = vmatmul.mubr.msk.f32.vlgmr.msra.gmra.mxu0 %vm139_vm2, %v642_v18  ;;  %v998_v20 = vpop.permute.xlu0 %997  ;;  %v996_v21 = vpop.permute.xlu1 %995 }
 0x152   :  { %1943 = vmatpush3.xpose.msk.msra.mxu0 %vm139_vm2, %v827_v19  ;;  %1944 = vmatprep.mubr.msk.f32.mxu0 %vm2072_vm1, %v2071_v6 }
 0x153   :  { %1952 = vmatprep.subr.mxu0 %v2071_v6 }
 0x155   :  { %1945 = vmatmul.mubr.msk.f32.vlgmr.msra.gmra.mxu0 %vm139_vm2, %v2179_v11  ;;  %v1165_v22 = vpop.permute.xlu0 %1164  ;;  %v1163_v24 = vpop.permute.xlu1 %1162 }
 0x156   :  { %1953 = vmatpush3.xpose.msk.msra.mxu0 %vm139_vm2, %v998_v20  ;;  %1954 = vmatprep.mubr.msk.f32.mxu0 %vm2072_vm1, %v2071_v6 }
 0x157   :  { %1962 = vmatprep.subr.mxu0 %v2071_v6 }
 0x159   :  { %1955 = vmatmul.mubr.msk.f32.vlgmr.msra.gmra.mxu0 %vm139_vm2, %v996_v21  ;;  %v1332_v23 = vpop.permute.xlu0 %1331  ;;  %v1330_v26 = vpop.permute.xlu1 %1329 }
 0x15a   :  { %1963 = vmatpush3.xpose.msk.msra.mxu0 %vm139_vm2, %v1165_v22  ;;  %1964 = vmatprep.mubr.msk.f32.mxu0 %vm2072_vm1, %v2071_v6 }
 0x15b   :  { %1972 = vmatprep.subr.mxu0 %v2071_v6 }
 0x15d   :  { %1965 = vmatmul.mubr.msk.f32.vlgmr.msra.gmra.mxu0 %vm139_vm2, %v1163_v24  ;;  %v232_v25 = vpop.permute.xlu0 %231  ;;  %v2248_v13 = vpop.permute.xlu1 %398 }
 0x15e   :  { %1908 = vmatpush3.msra.mxu1 %v232_v25  ;;  %1973 = vmatpush3.xpose.msk.msra.mxu0 %vm139_vm2, %v1332_v23 }
 0x15f   :  { %1974 = vmatprep.mubr.msk.f32.mxu0 %vm2072_vm1, %v2071_v6  ;;  %1917 = vmatprep.subr.mxu1 %v2071_v6 }
 0x161   :  { %1975 = vmatmul.mubr.msk.f32.vlgmr.msra.gmra.mxu0 %vm139_vm2, %v1330_v26 }
 0x205   :  { %v210_v32 = vpop.f32.mrf.mxu1 }
 0x206   :  { %v214_v33 = vmul.f32 0.35355338, %v210_v32 }
 0x207   :  { %v1906_v34 = vpop.f32.mrf.mxu1 }
 0x208   :  { %v219_v35 = vadd.f32 %v218_v31, %v214_v33 }
 0x209   :  { %v381_v36 = vpop.f32.mrf.mxu0 }
 0x20a   :  { %v385_v37 = vmul.f32 0.35355338, %v381_v36  ;;  %v220_v38 = vsel %vm139_vm2, %v219_v35, -inf }
 0x20b   :  { %221 = vmax.xlane.f32.xlu0 %v220_v38  ;;  %v1916_v39 = vpop.f32.mrf.mxu0 }
 0x20c   :  { %v386_v40 = vadd.f32 %v385_v37, %v218_v31 }
 0x20d   :  { %v548_v41 = vpop.f32.mrf.mxu0 }
 0x20e   :  { %v552_v42 = vmul.f32 0.35355338, %v548_v41  ;;  %v387_v43 = vsel %vm139_vm2, %v386_v40, -inf }
 0x20f   :  { %388 = vmax.xlane.f32.xlu1 %v387_v43  ;;  %v1926_v44 = vpop.f32.mrf.mxu0 }
 0x210   :  { %v553_v45 = vadd.f32 %v552_v42, %v218_v31 }
 0x211   :  { %v715_v47 = vpop.f32.mrf.mxu0 }
 0x212   :  { %v719_v48 = vmul.f32 0.35355338, %v715_v47  ;;  %v554_v49 = vsel %vm139_vm2, %v553_v45, -inf }
 0x213   :  { %555 = vmax.xlane.f32.xlu0 %v554_v49  ;;  %v1936_v50 = vpop.f32.mrf.mxu0 }
 0x214   :  { %v720_v51 = vadd.f32 %v719_v48, %v218_v31 }
 0x215   :  { %v898_v53 = vpop.f32.mrf.mxu0 }
 0x216   :  { %v902_v54 = vmul.f32 0.35355338, %v898_v53  ;;  %v721_v55 = vsel %vm139_vm2, %v720_v51, -inf }
 0x217   :  { %722 = vmax.xlane.f32.xlu0 %v721_v55  ;;  %v1946_v56 = vpop.f32.mrf.mxu0 }
 0x218   :  { %v907_v57 = vadd.f32 %v906_v52, %v902_v54 }
 0x219   :  { %v1069_v58 = vpop.f32.mrf.mxu0 }
 0x21a   :  { %v1073_v59 = vmul.f32 0.35355338, %v1069_v58  ;;  %v908_v60 = vsel %vm139_vm2, %v907_v57, -inf }
 0x21b   :  { %909 = vmax.xlane.f32.xlu1 %v908_v60  ;;  %v1956_v61 = vpop.f32.mrf.mxu0 }
 0x21c   :  { %v1074_v62 = vadd.f32 %v1073_v59, %v906_v52 }
 0x21d   :  { %v1236_v63 = vpop.f32.mrf.mxu0 }
 0x21e   :  { %v1240_v0 = vmul.f32 0.35355338, %v1236_v63  ;;  %v1075_v1 = vsel %vm139_vm2, %v1074_v62, -inf }
 0x21f   :  { %1076 = vmax.xlane.f32.xlu0 %v1075_v1  ;;  %v1966_v2 = vpop.f32.mrf.mxu0 }
 0x220   :  { %v1241_v3 = vadd.f32 %v1240_v0, %v906_v52 }
 0x221   :  { %v1403_v4 = vpop.f32.mrf.mxu0 }
 0x222   :  { %v1407_v5 = vmul.f32 0.35355338, %v1403_v4  ;;  %v1242_v7 = vsel %vm139_vm2, %v1241_v3, -inf }
 0x223   :  { %1243 = vmax.xlane.f32.xlu1 %v1242_v7  ;;  %v1976_v8 = vpop.f32.mrf.mxu0 }
 0x224   :  { %v1408_v9 = vadd.f32 %v1407_v5, %v906_v52 }
 0x226   :  { %v1409_v12 = vsel %vm139_vm2, %v1408_v9, -inf }
 0x227   :  { %1410 = vmax.xlane.f32.xlu0 %v1409_v12 }
 0x234   :  { %732 = vrot.lane.b32.xlu1 %v2171_v10, %s2082_s1 }
 0x23d   :  { %565 = vrot.lane.b32.xlu0 %v2171_v10, %s2083_s15 }
 0x294   :  { %v222_v14 = vpop.xlane.xlu0 %221 }
 0x295   :  { %v223_v15 = vsub.f32 %v219_v35, %v222_v14 }
 0x297   :  { %v224_v16 = vmul.f32 1.442695, %v223_v15 }
 0x298   :  { %v389_v17 = vpop.xlane.xlu1 %388 }
 0x299   :  { %2039 = vpow2.f32 %v224_v16  ;;  %v390_v18 = vsub.f32 %v386_v40, %v389_v17 }
 0x29b   :  { %v391_v19 = vmul.f32 1.442695, %v390_v18 }
 0x29c   :  { %v556_v20 = vpop.xlane.xlu0 %555 }
 0x29d   :  { %2041 = vpow2.f32 %v391_v19  ;;  %v557_v21 = vsub.f32 %v553_v45, %v556_v20 }
 0x29f   :  { %v558_v22 = vmul.f32 1.442695, %v557_v21 }
 0x2a0   :  { %v723_v23 = vpop.xlane.xlu0 %722 }
 0x2a1   :  { %2043 = vpow2.f32 %v558_v22  ;;  %v724_v24 = vsub.f32 %v720_v51, %v723_v23 }
 0x2a3   :  { %v725_v25 = vmul.f32 1.442695, %v724_v24 }
 0x2a4   :  { %v910_v33 = vpop.xlane.xlu1 %909 }
 0x2a5   :  { %2045 = vpow2.f32 %v725_v25  ;;  %v911_v34 = vsub.f32 %v907_v57, %v910_v33  ;;  %v1601_v33 = vld [vmem:[%s2389_s6 + $0x18] sm:$0xff] }
 0x2a6   :  { %v2040_v26 = vpop.eup %2039 }
 0x2a7   :  { %v226_v10 = vsel %vm139_vm2, %v2040_v26, 0.0  ;;  %v912_v38 = vmul.f32 1.442695, %v911_v34 }
 0x2a8   :  { %227 = vadd.xlane.f32.xlu1 %v226_v10  ;;  %v1077_v35 = vpop.xlane.xlu0 %1076 }
 0x2a9   :  { %v1078_v37 = vsub.f32 %v1074_v62, %v1077_v35  ;;  %2047 = vpow2.f32 %v912_v38 }
 0x2aa   :  { %v2042_v27 = vpop.eup %2041 }
 0x2ab   :  { %v393_v28 = vsel %vm139_vm2, %v2042_v27, 0.0  ;;  %v1079_v41 = vmul.f32 1.442695, %v1078_v37 }
 0x2ac   :  { %394 = vadd.xlane.f32.xlu0 %v393_v28  ;;  %v1244_v36 = vpop.xlane.xlu1 %1243  ;;  %v133_v28 = vld [vmem:[%s2388_s4 + $0x10] sm:$0xff] }
 0x2ad   :  { %v1245_v39 = vsub.f32 %v1241_v3, %v1244_v36  ;;  %2049 = vpow2.f32 %v1079_v41 }
 0x2ae   :  { %v2044_v29 = vpop.eup %2043 }
 0x2af   :  { %v560_v30 = vsel %vm139_vm2, %v2044_v29, 0.0  ;;  %v1246_v42 = vmul.f32 1.442695, %v1245_v39 }
 0x2b0   :  { %561 = vadd.xlane.f32.xlu1 %v560_v30  ;;  %v1411_v40 = vpop.xlane.xlu0 %1410  ;;  %v733_v53 = vpop.permute.xlu1 %732  ;;  %v131_v30 = vld [vmem:[%s2388_s4] sm:$0xff] }
 0x2b1   :  { %v1412_v43 = vsub.f32 %v1408_v9, %v1411_v40  ;;  %2051 = vpow2.f32 %v1246_v42 }
 0x2b2   :  { %v2253_v31 = vpop.eup %2045 }
 0x2b3   :  { %v727_v32 = vsel %vm139_vm2, %v2253_v31, 0.0  ;;  %v1413_v44 = vmul.f32 1.442695, %v1412_v43 }
 0x2b4   :  { %728 = vadd.xlane.f32.xlu0 %v727_v32  ;;  %v566_v54 = vpop.permute.xlu0 %565 }
 0x2b5   :  { %2053 = vpow2.f32 %v1413_v44 }
 0x2b6   :  { %v2048_v45 = vpop.eup %2047 }
 0x2b7   :  { %v914_v47 = vsel %vm139_vm2, %v2048_v45, 0.0 }
 0x2ba   :  { %v2261_v46 = vpop.eup %2049 }
 0x2bb   :  { %v1081_v50 = vsel %vm139_vm2, %v2261_v46, 0.0 }
 0x2be   :  { %v2264_v48 = vpop.eup %2051 }
 0x2bf   :  { %v1248_v49 = vsel %vm139_vm2, %v2264_v48, 0.0 }
 0x2c1   :  { %1086 = vrot.lane.b32.xlu1 %v2179_v11, %s2080_s11 }
 0x2c2   :  { %v2270_v51 = vpop.eup %2053 }
 0x2c3   :  { %v1415_v52 = vsel %vm139_vm2, %v2270_v51, 0.0 }
 0x2ca   :  { %919 = vrot.lane.b32.xlu0 %v2179_v11, %s2081_s12 }
 0x2e5   :  { %915 = vadd.xlane.f32.xlu1 %v914_v47 }
 0x2e9   :  { %1249 = vadd.xlane.f32.xlu1 %v1248_v49  ;;  %1082 = vadd.xlane.f32.xlu0 %v1081_v50 }
 0x2ed   :  { %1416 = vadd.xlane.f32.xlu1 %v1415_v52  ;;  %v1600_v52 = vld [vmem:[%s2389_s6 + $0x10] sm:$0xff] }
 0x2fe   :  { %1420 = vrot.lane.b32.xlu1 %v2179_v11, %s2082_s1 }
 0x2ff   :  { %1253 = vrot.lane.b32.xlu0 %v2179_v11, %s2083_s15 }
 0x331   :  { %v228_v55 = vpop.xlane.xlu1 %227 }
 0x332   :  { %2055 = vrcp.f32 %v228_v55  ;;  %v1610_v55 = vld [vmem:[%s2390_s8 + $0x38] sm:$0xff] }
 0x335   :  { %v395_v56 = vpop.xlane.xlu0 %394 }
 0x336   :  { %2057 = vrcp.f32 %v395_v56  ;;  %v1609_v56 = vld [vmem:[%s2390_s8 + $0x30] sm:$0xff] }
 0x339   :  { %v562_v57 = vpop.xlane.xlu1 %561 }
 0x33a   :  { %2059 = vrcp.f32 %v562_v57  ;;  %v1608_v57 = vld [vmem:[%s2390_s8 + $0x28] sm:$0xff] }
 0x33d   :  { %v729_v58 = vpop.xlane.xlu0 %728  ;;  %v1087_v3 = vpop.permute.xlu1 %1086 }
 0x33e   :  { %2061 = vrcp.f32 %v729_v58  ;;  %v1607_v58 = vld [vmem:[%s2390_s8 + $0x20] sm:$0xff] }
 0x33f   :  { %v2056_v59 = vpop.eup %2055 }
 0x340   :  { %v230_v60 = vmul.f32 %v2056_v59, %v2040_v26 }
 0x341   :  { %v920_v2 = vpop.permute.xlu0 %919 }
 0x342   :  { %1910 = vmatmul.mubr.msk.f32.vlgmr.msra.gmra.mxu1 %vm139_vm2, %v230_v60  ;;  %v1822_v60 = vld [vmem:[%s2391_s5] ss:$0 sm:$0xff] }
 0x343   :  { %v2058_v61 = vpop.eup %2057  ;;  %1918 = vmatpush3.msra.mxu1 %v2248_v13  ;;  %1919 = vmatprep.mubr.msk.f32.mxu1 %vm2072_vm1, %v2071_v6 }
 0x344   :  { %1927 = vmatprep.subr.mxu1 %v2071_v6  ;;  %v397_v11 = vmul.f32 %v2058_v61, %v2042_v27 }
 0x346   :  { %1920 = vmatmul.mubr.msk.f32.vlgmr.msra.gmra.mxu1 %vm139_vm2, %v397_v11 }
 0x347   :  { %v2060_v62 = vpop.eup %2059  ;;  %1928 = vmatpush3.msra.mxu1 %v566_v54  ;;  %1929 = vmatprep.mubr.msk.f32.mxu1 %vm2072_vm1, %v2071_v6  ;;  %v1598_v54 = vld [vmem:[%s2389_s6] sm:$0xff] }
 0x348   :  { %1937 = vmatprep.subr.mxu1 %v2071_v6  ;;  %v564_v63 = vmul.f32 %v2060_v62, %v2044_v29  ;;  %v132_v29 = vld [vmem:[%s2388_s4 + $0x8] sm:$0xff] }
 0x34a   :  { %1930 = vmatmul.mubr.msk.f32.vlgmr.msra.gmra.mxu1 %vm139_vm2, %v564_v63  ;;  %v1606_v63 = vld [vmem:[%s2390_s8 + $0x18] sm:$0xff] }
 0x34b   :  { %v2062_v0 = vpop.eup %2061  ;;  %1938 = vmatpush3.msra.mxu1 %v733_v53  ;;  %1939 = vmatprep.mubr.msk.f32.mxu1 %vm2072_vm1, %v2071_v6  ;;  %v1599_v53 = vld [vmem:[%s2389_s6 + $0x8] sm:$0xff] }
 0x34c   :  { %1947 = vmatprep.subr.mxu1 %v2071_v6  ;;  %v731_v1 = vmul.f32 %v2062_v0, %v2253_v31  ;;  %v1605_v0 = vld [vmem:[%s2390_s8 + $0x10] sm:$0xff] }
 0x34e   :  { %1940 = vmatmul.mubr.msk.f32.vlgmr.msra.gmra.mxu1 %vm139_vm2, %v731_v1  ;;  %v1604_v1 = vld [vmem:[%s2390_s8 + $0x8] sm:$0xff] }
 0x34f   :  { %1948 = vmatpush3.msra.mxu1 %v920_v2  ;;  %1949 = vmatprep.mubr.msk.f32.mxu1 %vm2072_vm1, %v2071_v6  ;;  %v1603_v2 = vld [vmem:[%s2390_s8] sm:$0xff] }
 0x350   :  { %1957 = vmatprep.subr.mxu1 %v2071_v6 }
 0x36e   :  { %v916_v4 = vpop.xlane.xlu1 %915 }
 0x36f   :  { %2063 = vrcp.f32 %v916_v4 }
 0x372   :  { %v1250_v5 = vpop.xlane.xlu1 %1249  ;;  %v1083_v7 = vpop.xlane.xlu0 %1082 }
 0x373   :  { %2065 = vrcp.f32 %v1083_v7 }
 0x374   :  { %2067 = vrcp.f32 %v1250_v5 }
 0x376   :  { %v1417_v8 = vpop.xlane.xlu1 %1416  ;;  %v1254_v16 = vpop.permute.xlu0 %1253 }
 0x377   :  { %2069 = vrcp.f32 %v1417_v8 }
 0x37a   :  { %v1421_v19 = vpop.permute.xlu1 %1420 }
 0x37c   :  { %v2064_v9 = vpop.eup %2063 }
 0x37d   :  { %v918_v12 = vmul.f32 %v2064_v9, %v2048_v45 }
 0x37f   :  { %1950 = vmatmul.mubr.msk.f32.vlgmr.msra.gmra.mxu1 %vm139_vm2, %v918_v12 }
 0x380   :  { %1958 = vmatpush3.msra.mxu1 %v1087_v3  ;;  %1959 = vmatprep.mubr.msk.f32.mxu1 %vm2072_vm1, %v2071_v6  ;;  %v2066_v13 = vpop.eup %2065  ;;  %v1825_v3 = vld [vmem:[%s2392_s7] ss:$0 sm:$0xff] }
 0x381   :  { %1967 = vmatprep.subr.mxu1 %v2071_v6  ;;  %v1085_v14 = vmul.f32 %v2066_v13, %v2261_v46  ;;  %v2068_v15 = vpop.eup %2067  ;;  %v1828_v13 = vld [vmem:[%s2393_s9] ss:$0 sm:$0xff] }
 0x382   :  { %v1252_v17 = vmul.f32 %v2068_v15, %v2264_v48 }
 0x383   :  { %1960 = vmatmul.mubr.msk.f32.vlgmr.msra.gmra.mxu1 %vm139_vm2, %v1085_v14 }
 0x384   :  { %1968 = vmatpush3.msra.mxu1 %v1254_v16  ;;  %1969 = vmatprep.mubr.msk.f32.mxu1 %vm2072_vm1, %v2071_v6  ;;  %v2070_v18 = vpop.eup %2069 }
 0x385   :  { %1977 = vmatprep.subr.mxu1 %v2071_v6  ;;  %v1419_v20 = vmul.f32 %v2070_v18, %v2270_v51 }
 0x387   :  { %1970 = vmatmul.mubr.msk.f32.vlgmr.msra.gmra.mxu1 %vm139_vm2, %v1252_v17 }
 0x388   :  { %1978 = vmatpush3.msra.mxu1 %v1421_v19  ;;  %1979 = vmatprep.mubr.msk.f32.mxu1 %vm2072_vm1, %v2071_v6  ;;  %v134_v6 = vld [vmem:[%s2388_s4 + $0x18] sm:$0xff] }
 0x389   :  { %1982 = vmatprep.subr.mxu0 %v134_v6  ;;  %1993 = vmatprep.subr.mxu1 %v1601_v33 }
 0x38a   :  { %1983 = vmatpush3.msra.mxu0 %v134_v6 }
 0x38b   :  { %1980 = vmatmul.mubr.msk.f32.vlgmr.msra.gmra.mxu1 %vm139_vm2, %v1419_v20  ;;  %1984 = vmatprep.subr.mxu0 %v133_v28 }
 0x38c   :  { %1985 = vmatpush3.msra.mxu0 %v133_v28  ;;  %1994 = vmatpush3.msra.mxu1 %v1601_v33 }
 0x38d   :  { %1986 = vmatprep.subr.mxu0 %v132_v29  ;;  %1995 = vmatprep.subr.mxu1 %v1600_v52 }
 0x38e   :  { %1987 = vmatpush3.msra.mxu0 %v132_v29  ;;  %1996 = vmatpush3.msra.mxu1 %v1600_v52 }
 0x38f   :  { %1988 = vmatprep.subr.mxu0 %v131_v30  ;;  %1997 = vmatprep.subr.mxu1 %v1599_v53 }
 0x390   :  { %1989 = vmatpush3.msra.mxu0 %v131_v30  ;;  %1998 = vmatpush3.msra.mxu1 %v1599_v53 }
 0x391   :  { %1999 = vmatprep.subr.mxu1 %v1598_v54  ;;  %2004 = vmatprep.subr.mxu0 %v1610_v55 }
 0x392   :  { %2000 = vmatpush3.msra.mxu1 %v1598_v54 }
 0x402   :  { %v303_v21 = vpop.f32.mrf.mxu1 }
 0x404   :  { %v1911_v22 = vpop.f32.mrf.mxu1 }
 0x406   :  { %v470_v23 = vpop.f32.mrf.mxu1 }
 0x407   :  { %809 = vrot.lane.b32.xlu0 %v470_v23, %s2084_s16 }
 0x408   :  { %v1921_v24 = vpop.f32.mrf.mxu1 }
 0x40a   :  { %v637_v25 = vpop.f32.mrf.mxu1 }
 0x40b   :  { %813 = vrot.lane.b32.xlu1 %v637_v25, %s2085_s17 }
 0x40c   :  { %v1931_v26 = vpop.f32.mrf.mxu1 }
 0x40e   :  { %v804_v10 = vpop.f32.mrf.mxu1 }
 0x40f   :  { %817 = vrot.lane.b32.xlu1 %v804_v10, %s2086_s18 }
 0x410   :  { %v1941_v27 = vpop.f32.mrf.mxu1 }
 0x43f   :  { %v991_v31 = vpop.f32.mrf.mxu1 }
 0x441   :  { %v1951_v32 = vpop.f32.mrf.mxu1 }
 0x443   :  { %v1158_v34 = vpop.f32.mrf.mxu1 }
 0x444   :  { %1497 = vrot.lane.b32.xlu0 %v1158_v34, %s2084_s16 }
 0x445   :  { %v1961_v35 = vpop.f32.mrf.mxu1 }
 0x447   :  { %v1325_v36 = vpop.f32.mrf.mxu1 }
 0x448   :  { %1501 = vrot.lane.b32.xlu0 %v1325_v36, %s2085_s17 }
 0x449   :  { %v1971_v37 = vpop.f32.mrf.mxu1 }
 0x44b   :  { %v1492_v38 = vpop.f32.mrf.mxu1 }
 0x44c   :  { %1505 = vrot.lane.b32.xlu1 %v1492_v38, %s2086_s18 }
 0x44d   :  { %v1981_v39 = vpop.f32.mrf.mxu1 }
 0x479   :  { %v810_v40 = vpop.permute.xlu0 %809 }
 0x47a   :  { %v820_v42 = vsel %vm139_vm2, %v303_v21, %v810_v40 }
 0x47d   :  { %v814_v41 = vpop.permute.xlu1 %813 }
 0x47e   :  { %v822_v43 = vsel %vm821_vm3, %v820_v42, %v814_v41 }
 0x481   :  { %v818_v44 = vpop.permute.xlu1 %817 }
 0x482   :  { %v824_v45 = vsel %vm823_vm4, %v822_v43, %v818_v44 }
 0x483   :  { %1990 = vmatprep.mubr.msk.f32.mxu0 %vm49_vm0, %v824_v45 }
 0x4b6   :  { %v1498_v46 = vpop.permute.xlu0 %1497 }
 0x4b7   :  { %v1508_v48 = vsel %vm139_vm2, %v991_v31, %v1498_v46 }
 0x4ba   :  { %v1502_v47 = vpop.permute.xlu0 %1501 }
 0x4bb   :  { %v1509_v49 = vsel %vm821_vm3, %v1508_v48, %v1502_v47 }
 0x4be   :  { %v1506_v50 = vpop.permute.xlu1 %1505 }
 0x4bf   :  { %v1510_v51 = vsel %vm823_vm4, %v1509_v49, %v1506_v50 }
 0x4c0   :  { %1991 = vmatmul.mubr.msk.f32.vlgmr.msra.gmra.mxu0 %vm49_vm0, %v1510_v51 }
 0x4c1   :  { %2005 = vmatpush3.msra.mxu0 %v1610_v55 }
 0x4c2   :  { %2006 = vmatprep.subr.mxu0 %v1609_v56 }
 0x4c3   :  { %2007 = vmatpush3.msra.mxu0 %v1609_v56 }
 0x4c4   :  { %2008 = vmatprep.subr.mxu0 %v1608_v57 }
 0x4c5   :  { %2009 = vmatpush3.msra.mxu0 %v1608_v57 }
 0x4c6   :  { %2010 = vmatprep.subr.mxu0 %v1607_v58 }
 0x4c7   :  { %2011 = vmatpush3.msra.mxu0 %v1607_v58 }
 0x4c8   :  { %2012 = vmatprep.subr.mxu0 %v1606_v63 }
 0x4c9   :  { %2013 = vmatpush3.msra.mxu0 %v1606_v63 }
 0x4ca   :  { %2014 = vmatprep.subr.mxu0 %v1605_v0 }
 0x4cb   :  { %2015 = vmatpush3.msra.mxu0 %v1605_v0 }
 0x4cc   :  { %2016 = vmatprep.subr.mxu0 %v1604_v1 }
 0x4cd   :  { %2017 = vmatpush3.msra.mxu0 %v1604_v1 }
 0x4ce   :  { %2018 = vmatprep.subr.mxu0 %v1603_v2 }
 0x4cf   :  { %2019 = vmatpush3.msra.mxu0 %v1603_v2 }
 0x580   :  { %v1992_v59 = vpop.f32.mrf.mxu0 }
 0x581   :  { %v1595_v62 = vadd.f32 %v1992_v59, %v1822_v60 }
 0x582   :  { %v1589_v61 = vpop.f32.mrf.mxu0 }
 0x583   :  { %v1590_v11 = vadd.f32 %v1822_v60, %v1589_v61 }
 0x585   :  { %2001 = vmatprep.mubr.msk.f32.mxu1 %vm49_vm0, %v1590_v11 }
 0x586   :  { %2002 = vmatmul.mubr.msk.f32.vlgmr.msra.gmra.mxu1 %vm49_vm0, %v1595_v62 }
 0x646   :  { %v2003_v4 = vpop.f32.mrf.mxu1 }
 0x647   :  { %v1696_v5 = vadd.f32 %v2003_v4, %v1825_v3 }
 0x648   :  { %v1690_v7 = vpop.f32.mrf.mxu1 }
 0x649   :  { %v1691_v8 = vadd.f32 %v1825_v3, %v1690_v7  ;;  %v1700_v12 = vmax.f32 %v1696_v5, 0.0 }
 0x64b   :  { %v1699_v9 = vmax.f32 %v1691_v8, 0.0 }
 0x64d   :  { %2020 = vmatprep.mubr.msk.f32.mxu0 %vm1707_vm5, %v1699_v9 }
 0x64e   :  { %2021 = vmatmul.mubr.msk.f32.vlgmr.msra.gmra.mxu0 %vm1707_vm5, %v1700_v12 }
 0x70e   :  { %v2022_v14 = vpop.f32.mrf.mxu0 }
 0x70f   :  { %v1786_v15 = vadd.f32 %v2022_v14, %v1828_v13 }
 0x710   :  { %v1780_v16 = vpop.f32.mrf.mxu0 }
 0x711   :  { %1790 = vst.msk [vmem:[%s2394_s10 + $0x8] sm:$0xff] %vm49_vm0, %v1786_v15  ;;  %v1781_v17 = vadd.f32 %v1828_v13, %v1780_v16 }
 0x713   :  { %1789 = vst.msk [vmem:[%s2394_s10] sm:$0xff] %vm49_vm0, %v1781_v17 }

// kernel: transformer_forward.7
= control target key start
LH: loop header
LB: loop body
LE: loop exit
PB: predicated region body
PF: predicated region fallthrough
CT: control target
= control target key end

     0   :  { %vm76_vm0 = vcmask 261120   ;;  %v3976_v6 = vmov 0.0   ;;  %vm3977_vm1 = vmmov 0   ;;  %s3979_s30 = smov 96   ;;  %s3981_s19 = smov 88   ;;  %vm166_vm2 = vcmask 64512   ;;  %s4591_s4 = inlined_call_operand.vmem [shape: f32[32,96], index: 4, kind: input, shape index: {}]   ;;  %s4592_s0 = inlined_call_operand.vmem [shape: f32[16,32], index: 0, kind: input, shape index: {}]   ;;  %s4593_s5 = inlined_call_operand.vmem [shape: f32[1,96], index: 5, kind: input, shape index: {}]   ;;  %s4594_s3 = inlined_call_operand.vmem [shape: f32[2,8], index: 3, kind: input, shape index: {}]   ;;  %s4595_s6 = inlined_call_operand.vmem [shape: f32[32,32], index: 6, kind: input, shape index: {}]   ;;  %s4596_s10 = inlined_call_operand.vmem [shape: f32[32,64], index: 10, kind: input, shape index: {}]   ;;  %s4597_s1 = inlined_call_operand.vmem [shape: f32[16,32], index: 1, kind: input, shape index: {}]   ;;  %s4598_s8 = inlined_call_operand.vmem [shape: f32[32,32], index: 8, kind: input, shape index: {}]   ;;  %s4599_s7 = inlined_call_operand.vmem [shape: f32[1,32], index: 7, kind: input, shape index: {}]   ;;  %s4600_s11 = inlined_call_operand.vmem [shape: f32[1,64], index: 11, kind: input, shape index: {}]   ;;  %s4601_s9 = inlined_call_operand.vmem [shape: f32[1,32], index: 9, kind: input, shape index: {}]   ;;  %s4602_s2 = inlined_call_operand.vmem [shape: f32[2,8], index: 2, kind: input, shape index: {}]   ;;  %s4603_s12 = inlined_call_operand.vmem [shape: f32[32,32], index: 12, kind: input, shape index: {}]   ;;  %s4604_s14 = inlined_call_operand.vmem [shape: f32[32,64], index: 14, kind: input, shape index: {}]   ;;  %s4605_s16 = inlined_call_operand.vmem [shape: f32[64,32], index: 16, kind: input, shape index: {}]   ;;  %s4606_s13 = inlined_call_operand.vmem [shape: f32[1,32], index: 13, kind: input, shape index: {}]   ;;  %s4607_s15 = inlined_call_operand.vmem [shape: f32[1,64], index: 15, kind: input, shape index: {}]   ;;  %s4608_s17 = inlined_call_operand.vmem [shape: f32[1,32], index: 17, kind: input, shape index: {}]   ;;  %s4609_s18 = inlined_call_operand.vmem [shape: f32[16,32], index: 18, kind: output, shape index: {}]  }
   0x1   :  { %4616 = sst [smem:[#allocation2_spill]] %s4591_s4  ;;  %3672 = vmatprep.subr.mxu0 %v3976_v6  ;;  %3674 = vmatprep.mubr.msk.f32.mxu0 %vm3977_vm1, %v3976_v6  ;;  %s4612_s4 = smov 80   ;;  %v242_v27 = vlaneseq  ;;  %v64_v30 = vld [vmem:[%s4594_s3] sm:$0x3]  ;;  %vm848_vm3 = vcmask 130048   ;;  %vm850_vm4 = vcmask 195584  }
   0x2   :  { %4617 = sst [smem:[#allocation3_spill]] %s4592_s0  ;;  %s4614_s0 = smov 72   ;;  %vm3384_vm5 = vcmask 523264  }
   0x3   :  { %4618 = sst [smem:[#allocation4_spill]] %s4593_s5  ;;  %s3984_s21 = smov 104   ;;  %v4198_v28 = vshrl.u32 %v242_v27, 7 }
   0x4   :  { %s4619_s29 = sld [smem:[#allocation2_spill]]  ;;  %s3985_s22 = smov 56  }
   0x5   :  { %s4620_s20 = sld [smem:[#allocation3_spill]]  ;;  %s3986_s5 = smov 64   ;;  %v244_v29 = vsub.s32 0, %v4198_v28  ;;  %v932_v46 = vsub.s32 1, %v4198_v28 }
   0x6   :  { %s4621_s28 = sld [smem:[#allocation4_spill]]  ;;  %s3987_s3 = smov 40  }
   0x7   :  { %v245_v31 = vrot.slane %v64_v30, %v244_v29  ;;  %v933_v52 = vrot.slane %v64_v30, %v932_v46  ;;  %s3988_s25 = smov 48   ;;  %s3989_s26 = smov 8  }
   0x8   :  { %s3990_s27 = smov 16  }
   0xa   :  { %v68_v0 = vld [vmem:[%s4619_s29 + $0x18] sm:$0xff]  ;;  %v67_v1 = vld [vmem:[%s4619_s29 + $0x10] sm:$0xff]  ;;  %v66_v3 = vld [vmem:[%s4619_s29 + $0x8] sm:$0xff] }
   0xb   :  { %3651 = vmatprep.subr.mxu1 %v68_v0  ;;  %v4096_v2 = vld [vmem:[%s4620_s20] sm:$0xff]  ;;  %v4109_v5 = vld [vmem:[%s4620_s20 + $0x8] sm:$0xff]  ;;  %s3983_s20 = smov 112  }
   0xc   :  { %3652 = vmatpush3.msra.mxu1 %v68_v0  ;;  %3659 = vmatprep.mubr.msk.f32.mxu1 %vm76_vm0, %v4096_v2  ;;  %v65_v4 = vld [vmem:[%s4619_s29] sm:$0xff]  ;;  %s3978_s29 = smov 120  }
   0xd   :  { %3653 = vmatprep.subr.mxu1 %v67_v1  ;;  %v3472_v8 = vld [vmem:[%s4621_s28] ss:$0 sm:$0xff]  ;;  %s3991_s28 = smov 24  }
   0xe   :  { %3654 = vmatpush3.msra.mxu1 %v67_v1 }
   0xf   :  { %3655 = vmatprep.subr.mxu1 %v66_v3 }
  0x10   :  { %3656 = vmatpush3.msra.mxu1 %v66_v3 }
  0x11   :  { %3657 = vmatprep.subr.mxu1 %v65_v4 }
  0x12   :  { %3658 = vmatpush3.msra.mxu1 %v65_v4 }
  0x13   :  { %3660 = vmatmul.mubr.msk.f32.vlgmr.msra.gmra.mxu1 %vm76_vm0, %v4109_v5  ;;  %3662 = vmatprep.subr.mxu1 %v3976_v6 }
  0x14   :  { %3664 = vmatprep.mubr.msk.f32.mxu1 %vm3977_vm1, %v3976_v6 }
  0xd3   :  { %v3661_v7 = vpop.f32.mrf.mxu1 }
  0xd4   :  { %v4136_v11 = vadd.f32 %v3661_v7, %v3472_v8 }
  0xd5   :  { %v149_v9 = vpop.f32.mrf.mxu1 }
  0xd6   :  { %v4122_v10 = vadd.f32 %v3472_v8, %v149_v9 }
  0xd8   :  { %334 = vrot.lane.b32.xlu1 %v4122_v10, %s3978_s29  ;;  %164 = vrot.lane.b32.xlu0 %v4122_v10, %s3979_s30 }
  0xdc   :  { %503 = vrot.lane.b32.xlu1 %v4122_v10, %s4612_s4  ;;  %336 = vrot.lane.b32.xlu0 %v4122_v10, %s3981_s19 }
  0xe0   :  { %670 = vrot.lane.b32.xlu1 %v4122_v10, %s4614_s0  ;;  %501 = vrot.lane.b32.xlu0 %v4122_v10, %s3983_s20 }
  0xe4   :  { %853 = vrot.lane.b32.xlu1 %v4136_v11, %s3979_s30  ;;  %668 = vrot.lane.b32.xlu0 %v4122_v10, %s3984_s21 }
  0xe8   :  { %1022 = vrot.lane.b32.xlu1 %v4136_v11, %s3978_s29  ;;  %1024 = vrot.lane.b32.xlu0 %v4136_v11, %s3981_s19 }
  0xec   :  { %1189 = vrot.lane.b32.xlu1 %v4136_v11, %s3983_s20  ;;  %1191 = vrot.lane.b32.xlu0 %v4136_v11, %s4612_s4 }
  0xf0   :  { %1356 = vrot.lane.b32.xlu1 %v4136_v11, %s3984_s21  ;;  %1358 = vrot.lane.b32.xlu0 %v4136_v11, %s4614_s0 }
  0xf4   :  { %425 = vrot.lane.b32.xlu1 %v4122_v10, %s3985_s22  ;;  %258 = vrot.lane.b32.xlu0 %v4122_v10, %s3986_s5 }
 0x14a   :  { %v335_v12 = vpop.permute.xlu1 %334  ;;  %v165_v13 = vpop.permute.xlu0 %164 }
 0x14b   :  { %3663 = vmatpush3.xpose.msk.msra.mxu1 %vm166_vm2, %v165_v13 }
 0x14c   :  { %3667 = vmatprep.subr.mxu1 %v3976_v6 }
 0x14e   :  { %v504_v14 = vpop.permute.xlu1 %503  ;;  %3665 = vmatmul.mubr.msk.f32.vlgmr.msra.gmra.mxu1 %vm166_vm2, %v4122_v10  ;;  %v337_v15 = vpop.permute.xlu0 %336 }
 0x14f   :  { %3673 = vmatpush3.xpose.msk.msra.mxu0 %vm166_vm2, %v337_v15  ;;  %3669 = vmatprep.mubr.msk.f32.mxu1 %vm3977_vm1, %v3976_v6 }
 0x150   :  { %3682 = vmatprep.subr.mxu0 %v3976_v6 }
 0x152   :  { %v671_v16 = vpop.permute.xlu1 %670  ;;  %3675 = vmatmul.mubr.msk.f32.vlgmr.msra.gmra.mxu0 %vm166_vm2, %v335_v12  ;;  %v502_v17 = vpop.permute.xlu0 %501 }
 0x153   :  { %3683 = vmatpush3.xpose.msk.msra.mxu0 %vm166_vm2, %v504_v14  ;;  %3684 = vmatprep.mubr.msk.f32.mxu0 %vm3977_vm1, %v3976_v6 }
 0x154   :  { %3692 = vmatprep.subr.mxu0 %v3976_v6 }
 0x156   :  { %3685 = vmatmul.mubr.msk.f32.vlgmr.msra.gmra.mxu0 %vm166_vm2, %v502_v17  ;;  %v669_v18 = vpop.permute.xlu0 %668  ;;  %v854_v19 = vpop.permute.xlu1 %853 }
 0x157   :  { %3693 = vmatpush3.xpose.msk.msra.mxu0 %vm166_vm2, %v671_v16  ;;  %3694 = vmatprep.mubr.msk.f32.mxu0 %vm3977_vm1, %v3976_v6 }
 0x158   :  { %3702 = vmatprep.subr.mxu0 %v3976_v6 }
 0x15a   :  { %3695 = vmatmul.mubr.msk.f32.vlgmr.msra.gmra.mxu0 %vm166_vm2, %v669_v18  ;;  %v1025_v20 = vpop.permute.xlu0 %1024  ;;  %v1023_v21 = vpop.permute.xlu1 %1022 }
 0x15b   :  { %3703 = vmatpush3.xpose.msk.msra.mxu0 %vm166_vm2, %v854_v19  ;;  %3704 = vmatprep.mubr.msk.f32.mxu0 %vm3977_vm1, %v3976_v6 }
 0x15c   :  { %3712 = vmatprep.subr.mxu0 %v3976_v6 }
 0x15e   :  { %3705 = vmatmul.mubr.msk.f32.vlgmr.msra.gmra.mxu0 %vm166_vm2, %v4136_v11  ;;  %v1192_v22 = vpop.permute.xlu0 %1191  ;;  %v1190_v24 = vpop.permute.xlu1 %1189 }
 0x15f   :  { %3713 = vmatpush3.xpose.msk.msra.mxu0 %vm166_vm2, %v1025_v20  ;;  %3714 = vmatprep.mubr.msk.f32.mxu0 %vm3977_vm1, %v3976_v6 }
 0x160   :  { %3722 = vmatprep.subr.mxu0 %v3976_v6 }
 0x162   :  { %3715 = vmatmul.mubr.msk.f32.vlgmr.msra.gmra.mxu0 %vm166_vm2, %v1023_v21  ;;  %v1359_v23 = vpop.permute.xlu0 %1358  ;;  %v1357_v26 = vpop.permute.xlu1 %1356 }
 0x163   :  { %3723 = vmatpush3.xpose.msk.msra.mxu0 %vm166_vm2, %v1192_v22  ;;  %3724 = vmatprep.mubr.msk.f32.mxu0 %vm3977_vm1, %v3976_v6 }
 0x164   :  { %3732 = vmatprep.subr.mxu0 %v3976_v6 }
 0x166   :  { %3725 = vmatmul.mubr.msk.f32.vlgmr.msra.gmra.mxu0 %vm166_vm2, %v1190_v24  ;;  %v259_v25 = vpop.permute.xlu0 %258  ;;  %v4221_v15 = vpop.permute.xlu1 %425 }
 0x167   :  { %3668 = vmatpush3.msra.mxu1 %v259_v25  ;;  %3733 = vmatpush3.xpose.msk.msra.mxu0 %vm166_vm2, %v1359_v23 }
 0x168   :  { %3734 = vmatprep.mubr.msk.f32.mxu0 %vm3977_vm1, %v3976_v6  ;;  %3677 = vmatprep.subr.mxu1 %v3976_v6 }
 0x16a   :  { %3735 = vmatmul.mubr.msk.f32.vlgmr.msra.gmra.mxu0 %vm166_vm2, %v1357_v26 }
 0x20e   :  { %v237_v32 = vpop.f32.mrf.mxu1 }
 0x20f   :  { %v241_v33 = vmul.f32 0.35355338, %v237_v32 }
 0x210   :  { %v3666_v34 = vpop.f32.mrf.mxu1 }
 0x211   :  { %v246_v35 = vadd.f32 %v245_v31, %v241_v33 }
 0x212   :  { %v408_v36 = vpop.f32.mrf.mxu0 }
 0x213   :  { %v412_v37 = vmul.f32 0.35355338, %v408_v36  ;;  %v247_v38 = vsel %vm166_vm2, %v246_v35, -inf }
 0x214   :  { %248 = vmax.xlane.f32.xlu0 %v247_v38  ;;  %v3676_v39 = vpop.f32.mrf.mxu0 }
 0x215   :  { %v413_v40 = vadd.f32 %v412_v37, %v245_v31 }
 0x216   :  { %v575_v41 = vpop.f32.mrf.mxu0 }
 0x217   :  { %v579_v42 = vmul.f32 0.35355338, %v575_v41  ;;  %v414_v43 = vsel %vm166_vm2, %v413_v40, -inf }
 0x218   :  { %415 = vmax.xlane.f32.xlu1 %v414_v43  ;;  %v3686_v44 = vpop.f32.mrf.mxu0 }
 0x219   :  { %v580_v45 = vadd.f32 %v579_v42, %v245_v31 }
 0x21a   :  { %v742_v47 = vpop.f32.mrf.mxu0 }
 0x21b   :  { %v746_v48 = vmul.f32 0.35355338, %v742_v47  ;;  %v581_v49 = vsel %vm166_vm2, %v580_v45, -inf }
 0x21c   :  { %582 = vmax.xlane.f32.xlu0 %v581_v49  ;;  %v3696_v50 = vpop.f32.mrf.mxu0 }
 0x21d   :  { %v747_v51 = vadd.f32 %v746_v48, %v245_v31 }
 0x21e   :  { %v925_v53 = vpop.f32.mrf.mxu0 }
 0x21f   :  { %v929_v54 = vmul.f32 0.35355338, %v925_v53  ;;  %v748_v55 = vsel %vm166_vm2, %v747_v51, -inf }
 0x220   :  { %749 = vmax.xlane.f32.xlu0 %v748_v55  ;;  %v3706_v56 = vpop.f32.mrf.mxu0 }
 0x221   :  { %v934_v57 = vadd.f32 %v933_v52, %v929_v54 }
 0x222   :  { %v1096_v58 = vpop.f32.mrf.mxu0 }
 0x223   :  { %v1100_v59 = vmul.f32 0.35355338, %v1096_v58  ;;  %v935_v60 = vsel %vm166_vm2, %v934_v57, -inf }
 0x224   :  { %936 = vmax.xlane.f32.xlu1 %v935_v60  ;;  %v3716_v61 = vpop.f32.mrf.mxu0 }
 0x225   :  { %v1101_v62 = vadd.f32 %v1100_v59, %v933_v52 }
 0x226   :  { %v1263_v63 = vpop.f32.mrf.mxu0 }
 0x227   :  { %v1267_v0 = vmul.f32 0.35355338, %v1263_v63  ;;  %v1102_v1 = vsel %vm166_vm2, %v1101_v62, -inf }
 0x228   :  { %1103 = vmax.xlane.f32.xlu0 %v1102_v1  ;;  %v3726_v3 = vpop.f32.mrf.mxu0 }
 0x229   :  { %v1268_v4 = vadd.f32 %v1267_v0, %v933_v52 }
 0x22a   :  { %v1430_v7 = vpop.f32.mrf.mxu0 }
 0x22b   :  { %v1434_v8 = vmul.f32 0.35355338, %v1430_v7  ;;  %v1269_v9 = vsel %vm166_vm2, %v1268_v4, -inf }
 0x22c   :  { %1270 = vmax.xlane.f32.xlu1 %v1269_v9  ;;  %v3736_v12 = vpop.f32.mrf.mxu0 }
 0x22d   :  { %v1435_v13 = vadd.f32 %v1434_v8, %v933_v52 }
 0x22f   :  { %v1436_v14 = vsel %vm166_vm2, %v1435_v13, -inf }
 0x230   :  { %1437 = vmax.xlane.f32.xlu0 %v1436_v14 }
 0x23d   :  { %759 = vrot.lane.b32.xlu1 %v4122_v10, %s3987_s3 }
 0x246   :  { %592 = vrot.lane.b32.xlu0 %v4122_v10, %s3988_s25 }
 0x29d   :  { %v249_v16 = vpop.xlane.xlu0 %248 }
 0x29e   :  { %v250_v17 = vsub.f32 %v246_v35, %v249_v16 }
 0x2a0   :  { %v251_v18 = vmul.f32 1.442695, %v250_v17 }
 0x2a1   :  { %v416_v19 = vpop.xlane.xlu1 %415 }
 0x2a2   :  { %3912 = vpow2.f32 %v251_v18  ;;  %v417_v20 = vsub.f32 %v413_v40, %v416_v19 }
 0x2a4   :  { %v418_v21 = vmul.f32 1.442695, %v417_v20 }
 0x2a5   :  { %v583_v22 = vpop.xlane.xlu0 %582 }
 0x2a6   :  { %3914 = vpow2.f32 %v418_v21  ;;  %v584_v23 = vsub.f32 %v580_v45, %v583_v22 }
 0x2a8   :  { %v585_v24 = vmul.f32 1.442695, %v584_v23 }
 0x2a9   :  { %v750_v25 = vpop.xlane.xlu0 %749 }
 0x2aa   :  { %3916 = vpow2.f32 %v585_v24  ;;  %v751_v26 = vsub.f32 %v747_v51, %v750_v25 }
 0x2ac   :  { %v752_v27 = vmul.f32 1.442695, %v751_v26 }
 0x2ad   :  { %v937_v37 = vpop.xlane.xlu1 %936 }
 0x2ae   :  { %3918 = vpow2.f32 %v752_v27  ;;  %v938_v38 = vsub.f32 %v934_v57, %v937_v37  ;;  %v161_v37 = vld [vmem:[%s4595_s6 + $0x18] sm:$0xff] }
 0x2af   :  { %v3913_v30 = vpop.eup %3912  ;;  %3742 = vmatprep.subr.mxu0 %v161_v37 }
 0x2b0   :  { %v253_v10 = vsel %vm166_vm2, %v3913_v30, 0.0  ;;  %v939_v42 = vmul.f32 1.442695, %v938_v38  ;;  %v160_v38 = vld [vmem:[%s4595_s6 + $0x10] sm:$0xff]  ;;  %3743 = vmatpush3.msra.mxu0 %v161_v37 }
 0x2b1   :  { %254 = vadd.xlane.f32.xlu1 %v253_v10  ;;  %v1104_v39 = vpop.xlane.xlu0 %1103  ;;  %3744 = vmatprep.subr.mxu0 %v160_v38 }
 0x2b2   :  { %v1105_v41 = vsub.f32 %v1101_v62, %v1104_v39  ;;  %3920 = vpow2.f32 %v939_v42  ;;  %v159_v39 = vld [vmem:[%s4595_s6 + $0x8] sm:$0xff]  ;;  %3745 = vmatpush3.msra.mxu0 %v160_v38 }
 0x2b3   :  { %v3915_v31 = vpop.eup %3914  ;;  %3746 = vmatprep.subr.mxu0 %v159_v39 }
 0x2b4   :  { %v420_v32 = vsel %vm166_vm2, %v3915_v31, 0.0  ;;  %v1106_v45 = vmul.f32 1.442695, %v1105_v41  ;;  %3747 = vmatpush3.msra.mxu0 %v159_v39 }
 0x2b5   :  { %421 = vadd.xlane.f32.xlu0 %v420_v32  ;;  %v1271_v40 = vpop.xlane.xlu1 %1270 }
 0x2b6   :  { %v1272_v43 = vsub.f32 %v1268_v4, %v1271_v40  ;;  %3922 = vpow2.f32 %v1106_v45  ;;  %v158_v40 = vld [vmem:[%s4595_s6] sm:$0xff] }
 0x2b7   :  { %v3917_v33 = vpop.eup %3916  ;;  %3748 = vmatprep.subr.mxu0 %v158_v40 }
 0x2b8   :  { %v587_v34 = vsel %vm166_vm2, %v3917_v33, 0.0  ;;  %v1273_v47 = vmul.f32 1.442695, %v1272_v43  ;;  %3749 = vmatpush3.msra.mxu0 %v158_v40  ;;  %v1722_v43 = vld [vmem:[%s4596_s10 + $0x18] sm:$0xff] }
 0x2b9   :  { %588 = vadd.xlane.f32.xlu1 %v587_v34  ;;  %v1438_v44 = vpop.xlane.xlu0 %1437  ;;  %v760_v58 = vpop.permute.xlu1 %759  ;;  %3764 = vmatprep.subr.mxu0 %v1722_v43 }
 0x2ba   :  { %v1439_v48 = vsub.f32 %v1435_v13, %v1438_v44  ;;  %3924 = vpow2.f32 %v1273_v47 }
 0x2bb   :  { %v4226_v35 = vpop.eup %3918 }
 0x2bc   :  { %v754_v36 = vsel %vm166_vm2, %v4226_v35, 0.0  ;;  %v1440_v49 = vmul.f32 1.442695, %v1439_v48 }
 0x2bd   :  { %755 = vadd.xlane.f32.xlu0 %v754_v36  ;;  %v593_v59 = vpop.permute.xlu0 %592 }
 0x2be   :  { %3926 = vpow2.f32 %v1440_v49 }
 0x2bf   :  { %v3921_v50 = vpop.eup %3920 }
 0x2c0   :  { %v941_v52 = vsel %vm166_vm2, %v3921_v50, 0.0 }
 0x2c3   :  { %v4234_v51 = vpop.eup %3922 }
 0x2c4   :  { %v1108_v55 = vsel %vm166_vm2, %v4234_v51, 0.0 }
 0x2c7   :  { %v4237_v53 = vpop.eup %3924 }
 0x2c8   :  { %v1275_v54 = vsel %vm166_vm2, %v4237_v53, 0.0 }
 0x2ca   :  { %1113 = vrot.lane.b32.xlu1 %v4136_v11, %s3985_s22 }
 0x2cb   :  { %v4243_v56 = vpop.eup %3926 }
 0x2cc   :  { %v1442_v57 = vsel %vm166_vm2, %v4243_v56, 0.0 }
 0x2d3   :  { %946 = vrot.lane.b32.xlu0 %v4136_v11, %s3986_s5 }
 0x2ee   :  { %942 = vadd.xlane.f32.xlu1 %v941_v52 }
 0x2f2   :  { %1276 = vadd.xlane.f32.xlu1 %v1275_v54  ;;  %1109 = vadd.xlane.f32.xlu0 %v1108_v55 }
 0x2f6   :  { %1443 = vadd.xlane.f32.xlu1 %v1442_v57 }
 0x307   :  { %1447 = vrot.lane.b32.xlu1 %v4136_v11, %s3987_s3 }
 0x308   :  { %1280 = vrot.lane.b32.xlu0 %v4136_v11, %s3988_s25 }
 0x33a   :  { %v255_v60 = vpop.xlane.xlu1 %254 }
 0x33b   :  { %3928 = vrcp.f32 %v255_v60 }
 0x33e   :  { %v422_v61 = vpop.xlane.xlu0 %421 }
 0x33f   :  { %3930 = vrcp.f32 %v422_v61 }
 0x342   :  { %v589_v62 = vpop.xlane.xlu1 %588 }
 0x343   :  { %3932 = vrcp.f32 %v589_v62  ;;  %v61_v62 = vld [vmem:[%s4597_s1] sm:$0xff] }
 0x346   :  { %v756_v63 = vpop.xlane.xlu0 %755  ;;  %v1114_v13 = vpop.permute.xlu1 %1113 }
 0x347   :  { %3934 = vrcp.f32 %v756_v63 }
 0x348   :  { %v3929_v0 = vpop.eup %3928 }
 0x349   :  { %v257_v1 = vmul.f32 %v3929_v0, %v3913_v30  ;;  %v1721_v0 = vld [vmem:[%s4596_s10 + $0x10] sm:$0xff] }
 0x34a   :  { %v947_v12 = vpop.permute.xlu0 %946 }
 0x34b   :  { %3670 = vmatmul.mubr.msk.f32.vlgmr.msra.gmra.mxu1 %vm166_vm2, %v257_v1  ;;  %v1720_v1 = vld [vmem:[%s4596_s10 + $0x8] sm:$0xff] }
 0x34c   :  { %v3931_v3 = vpop.eup %3930  ;;  %3678 = vmatpush3.msra.mxu1 %v4221_v15  ;;  %3679 = vmatprep.mubr.msk.f32.mxu1 %vm3977_vm1, %v3976_v6 }
 0x34d   :  { %3687 = vmatprep.subr.mxu1 %v3976_v6  ;;  %v424_v11 = vmul.f32 %v3931_v3, %v3915_v31  ;;  %v1719_v3 = vld [vmem:[%s4596_s10] sm:$0xff] }
 0x34f   :  { %3680 = vmatmul.mubr.msk.f32.vlgmr.msra.gmra.mxu1 %vm166_vm2, %v424_v11  ;;  %v62_v11 = vld [vmem:[%s4597_s1 + $0x8] sm:$0xff] }
 0x350   :  { %v3933_v4 = vpop.eup %3932  ;;  %3688 = vmatpush3.msra.mxu1 %v593_v59  ;;  %3689 = vmatprep.mubr.msk.f32.mxu1 %vm3977_vm1, %v3976_v6 }
 0x351   :  { %3697 = vmatprep.subr.mxu1 %v3976_v6  ;;  %v591_v7 = vmul.f32 %v3933_v4, %v3917_v33  ;;  %v1630_v4 = vld [vmem:[%s4598_s8 + $0x18] sm:$0xff] }
 0x353   :  { %3690 = vmatmul.mubr.msk.f32.vlgmr.msra.gmra.mxu1 %vm166_vm2, %v591_v7  ;;  %v1629_v7 = vld [vmem:[%s4598_s8 + $0x10] sm:$0xff] }
 0x354   :  { %v3935_v8 = vpop.eup %3934  ;;  %3698 = vmatpush3.msra.mxu1 %v760_v58  ;;  %3699 = vmatprep.mubr.msk.f32.mxu1 %vm3977_vm1, %v3976_v6 }
 0x355   :  { %3707 = vmatprep.subr.mxu1 %v3976_v6  ;;  %v758_v9 = vmul.f32 %v3935_v8, %v4226_v35  ;;  %v1628_v8 = vld [vmem:[%s4598_s8 + $0x8] sm:$0xff] }
 0x357   :  { %3700 = vmatmul.mubr.msk.f32.vlgmr.msra.gmra.mxu1 %vm166_vm2, %v758_v9  ;;  %v1627_v9 = vld [vmem:[%s4598_s8] sm:$0xff] }
 0x358   :  { %3708 = vmatpush3.msra.mxu1 %v947_v12  ;;  %3709 = vmatprep.mubr.msk.f32.mxu1 %vm3977_vm1, %v3976_v6  ;;  %v3499_v12 = vld [vmem:[%s4599_s7] ss:$0 sm:$0xff] }
 0x359   :  { %3717 = vmatprep.subr.mxu1 %v3976_v6 }
 0x377   :  { %v943_v14 = vpop.xlane.xlu1 %942 }
 0x378   :  { %3936 = vrcp.f32 %v943_v14 }
 0x37b   :  { %v1277_v15 = vpop.xlane.xlu1 %1276  ;;  %v1110_v16 = vpop.xlane.xlu0 %1109 }
 0x37c   :  { %3938 = vrcp.f32 %v1110_v16 }
 0x37d   :  { %3940 = vrcp.f32 %v1277_v15 }
 0x37f   :  { %v1444_v17 = vpop.xlane.xlu1 %1443  ;;  %v1281_v23 = vpop.permute.xlu0 %1280 }
 0x380   :  { %3942 = vrcp.f32 %v1444_v17 }
 0x383   :  { %v1448_v26 = vpop.permute.xlu1 %1447 }
 0x385   :  { %v3937_v18 = vpop.eup %3936 }
 0x386   :  { %v945_v19 = vmul.f32 %v3937_v18, %v3921_v50 }
 0x388   :  { %3710 = vmatmul.mubr.msk.f32.vlgmr.msra.gmra.mxu1 %vm166_vm2, %v945_v19 }
 0x389   :  { %3718 = vmatpush3.msra.mxu1 %v1114_v13  ;;  %3719 = vmatprep.mubr.msk.f32.mxu1 %vm3977_vm1, %v3976_v6  ;;  %v3939_v20 = vpop.eup %3938 }
 0x38a   :  { %3727 = vmatprep.subr.mxu1 %v3976_v6  ;;  %v1112_v21 = vmul.f32 %v3939_v20, %v4234_v51  ;;  %v3941_v22 = vpop.eup %3940  ;;  %v3505_v20 = vld [vmem:[%s4600_s11] ss:$0 sm:$0xff] }
 0x38b   :  { %v1279_v24 = vmul.f32 %v3941_v22, %v4237_v53 }
 0x38c   :  { %3720 = vmatmul.mubr.msk.f32.vlgmr.msra.gmra.mxu1 %vm166_vm2, %v1112_v21 }
 0x38d   :  { %3728 = vmatpush3.msra.mxu1 %v1281_v23  ;;  %3729 = vmatprep.mubr.msk.f32.mxu1 %vm3977_vm1, %v3976_v6  ;;  %v3943_v25 = vpop.eup %3942 }
 0x38e   :  { %3737 = vmatprep.subr.mxu1 %v3976_v6  ;;  %v1446_v27 = vmul.f32 %v3943_v25, %v4243_v56 }
 0x390   :  { %3730 = vmatmul.mubr.msk.f32.vlgmr.msra.gmra.mxu1 %vm166_vm2, %v1279_v24 }
 0x391   :  { %3738 = vmatpush3.msra.mxu1 %v1448_v26  ;;  %3739 = vmatprep.mubr.msk.f32.mxu1 %vm3977_vm1, %v3976_v6 }
 0x392   :  { %3753 = vmatprep.subr.mxu1 %v1630_v4 }
 0x394   :  { %3740 = vmatmul.mubr.msk.f32.vlgmr.msra.gmra.mxu1 %vm166_vm2, %v1446_v27 }
 0x395   :  { %3754 = vmatpush3.msra.mxu1 %v1630_v4 }
 0x396   :  { %3755 = vmatprep.subr.mxu1 %v1629_v7 }
 0x397   :  { %3756 = vmatpush3.msra.mxu1 %v1629_v7 }
 0x398   :  { %3757 = vmatprep.subr.mxu1 %v1628_v8 }
 0x399   :  { %3758 = vmatpush3.msra.mxu1 %v1628_v8 }
 0x39a   :  { %3759 = vmatprep.subr.mxu1 %v1627_v9 }
 0x39b   :  { %3760 = vmatpush3.msra.mxu1 %v1627_v9 }
 0x39c   :  { %3775 = vmatprep.subr.mxu1 %v3976_v6 }
 0x40b   :  { %v330_v30 = vpop.f32.mrf.mxu1 }
 0x40d   :  { %v3671_v10 = vpop.f32.mrf.mxu1 }
 0x40e   :  { %v3502_v10 = vld [vmem:[%s4601_s9] ss:$0 sm:$0xff] }
 0x40f   :  { %v497_v31 = vpop.f32.mrf.mxu1 }
 0x410   :  { %836 = vrot.lane.b32.xlu0 %v497_v31, %s3989_s26 }
 0x411   :  { %v3681_v32 = vpop.f32.mrf.mxu1 }
 0x413   :  { %v664_v33 = vpop.f32.mrf.mxu1 }
 0x414   :  { %840 = vrot.lane.b32.xlu1 %v664_v33, %s3990_s27 }
 0x415   :  { %v3691_v34 = vpop.f32.mrf.mxu1 }
 0x417   :  { %v831_v35 = vpop.f32.mrf.mxu1 }
 0x418   :  { %844 = vrot.lane.b32.xlu1 %v831_v35, %s3991_s28 }
 0x419   :  { %v3701_v36 = vpop.f32.mrf.mxu1 }
 0x448   :  { %v1018_v41 = vpop.f32.mrf.mxu1 }
 0x44a   :  { %v3711_v42 = vpop.f32.mrf.mxu1 }
 0x44c   :  { %v1185_v44 = vpop.f32.mrf.mxu1 }
 0x44d   :  { %1524 = vrot.lane.b32.xlu0 %v1185_v44, %s3989_s26 }
 0x44e   :  { %v3721_v45 = vpop.f32.mrf.mxu1 }
 0x450   :  { %v1352_v47 = vpop.f32.mrf.mxu1 }
 0x451   :  { %1528 = vrot.lane.b32.xlu0 %v1352_v47, %s3990_s27 }
 0x452   :  { %v3731_v48 = vpop.f32.mrf.mxu1 }
 0x454   :  { %v1519_v49 = vpop.f32.mrf.mxu1 }
 0x455   :  { %1532 = vrot.lane.b32.xlu1 %v1519_v49, %s3991_s28 }
 0x456   :  { %v3741_v50 = vpop.f32.mrf.mxu1 }
 0x482   :  { %v837_v51 = vpop.permute.xlu0 %836 }
 0x483   :  { %v847_v53 = vsel %vm166_vm2, %v330_v30, %v837_v51 }
 0x486   :  { %v841_v52 = vpop.permute.xlu1 %840 }
 0x487   :  { %v849_v54 = vsel %vm848_vm3, %v847_v53, %v841_v52 }
 0x48a   :  { %v845_v55 = vpop.permute.xlu1 %844 }
 0x48b   :  { %v851_v56 = vsel %vm850_vm4, %v849_v54, %v845_v55 }
 0x48c   :  { %3750 = vmatprep.mubr.msk.f32.mxu0 %vm76_vm0, %v851_v56 }
 0x4bf   :  { %v1525_v57 = vpop.permute.xlu0 %1524 }
 0x4c0   :  { %v1535_v59 = vsel %vm166_vm2, %v1018_v41, %v1525_v57  ;;  %v63_v41 = vld [vmem:[%s4602_s2] sm:$0x3]  ;;  %s4622_s2 = smov 72  }
 0x4c1   :  { %v1896_v42 = vrot.slane %v63_v41, %v244_v29 }
 0x4c3   :  { %v1529_v58 = vpop.permute.xlu0 %1528 }
 0x4c4   :  { %v1536_v60 = vsel %vm848_vm3, %v1535_v59, %v1529_v58 }
 0x4c7   :  { %v1533_v61 = vpop.permute.xlu1 %1532 }
 0x4c8   :  { %v1537_v63 = vsel %vm850_vm4, %v1536_v60, %v1533_v61 }
 0x4c9   :  { %3751 = vmatmul.mubr.msk.f32.vlgmr.msra.gmra.mxu0 %vm76_vm0, %v1537_v63 }
 0x4ca   :  { %3765 = vmatpush3.msra.mxu0 %v1722_v43  ;;  %3772 = vmatprep.mubr.msk.f32.mxu0 %vm76_vm0, %v61_v62  ;;  %v2581_v62 = vrot.slane %v63_v41, %v932_v46 }
 0x4cb   :  { %3766 = vmatprep.subr.mxu0 %v1721_v0 }
 0x4cc   :  { %3767 = vmatpush3.msra.mxu0 %v1721_v0 }
 0x4cd   :  { %3768 = vmatprep.subr.mxu0 %v1720_v1 }
 0x4ce   :  { %3769 = vmatpush3.msra.mxu0 %v1720_v1 }
 0x4cf   :  { %3770 = vmatprep.subr.mxu0 %v1719_v3 }
 0x4d0   :  { %3771 = vmatpush3.msra.mxu0 %v1719_v3 }
 0x4d1   :  { %3773 = vmatmul.mubr.msk.f32.vlgmr.msra.gmra.mxu0 %vm76_vm0, %v62_v11  ;;  %3785 = vmatprep.subr.mxu0 %v3976_v6 }
 0x4d2   :  { %3787 = vmatprep.mubr.msk.f32.mxu0 %vm3977_vm1, %v3976_v6 }
 0x589   :  { %v3752_v13 = vpop.f32.mrf.mxu0 }
 0x58a   :  { %v1622_v14 = vadd.f32 %v3752_v13, %v3499_v12 }
 0x58b   :  { %v1616_v15 = vpop.f32.mrf.mxu0 }
 0x58c   :  { %v1617_v16 = vadd.f32 %v3499_v12, %v1616_v15  ;;  %v4353_v18 = vadd.f32 %v1622_v14, %v4109_v5 }
 0x58e   :  { %v4350_v17 = vadd.f32 %v1617_v16, %v4096_v2 }
 0x590   :  { %3761 = vmatprep.mubr.msk.f32.mxu1 %vm76_vm0, %v4350_v17 }
 0x591   :  { %3762 = vmatmul.mubr.msk.f32.vlgmr.msra.gmra.mxu1 %vm76_vm0, %v4353_v18  ;;  %v3774_v19 = vpop.f32.mrf.mxu0 }
 0x592   :  { %3777 = vmatprep.mubr.msk.f32.mxu1 %vm3977_vm1, %v3976_v6  ;;  %v4373_v5 = vadd.f32 %v3774_v19, %v3505_v20 }
 0x593   :  { %v1802_v21 = vpop.f32.mrf.mxu0 }
 0x594   :  { %v4364_v2 = vadd.f32 %v3505_v20, %v1802_v21 }
 0x596   :  { %1987 = vrot.lane.b32.xlu0 %v4364_v2, %s3978_s29  ;;  %3776 = vmatpush3.xpose.msk.msra.mxu1 %vm166_vm2, %v4364_v2 }
 0x597   :  { %3780 = vmatprep.subr.mxu1 %v3976_v6 }
 0x59a   :  { %2154 = vrot.lane.b32.xlu0 %v4364_v2, %s3983_s20 }
 0x59e   :  { %2321 = vrot.lane.b32.xlu0 %v4364_v2, %s3984_s21 }
 0x5a2   :  { %2672 = vrot.lane.b32.xlu0 %v4373_v5, %s3978_s29 }
 0x5a6   :  { %2839 = vrot.lane.b32.xlu0 %v4373_v5, %s3983_s20 }
 0x5aa   :  { %3006 = vrot.lane.b32.xlu0 %v4373_v5, %s3984_s21 }
 0x5ae   :  { %1909 = vrot.lane.b32.xlu0 %v4364_v2, %s3979_s30 }
 0x608   :  { %v1988_v22 = vpop.permute.xlu0 %1987 }
 0x609   :  { %3786 = vmatpush3.xpose.msk.msra.mxu0 %vm166_vm2, %v1988_v22 }
 0x60a   :  { %3795 = vmatprep.subr.mxu0 %v3976_v6 }
 0x60c   :  { %v2155_v23 = vpop.permute.xlu0 %2154 }
 0x610   :  { %v2322_v24 = vpop.permute.xlu0 %2321 }
 0x614   :  { %v2673_v25 = vpop.permute.xlu0 %2672 }
 0x618   :  { %v2840_v26 = vpop.permute.xlu0 %2839 }
 0x61c   :  { %v3007_v27 = vpop.permute.xlu0 %3006 }
 0x620   :  { %v1910_v33 = vpop.permute.xlu0 %1909 }
 0x651   :  { %v3763_v30 = vpop.f32.mrf.mxu1 }
 0x652   :  { %v1716_v34 = vadd.f32 %v3763_v30, %v3502_v10 }
 0x653   :  { %v1710_v31 = vpop.f32.mrf.mxu1 }
 0x654   :  { %v1711_v32 = vadd.f32 %v3502_v10, %v1710_v31 }
 0x656   :  { %1985 = vrot.lane.b32.xlu1 %v1711_v32, %s3978_s29  ;;  %3778 = vmatmul.mubr.msk.f32.vlgmr.msra.gmra.mxu1 %vm166_vm2, %v1711_v32 }
 0x657   :  { %3781 = vmatpush3.msra.mxu1 %v1910_v33  ;;  %3782 = vmatprep.mubr.msk.f32.mxu1 %vm3977_vm1, %v3976_v6 }
 0x658   :  { %3790 = vmatprep.subr.mxu1 %v3976_v6 }
 0x65a   :  { %2152 = vrot.lane.b32.xlu1 %v1711_v32, %s3983_s20 }
 0x65e   :  { %2319 = vrot.lane.b32.xlu1 %v1711_v32, %s3984_s21 }
 0x662   :  { %2670 = vrot.lane.b32.xlu1 %v1716_v34, %s3978_s29 }
 0x666   :  { %2837 = vrot.lane.b32.xlu1 %v1716_v34, %s3983_s20  ;;  %s4623_s20 = smov 80  }
 0x66a   :  { %3004 = vrot.lane.b32.xlu1 %v1716_v34, %s3984_s21 }
 0x66e   :  { %2076 = vrot.lane.b32.xlu1 %v4364_v2, %s3981_s19 }
 0x6c8   :  { %v1986_v35 = vpop.permute.xlu1 %1985 }
 0x6c9   :  { %3788 = vmatmul.mubr.msk.f32.vlgmr.msra.gmra.mxu0 %vm166_vm2, %v1986_v35 }
 0x6ca   :  { %3796 = vmatpush3.xpose.msk.msra.mxu0 %vm166_vm2, %v2155_v23  ;;  %3797 = vmatprep.mubr.msk.f32.mxu0 %vm3977_vm1, %v3976_v6 }
 0x6cb   :  { %3805 = vmatprep.subr.mxu0 %v3976_v6 }
 0x6cc   :  { %v2153_v36 = vpop.permute.xlu1 %2152 }
 0x6cd   :  { %3798 = vmatmul.mubr.msk.f32.vlgmr.msra.gmra.mxu0 %vm166_vm2, %v2153_v36 }
 0x6ce   :  { %3806 = vmatpush3.xpose.msk.msra.mxu0 %vm166_vm2, %v2322_v24  ;;  %3807 = vmatprep.mubr.msk.f32.mxu0 %vm3977_vm1, %v3976_v6 }
 0x6cf   :  { %3815 = vmatprep.subr.mxu0 %v3976_v6 }
 0x6d0   :  { %v2320_v37 = vpop.permute.xlu1 %2319 }
 0x6d1   :  { %3808 = vmatmul.mubr.msk.f32.vlgmr.msra.gmra.mxu0 %vm166_vm2, %v2320_v37 }
 0x6d2   :  { %3816 = vmatpush3.xpose.msk.msra.mxu0 %vm166_vm2, %v4373_v5  ;;  %3817 = vmatprep.mubr.msk.f32.mxu0 %vm3977_vm1, %v3976_v6 }
 0x6d3   :  { %3825 = vmatprep.subr.mxu0 %v3976_v6 }
 0x6d4   :  { %v2671_v38 = vpop.permute.xlu1 %2670 }
 0x6d5   :  { %3818 = vmatmul.mubr.msk.f32.vlgmr.msra.gmra.mxu0 %vm166_vm2, %v1716_v34 }
 0x6d6   :  { %3826 = vmatpush3.xpose.msk.msra.mxu0 %vm166_vm2, %v2673_v25  ;;  %3827 = vmatprep.mubr.msk.f32.mxu0 %vm3977_vm1, %v3976_v6 }
 0x6d7   :  { %3835 = vmatprep.subr.mxu0 %v3976_v6 }
 0x6d8   :  { %v2838_v39 = vpop.permute.xlu1 %2837 }
 0x6d9   :  { %3828 = vmatmul.mubr.msk.f32.vlgmr.msra.gmra.mxu0 %vm166_vm2, %v2671_v38 }
 0x6da   :  { %3836 = vmatpush3.xpose.msk.msra.mxu0 %vm166_vm2, %v2840_v26  ;;  %3837 = vmatprep.mubr.msk.f32.mxu0 %vm3977_vm1, %v3976_v6 }
 0x6db   :  { %3845 = vmatprep.subr.mxu0 %v3976_v6 }
 0x6dc   :  { %v3005_v40 = vpop.permute.xlu1 %3004 }
 0x6dd   :  { %3838 = vmatmul.mubr.msk.f32.vlgmr.msra.gmra.mxu0 %vm166_vm2, %v2838_v39 }
 0x6de   :  { %3846 = vmatpush3.xpose.msk.msra.mxu0 %vm166_vm2, %v3007_v27  ;;  %3847 = vmatprep.mubr.msk.f32.mxu0 %vm3977_vm1, %v3976_v6 }
 0x6e0   :  { %v2077_v10 = vpop.permute.xlu1 %2076 }
 0x6e1   :  { %3848 = vmatmul.mubr.msk.f32.vlgmr.msra.gmra.mxu0 %vm166_vm2, %v3005_v40 }
 0x716   :  { %v1888_v43 = vpop.f32.mrf.mxu1 }
 0x717   :  { %v1892_v44 = vmul.f32 0.35355338, %v1888_v43 }
 0x718   :  { %v3779_v45 = vpop.f32.mrf.mxu1 }
 0x719   :  { %v1897_v47 = vadd.f32 %v1896_v42, %v1892_v44 }
 0x71b   :  { %v1898_v48 = vsel %vm166_vm2, %v1897_v47, -inf }
 0x71c   :  { %1899 = vmax.xlane.f32.xlu0 %v1898_v48 }
 0x789   :  { %v2059_v49 = vpop.f32.mrf.mxu0 }
 0x78a   :  { %v2063_v50 = vmul.f32 0.35355338, %v2059_v49 }
 0x78b   :  { %v3789_v51 = vpop.f32.mrf.mxu0 }
 0x78c   :  { %v2064_v52 = vadd.f32 %v2063_v50, %v1896_v42 }
 0x78d   :  { %v2226_v53 = vpop.f32.mrf.mxu0 }
 0x78e   :  { %v2230_v54 = vmul.f32 0.35355338, %v2226_v53  ;;  %v2065_v55 = vsel %vm166_vm2, %v2064_v52, -inf }
 0x78f   :  { %2066 = vmax.xlane.f32.xlu1 %v2065_v55  ;;  %v3799_v56 = vpop.f32.mrf.mxu0 }
 0x790   :  { %v2231_v57 = vadd.f32 %v2230_v54, %v1896_v42 }
 0x791   :  { %v2393_v58 = vpop.f32.mrf.mxu0 }
 0x792   :  { %v2397_v29 = vmul.f32 0.35355338, %v2393_v58  ;;  %v2232_v59 = vsel %vm166_vm2, %v2231_v57, -inf }
 0x793   :  { %v3809_v60 = vpop.f32.mrf.mxu0  ;;  %2233 = vmax.xlane.f32.xlu0 %v2232_v59 }
 0x794   :  { %v2398_v61 = vadd.f32 %v2397_v29, %v1896_v42 }
 0x795   :  { %v2573_v63 = vpop.f32.mrf.mxu0 }
 0x796   :  { %v2577_v0 = vmul.f32 0.35355338, %v2573_v63  ;;  %v2399_v1 = vsel %vm166_vm2, %v2398_v61, -inf }
 0x797   :  { %v3819_v3 = vpop.f32.mrf.mxu0  ;;  %2400 = vmax.xlane.f32.xlu0 %v2399_v1 }
 0x798   :  { %v2582_v11 = vadd.f32 %v2581_v62, %v2577_v0 }
 0x799   :  { %v2744_v4 = vpop.f32.mrf.mxu0 }
 0x79a   :  { %v2748_v7 = vmul.f32 0.35355338, %v2744_v4  ;;  %v2583_v8 = vsel %vm166_vm2, %v2582_v11, -inf }
 0x79b   :  { %2584 = vmax.xlane.f32.xlu1 %v2583_v8  ;;  %v3829_v9 = vpop.f32.mrf.mxu0 }
 0x79c   :  { %v2749_v12 = vadd.f32 %v2748_v7, %v2581_v62 }
 0x79d   :  { %v2911_v13 = vpop.f32.mrf.mxu0 }
 0x79e   :  { %v2915_v14 = vmul.f32 0.35355338, %v2911_v13  ;;  %v2750_v15 = vsel %vm166_vm2, %v2749_v12, -inf }
 0x79f   :  { %v3839_v28 = vpop.f32.mrf.mxu0  ;;  %2751 = vmax.xlane.f32.xlu0 %v2750_v15 }
 0x7a0   :  { %v2916_v46 = vadd.f32 %v2915_v14, %v2581_v62 }
 0x7a1   :  { %v3078_v16 = vpop.f32.mrf.mxu0 }
 0x7a2   :  { %v3082_v19 = vmul.f32 0.35355338, %v3078_v16  ;;  %v2917_v20 = vsel %vm166_vm2, %v2916_v46, -inf }
 0x7a3   :  { %2918 = vmax.xlane.f32.xlu1 %v2917_v20  ;;  %v3849_v21 = vpop.f32.mrf.mxu0 }
 0x7a4   :  { %v3083_v22 = vadd.f32 %v3082_v19, %v2581_v62 }
 0x7a5   :  { %v1900_v24 = vpop.xlane.xlu0 %1899 }
 0x7a6   :  { %v3084_v23 = vsel %vm166_vm2, %v3083_v22, -inf  ;;  %v1901_v25 = vsub.f32 %v1897_v47, %v1900_v24 }
 0x7a7   :  { %3085 = vmax.xlane.f32.xlu0 %v3084_v23 }
 0x7a8   :  { %v1902_v26 = vmul.f32 1.442695, %v1901_v25 }
 0x7aa   :  { %3944 = vpow2.f32 %v1902_v26 }
 0x7b4   :  { %2410 = vrot.lane.b32.xlu1 %v4364_v2, %s4622_s2 }
 0x7b7   :  { %v3945_v27 = vpop.eup %3944 }
 0x7b8   :  { %v1904_v30 = vsel %vm166_vm2, %v3945_v27, 0.0 }
 0x7bd   :  { %2243 = vrot.lane.b32.xlu0 %v4364_v2, %s4623_s20 }
 0x7d8   :  { %1905 = vadd.xlane.f32.xlu1 %v1904_v30 }
 0x818   :  { %v2067_v31 = vpop.xlane.xlu1 %2066 }
 0x819   :  { %v2068_v32 = vsub.f32 %v2064_v52, %v2067_v31 }
 0x81b   :  { %v2069_v33 = vmul.f32 1.442695, %v2068_v32 }
 0x81c   :  { %v2234_v34 = vpop.xlane.xlu0 %2233 }
 0x81d   :  { %3946 = vpow2.f32 %v2069_v33  ;;  %v2235_v35 = vsub.f32 %v2231_v57, %v2234_v34 }
 0x81f   :  { %v2236_v36 = vmul.f32 1.442695, %v2235_v35 }
 0x820   :  { %v2401_v37 = vpop.xlane.xlu0 %2400 }
 0x821   :  { %3948 = vpow2.f32 %v2236_v36  ;;  %v2402_v38 = vsub.f32 %v2398_v61, %v2401_v37 }
 0x823   :  { %v2403_v39 = vmul.f32 1.442695, %v2402_v38 }
 0x824   :  { %v2585_v45 = vpop.xlane.xlu1 %2584 }
 0x825   :  { %3950 = vpow2.f32 %v2403_v39  ;;  %v2586_v47 = vsub.f32 %v2582_v11, %v2585_v45 }
 0x827   :  { %v2587_v51 = vmul.f32 1.442695, %v2586_v47 }
 0x828   :  { %v2752_v48 = vpop.xlane.xlu0 %2751 }
 0x829   :  { %v2753_v50 = vsub.f32 %v2749_v12, %v2752_v48  ;;  %3952 = vpow2.f32 %v2587_v51 }
 0x82a   :  { %v3947_v2 = vpop.eup %3946 }
 0x82b   :  { %v2071_v40 = vsel %vm166_vm2, %v3947_v2, 0.0  ;;  %v2754_v54 = vmul.f32 1.442695, %v2753_v50 }
 0x82c   :  { %2072 = vadd.xlane.f32.xlu0 %v2071_v40  ;;  %v2919_v49 = vpop.xlane.xlu1 %2918 }
 0x82d   :  { %v2920_v52 = vsub.f32 %v2916_v46, %v2919_v49  ;;  %3954 = vpow2.f32 %v2754_v54 }
 0x82e   :  { %v3949_v41 = vpop.eup %3948 }
 0x82f   :  { %v2238_v42 = vsel %vm166_vm2, %v3949_v41, 0.0  ;;  %v2921_v55 = vmul.f32 1.442695, %v2920_v52 }
 0x830   :  { %2239 = vadd.xlane.f32.xlu1 %v2238_v42  ;;  %v3086_v53 = vpop.xlane.xlu0 %3085  ;;  %v2411_v58 = vpop.permute.xlu1 %2410  ;;  %v1813_v42 = vld [vmem:[%s4603_s12 + $0x10] sm:$0xff] }
 0x831   :  { %v3087_v56 = vsub.f32 %v3083_v22, %v3086_v53  ;;  %3956 = vpow2.f32 %v2921_v55 }
 0x832   :  { %v4455_v43 = vpop.eup %3950 }
 0x833   :  { %v2405_v44 = vsel %vm166_vm2, %v4455_v43, 0.0  ;;  %v3088_v57 = vmul.f32 1.442695, %v3087_v56 }
 0x834   :  { %2406 = vadd.xlane.f32.xlu0 %v2405_v44  ;;  %v2244_v7 = vpop.permute.xlu0 %2243  ;;  %v1811_v44 = vld [vmem:[%s4603_s12] sm:$0xff] }
 0x835   :  { %3958 = vpow2.f32 %v3088_v57 }
 0x836   :  { %v3953_v29 = vpop.eup %3952 }
 0x837   :  { %v2589_v61 = vsel %vm166_vm2, %v3953_v29, 0.0 }
 0x83a   :  { %v3955_v60 = vpop.eup %3954 }
 0x83b   :  { %v2756_v0 = vsel %vm166_vm2, %v3955_v60, 0.0 }
 0x83e   :  { %v4464_v62 = vpop.eup %3956 }
 0x83f   :  { %v2923_v63 = vsel %vm166_vm2, %v4464_v62, 0.0 }
 0x841   :  { %2761 = vrot.lane.b32.xlu1 %v4373_v5, %s3981_s19 }
 0x842   :  { %v4469_v1 = vpop.eup %3958 }
 0x843   :  { %v3090_v3 = vsel %vm166_vm2, %v4469_v1, 0.0 }
 0x84a   :  { %2594 = vrot.lane.b32.xlu0 %v4373_v5, %s3979_s30 }
 0x861   :  { %v1906_v59 = vpop.xlane.xlu1 %1905 }
 0x862   :  { %3960 = vrcp.f32 %v1906_v59 }
 0x865   :  { %2590 = vadd.xlane.f32.xlu1 %v2589_v61 }
 0x869   :  { %2924 = vadd.xlane.f32.xlu1 %v2923_v63  ;;  %2757 = vadd.xlane.f32.xlu0 %v2756_v0 }
 0x86d   :  { %3091 = vadd.xlane.f32.xlu1 %v3090_v3  ;;  %v3277_v3 = vld [vmem:[%s4604_s14 + $0x10] sm:$0xff] }
 0x86f   :  { %v3961_v11 = vpop.eup %3960 }
 0x870   :  { %v1908_v4 = vmul.f32 %v3961_v11, %v3945_v27  ;;  %v3276_v11 = vld [vmem:[%s4604_s14 + $0x8] sm:$0xff] }
 0x872   :  { %3783 = vmatmul.mubr.msk.f32.vlgmr.msra.gmra.mxu1 %vm166_vm2, %v1908_v4  ;;  %v3275_v4 = vld [vmem:[%s4604_s14] sm:$0xff] }
 0x873   :  { %3791 = vmatpush3.msra.mxu1 %v2077_v10  ;;  %3792 = vmatprep.mubr.msk.f32.mxu1 %vm3977_vm1, %v3976_v6 }
 0x874   :  { %3800 = vmatprep.subr.mxu1 %v3976_v6 }
 0x87e   :  { %3095 = vrot.lane.b32.xlu1 %v4373_v5, %s4622_s2 }
 0x87f   :  { %2928 = vrot.lane.b32.xlu0 %v4373_v5, %s4623_s20 }
 0x8b5   :  { %v2073_v8 = vpop.xlane.xlu0 %2072 }
 0x8b6   :  { %3962 = vrcp.f32 %v2073_v8  ;;  %v3286_v8 = vld [vmem:[%s4605_s16 + $0x30] sm:$0xff] }
 0x8b9   :  { %v2240_v9 = vpop.xlane.xlu1 %2239 }
 0x8ba   :  { %3964 = vrcp.f32 %v2240_v9  ;;  %v3285_v9 = vld [vmem:[%s4605_s16 + $0x28] sm:$0xff] }
 0x8bd   :  { %v2407_v12 = vpop.xlane.xlu0 %2406  ;;  %v2762_v19 = vpop.permute.xlu1 %2761 }
 0x8be   :  { %3966 = vrcp.f32 %v2407_v12  ;;  %v3284_v12 = vld [vmem:[%s4605_s16 + $0x20] sm:$0xff] }
 0x8c1   :  { %v2595_v16 = vpop.permute.xlu0 %2594 }
 0x8c3   :  { %v3963_v13 = vpop.eup %3962 }
 0x8c4   :  { %v2075_v14 = vmul.f32 %v3963_v13, %v3947_v2  ;;  %v3532_v13 = vld [vmem:[%s4606_s13] ss:$0 sm:$0xff] }
 0x8c6   :  { %3793 = vmatmul.mubr.msk.f32.vlgmr.msra.gmra.mxu1 %vm166_vm2, %v2075_v14 }
 0x8c7   :  { %v3965_v15 = vpop.eup %3964  ;;  %3801 = vmatpush3.msra.mxu1 %v2244_v7  ;;  %3802 = vmatprep.mubr.msk.f32.mxu1 %vm3977_vm1, %v3976_v6  ;;  %v3287_v7 = vld [vmem:[%s4605_s16 + $0x38] sm:$0xff] }
 0x8c8   :  { %3810 = vmatprep.subr.mxu1 %v3976_v6  ;;  %v2242_v28 = vmul.f32 %v3965_v15, %v3949_v41 }
 0x8ca   :  { %3803 = vmatmul.mubr.msk.f32.vlgmr.msra.gmra.mxu1 %vm166_vm2, %v2242_v28 }
 0x8cb   :  { %v3967_v5 = vpop.eup %3966  ;;  %3811 = vmatpush3.msra.mxu1 %v2411_v58  ;;  %3812 = vmatprep.mubr.msk.f32.mxu1 %vm3977_vm1, %v3976_v6 }
 0x8cc   :  { %3820 = vmatprep.subr.mxu1 %v3976_v6  ;;  %v2409_v46 = vmul.f32 %v3967_v5, %v4455_v43  ;;  %v1812_v43 = vld [vmem:[%s4603_s12 + $0x8] sm:$0xff] }
 0x8ce   :  { %3813 = vmatmul.mubr.msk.f32.vlgmr.msra.gmra.mxu1 %vm166_vm2, %v2409_v46 }
 0x8cf   :  { %3821 = vmatpush3.msra.mxu1 %v2595_v16  ;;  %3822 = vmatprep.mubr.msk.f32.mxu1 %vm3977_vm1, %v3976_v6 }
 0x8d0   :  { %3830 = vmatprep.subr.mxu1 %v3976_v6 }
 0x8ee   :  { %v2591_v20 = vpop.xlane.xlu1 %2590 }
 0x8ef   :  { %3968 = vrcp.f32 %v2591_v20  ;;  %v3282_v20 = vld [vmem:[%s4605_s16 + $0x10] sm:$0xff] }
 0x8f2   :  { %v2925_v21 = vpop.xlane.xlu1 %2924  ;;  %v2758_v22 = vpop.xlane.xlu0 %2757 }
 0x8f3   :  { %3970 = vrcp.f32 %v2758_v22 }
 0x8f4   :  { %3972 = vrcp.f32 %v2925_v21  ;;  %v3535_v21 = vld [vmem:[%s4607_s15] ss:$0 sm:$0xff] }
 0x8f6   :  { %v3092_v23 = vpop.xlane.xlu1 %3091  ;;  %v2929_v10 = vpop.permute.xlu0 %2928 }
 0x8f7   :  { %3974 = vrcp.f32 %v3092_v23 }
 0x8fa   :  { %v3096_v33 = vpop.permute.xlu1 %3095 }
 0x8fc   :  { %v3969_v24 = vpop.eup %3968 }
 0x8fd   :  { %v2593_v25 = vmul.f32 %v3969_v24, %v3953_v29 }
 0x8ff   :  { %3823 = vmatmul.mubr.msk.f32.vlgmr.msra.gmra.mxu1 %vm166_vm2, %v2593_v25 }
 0x900   :  { %3831 = vmatpush3.msra.mxu1 %v2762_v19  ;;  %3832 = vmatprep.mubr.msk.f32.mxu1 %vm3977_vm1, %v3976_v6  ;;  %v3971_v26 = vpop.eup %3970  ;;  %v3283_v19 = vld [vmem:[%s4605_s16 + $0x18] sm:$0xff] }
 0x901   :  { %3840 = vmatprep.subr.mxu1 %v3976_v6  ;;  %v2760_v27 = vmul.f32 %v3971_v26, %v3955_v60  ;;  %v3973_v30 = vpop.eup %3972 }
 0x902   :  { %v2927_v31 = vmul.f32 %v3973_v30, %v4464_v62  ;;  %v3538_v30 = vld [vmem:[%s4608_s17] ss:$0 sm:$0xff] }
 0x903   :  { %3833 = vmatmul.mubr.msk.f32.vlgmr.msra.gmra.mxu1 %vm166_vm2, %v2760_v27 }
 0x904   :  { %3841 = vmatpush3.msra.mxu1 %v2929_v10  ;;  %3842 = vmatprep.mubr.msk.f32.mxu1 %vm3977_vm1, %v3976_v6  ;;  %v3975_v32 = vpop.eup %3974 }
 0x905   :  { %3850 = vmatprep.subr.mxu1 %v3976_v6  ;;  %v3094_v34 = vmul.f32 %v3975_v32, %v4469_v1  ;;  %v3278_v1 = vld [vmem:[%s4604_s14 + $0x18] sm:$0xff] }
 0x907   :  { %3843 = vmatmul.mubr.msk.f32.vlgmr.msra.gmra.mxu1 %vm166_vm2, %v2927_v31 }
 0x908   :  { %3851 = vmatpush3.msra.mxu1 %v3096_v33  ;;  %3852 = vmatprep.mubr.msk.f32.mxu1 %vm3977_vm1, %v3976_v6  ;;  %v1814_v6 = vld [vmem:[%s4603_s12 + $0x18] sm:$0xff] }
 0x909   :  { %3855 = vmatprep.subr.mxu0 %v1814_v6  ;;  %3866 = vmatprep.subr.mxu1 %v3278_v1 }
 0x90a   :  { %3856 = vmatpush3.msra.mxu0 %v1814_v6 }
 0x90b   :  { %3853 = vmatmul.mubr.msk.f32.vlgmr.msra.gmra.mxu1 %vm166_vm2, %v3094_v34  ;;  %3857 = vmatprep.subr.mxu0 %v1813_v42 }
 0x90c   :  { %3858 = vmatpush3.msra.mxu0 %v1813_v42  ;;  %3867 = vmatpush3.msra.mxu1 %v3278_v1 }
 0x90d   :  { %3859 = vmatprep.subr.mxu0 %v1812_v43  ;;  %3868 = vmatprep.subr.mxu1 %v3277_v3 }
 0x90e   :  { %3860 = vmatpush3.msra.mxu0 %v1812_v43  ;;  %3869 = vmatpush3.msra.mxu1 %v3277_v3 }
 0x90f   :  { %3861 = vmatprep.subr.mxu0 %v1811_v44  ;;  %3870 = vmatprep.subr.mxu1 %v3276_v11 }
 0x910   :  { %3862 = vmatpush3.msra.mxu0 %v1811_v44  ;;  %3871 = vmatpush3.msra.mxu1 %v3276_v11 }
 0x911   :  { %3872 = vmatprep.subr.mxu1 %v3275_v4  ;;  %3877 = vmatprep.subr.mxu0 %v3287_v7 }
 0x912   :  { %3873 = vmatpush3.msra.mxu1 %v3275_v4 }
 0x932   :  { %v1981_v35 = vpop.f32.mrf.mxu1 }
 0x934   :  { %v3784_v36 = vpop.f32.mrf.mxu1 }
 0x986   :  { %v2148_v37 = vpop.f32.mrf.mxu1 }
 0x987   :  { %2487 = vrot.lane.b32.xlu0 %v2148_v37, %s3989_s26 }
 0x988   :  { %v3794_v38 = vpop.f32.mrf.mxu1 }
 0x98a   :  { %v2315_v39 = vpop.f32.mrf.mxu1 }
 0x98b   :  { %2491 = vrot.lane.b32.xlu1 %v2315_v39, %s3990_s27 }
 0x98c   :  { %v3804_v2 = vpop.f32.mrf.mxu1 }
 0x98e   :  { %v2482_v40 = vpop.f32.mrf.mxu1 }
 0x98f   :  { %2495 = vrot.lane.b32.xlu1 %v2482_v40, %s3991_s28 }
 0x990   :  { %v3814_v41 = vpop.f32.mrf.mxu1 }
 0x9bf   :  { %v2666_v45 = vpop.f32.mrf.mxu1 }
 0x9c1   :  { %v3824_v47 = vpop.f32.mrf.mxu1 }
 0x9c3   :  { %v2833_v48 = vpop.f32.mrf.mxu1 }
 0x9c4   :  { %3172 = vrot.lane.b32.xlu0 %v2833_v48, %s3989_s26 }
 0x9c5   :  { %v3834_v49 = vpop.f32.mrf.mxu1 }
 0x9c7   :  { %v3000_v50 = vpop.f32.mrf.mxu1 }
 0x9c8   :  { %3176 = vrot.lane.b32.xlu0 %v3000_v50, %s3990_s27 }
 0x9c9   :  { %v3844_v51 = vpop.f32.mrf.mxu1 }
 0x9cb   :  { %v3167_v52 = vpop.f32.mrf.mxu1 }
 0x9cc   :  { %3180 = vrot.lane.b32.xlu1 %v3167_v52, %s3991_s28 }
 0x9cd   :  { %v3854_v53 = vpop.f32.mrf.mxu1 }
 0x9f9   :  { %v2488_v54 = vpop.permute.xlu0 %2487 }
 0x9fa   :  { %v2498_v56 = vsel %vm166_vm2, %v1981_v35, %v2488_v54 }
 0x9fd   :  { %v2492_v55 = vpop.permute.xlu1 %2491 }
 0x9fe   :  { %v2499_v57 = vsel %vm848_vm3, %v2498_v56, %v2492_v55 }
 0xa01   :  { %v2496_v58 = vpop.permute.xlu1 %2495 }
 0xa02   :  { %v2500_v29 = vsel %vm850_vm4, %v2499_v57, %v2496_v58 }
 0xa03   :  { %3863 = vmatprep.mubr.msk.f32.mxu0 %vm76_vm0, %v2500_v29 }
 0xa36   :  { %v3173_v59 = vpop.permute.xlu0 %3172 }
 0xa37   :  { %v3183_v61 = vsel %vm166_vm2, %v2666_v45, %v3173_v59 }
 0xa3a   :  { %v3177_v60 = vpop.permute.xlu0 %3176 }
 0xa3b   :  { %v3184_v62 = vsel %vm848_vm3, %v3183_v61, %v3177_v60 }
 0xa3e   :  { %v3181_v63 = vpop.permute.xlu1 %3180 }
 0xa3f   :  { %v3185_v0 = vsel %vm850_vm4, %v3184_v62, %v3181_v63 }
 0xa40   :  { %3864 = vmatmul.mubr.msk.f32.vlgmr.msra.gmra.mxu0 %vm76_vm0, %v3185_v0 }
 0xa41   :  { %3878 = vmatpush3.msra.mxu0 %v3287_v7 }
 0xa42   :  { %3879 = vmatprep.subr.mxu0 %v3286_v8 }
 0xa43   :  { %3880 = vmatpush3.msra.mxu0 %v3286_v8 }
 0xa44   :  { %3881 = vmatprep.subr.mxu0 %v3285_v9 }
 0xa45   :  { %3882 = vmatpush3.msra.mxu0 %v3285_v9 }
 0xa46   :  { %3883 = vmatprep.subr.mxu0 %v3284_v12 }
 0xa47   :  { %3884 = vmatpush3.msra.mxu0 %v3284_v12 }
 0xa48   :  { %3885 = vmatprep.subr.mxu0 %v3283_v19 }
 0xa49   :  { %3886 = vmatpush3.msra.mxu0 %v3283_v19 }
 0xa4a   :  { %3887 = vmatprep.subr.mxu0 %v3282_v20 }
 0xa4b   :  { %3888 = vmatpush3.msra.mxu0 %v3282_v20 }
 0xb00   :  { %v3865_v14 = vpop.f32.mrf.mxu0 }
 0xb01   :  { %v3270_v15 = vadd.f32 %v3865_v14, %v3532_v13 }
 0xb02   :  { %v3264_v28 = vpop.f32.mrf.mxu0 }
 0xb03   :  { %v3265_v5 = vadd.f32 %v3532_v13, %v3264_v28  ;;  %v3274_v16 = vadd.f32 %v3270_v15, %v4353_v18  ;;  %v3280_v18 = vld [vmem:[%s4605_s16] sm:$0xff] }
 0xb05   :  { %v3273_v46 = vadd.f32 %v3265_v5, %v4350_v17  ;;  %v3281_v17 = vld [vmem:[%s4605_s16 + $0x8] sm:$0xff] }
 0xb06   :  { %3889 = vmatprep.subr.mxu0 %v3281_v17 }
 0xb07   :  { %3874 = vmatprep.mubr.msk.f32.mxu1 %vm76_vm0, %v3273_v46  ;;  %3890 = vmatpush3.msra.mxu0 %v3281_v17 }
 0xb08   :  { %3875 = vmatmul.mubr.msk.f32.vlgmr.msra.gmra.mxu1 %vm76_vm0, %v3274_v16  ;;  %3891 = vmatprep.subr.mxu0 %v3280_v18 }
 0xb09   :  { %3892 = vmatpush3.msra.mxu0 %v3280_v18 }
 0xbc8   :  { %v3876_v22 = vpop.f32.mrf.mxu1 }
 0xbc9   :  { %v3373_v23 = vadd.f32 %v3876_v22, %v3535_v21 }
 0xbca   :  { %v3367_v24 = vpop.f32.mrf.mxu1 }
 0xbcb   :  { %v3368_v25 = vadd.f32 %v3535_v21, %v3367_v24  ;;  %v3377_v27 = vmax.f32 %v3373_v23, 0.0 }
 0xbcd   :  { %v3376_v26 = vmax.f32 %v3368_v25, 0.0 }
 0xbcf   :  { %3893 = vmatprep.mubr.msk.f32.mxu0 %vm3384_vm5, %v3376_v26 }
 0xbd0   :  { %3894 = vmatmul.mubr.msk.f32.vlgmr.msra.gmra.mxu0 %vm3384_vm5, %v3377_v27 }
 0xc90   :  { %v3895_v10 = vpop.f32.mrf.mxu0 }
 0xc91   :  { %v3463_v31 = vadd.f32 %v3895_v10, %v3538_v30 }
 0xc92   :  { %v3457_v32 = vpop.f32.mrf.mxu0 }
 0xc93   :  { %3467 = vst.msk [vmem:[%s4609_s18 + $0x8] sm:$0xff] %vm76_vm0, %v3463_v31  ;;  %v3458_v33 = vadd.f32 %v3538_v30, %v3457_v32 }
 0xc95   :  { %3466 = vst.msk [vmem:[%s4609_s18] sm:$0xff] %vm76_vm0, %v3458_v33 }

</bundles_post_ra>
